<compile_context>
chip_gen: v7x
topology: tpu7x:2x2x1
jax: 0.10.0
libtpu: 0.0.40
codegen_flags: <defaults>
</compile_context>

<pallas_src>
import functools
import math

import jax
import jax.numpy as jnp
from jax.experimental import pallas as pl
from jax.experimental.pallas import tpu as pltpu


# --------------------------------------------------------------------------
# Single fused kernel: LN1 + attention + proj + residual + LN2 + MLP + residual
# --------------------------------------------------------------------------
def _quadtree_block_kernel(x_ref, t_ref, g1_ref, b1_ref, wq_ref, wkv_ref,
                           wproj_ref, bproj_ref, g2_ref, b2_ref,
                           wfc1_ref, bfc1_ref, wdw_ref, bdw_ref,
                           wfc2_ref, bfc2_ref, o_ref, pad_ref,
                           *, num_heads, scale, H, W):
    x = x_ref[0].astype(jnp.float32)                     # (N, C)
    t = t_ref[0].astype(jnp.float32)                     # (M, C)

    def _ln(z, g, b):                                    # LayerNorm, eps = 1e-5
        mu = jnp.mean(z, axis=-1, keepdims=True)
        var = jnp.mean((z - mu) ** 2, axis=-1, keepdims=True)
        return (z - mu) * jax.lax.rsqrt(var + 1e-5) * g + b

    g1 = g1_ref[...].astype(jnp.float32)                 # (1, C)
    b1 = b1_ref[...].astype(jnp.float32)                 # (1, C)
    xn = _ln(x, g1, b1)
    tn = _ln(t, g1, b1)

    # qkv_bias=False -> no bias add at all.
    q = jnp.dot(xn, wq_ref[...], preferred_element_type=jnp.float32)    # (N, C)
    kv = jnp.dot(tn, wkv_ref[...], preferred_element_type=jnp.float32)  # (M, 2C)

    N, C = q.shape
    k = kv[:, :C]                                        # (M, C)
    v = kv[:, C:]                                        # (M, C)

    d = C // num_heads
    wproj = wproj_ref[...].astype(jnp.float32)           # (C, C)

    acc = jnp.zeros((N, C), jnp.float32)
    for h in range(num_heads):                           # static, in-kernel head loop
        qh = q[:, h * d:(h + 1) * d]                     # (N, d)
        kh = k[:, h * d:(h + 1) * d]                     # (M, d)
        vh = v[:, h * d:(h + 1) * d]                     # (M, d)
        s = jax.lax.dot_general(qh, kh, (((1,), (1,)), ((), ())),
                                preferred_element_type=jnp.float32) * scale
        s = s - jnp.max(s, axis=-1, keepdims=True)
        p = jnp.exp(s)
        p = p * pl.reciprocal(jnp.sum(p, axis=-1, keepdims=True), approx=True)
        oh = jnp.dot(p, vh, preferred_element_type=jnp.float32)          # (N, d)
        # Fold the output projection into the head loop:
        #   attn_out @ Wproj == sum_h  head_out_h @ Wproj[h*d:(h+1)*d, :]
        acc = acc + jnp.dot(oh, wproj[h * d:(h + 1) * d, :],
                            preferred_element_type=jnp.float32)

    x1 = x + acc + bproj_ref[...].astype(jnp.float32)    # residual 1

    # ---- MLP branch: LN2 + fc1 + ReLU + depthwise 3x3 conv + GELU + fc2 ----
    x2n = _ln(x1, g2_ref[...].astype(jnp.float32), b2_ref[...].astype(jnp.float32))

    h1 = jnp.dot(x2n, wfc1_ref[...], preferred_element_type=jnp.float32)
    h1 = jnp.maximum(h1 + bfc1_ref[...].astype(jnp.float32), 0.0)        # fc1 + ReLU
    hidden = h1.shape[-1]

    # Depthwise 3x3 conv, stride 1, pad 1.  Halo padding lives in a VMEM scratch
    # (no HBM round trip of the hidden activation).
    pad_ref[...] = jnp.zeros_like(pad_ref)
    pad_ref[1:H + 1, 1:W + 1, :] = h1.reshape(H, W, hidden)

    wdw = wdw_ref[...].astype(jnp.float32)               # (9, hidden)
    conv = jnp.zeros((H, W, hidden), jnp.float32)
    for ky in range(3):
        for kx in range(3):
            kidx = ky * 3 + kx
            wk_tap = wdw[kidx:kidx + 1, :].reshape(1, 1, hidden)
            conv = conv + pad_ref[ky:ky + H, kx:kx + W, :] * wk_tap
    conv = conv + bdw_ref[...].reshape(1, 1, hidden)

    # TODO(synk): exact erf GELU not used (tanh approximation).
    h2 = jax.nn.gelu(conv, approximate=True).reshape(H * W, hidden)

    y = (jnp.dot(h2, wfc2_ref[...], preferred_element_type=jnp.float32)
         + bfc2_ref[...].astype(jnp.float32))

    o_ref[0] = (x1 + y).astype(o_ref.dtype)              # residual 2


# --------------------------------------------------------------------------
# QuadtreeBlock forward (single fused pallas_call)
# --------------------------------------------------------------------------
def quadtree_block_forward(x, target, H, W, params):
    B, N, C = x.shape
    M = target.shape[1]
    nh = params["num_heads"]
    d = C // nh
    hidden = params["w_fc1"].shape[1]

    # Fuse Wk|Wv into one (C, 2C) weight: one matmul, wider lane output.
    wkv = jnp.concatenate([params["wk"], params["wv"]], axis=1)

    bcast2 = lambda shape: pl.BlockSpec(shape, lambda b: (0, 0))

    return pl.pallas_call(
        functools.partial(_quadtree_block_kernel,
                          num_heads=nh, scale=d ** -0.5, H=H, W=W),
        out_shape=jax.ShapeDtypeStruct((B, N, C), x.dtype),
        grid=(B,),
        in_specs=[
            pl.BlockSpec((1, N, C), lambda b: (b, 0, 0)),      # x
            pl.BlockSpec((1, M, C), lambda b: (b, 0, 0)),      # target
            bcast2((1, C)),                                    # gamma1
            bcast2((1, C)),                                    # beta1
            bcast2((C, C)),                                    # Wq
            bcast2((C, 2 * C)),                                # [Wk|Wv]
            bcast2((C, C)),                                    # Wproj
            bcast2((1, C)),                                    # bproj
            bcast2((1, C)),                                    # gamma2
            bcast2((1, C)),                                    # beta2
            bcast2((C, hidden)),                               # W_fc1
            bcast2((1, hidden)),                               # b_fc1
            bcast2((9, hidden)),                               # W_dw (3x3 depthwise)
            bcast2((1, hidden)),                               # b_dw
            bcast2((hidden, C)),                               # W_fc2
            bcast2((1, C)),                                    # b_fc2
        ],
        out_specs=pl.BlockSpec((1, N, C), lambda b: (b, 0, 0)),
        scratch_shapes=[pltpu.VMEM((H + 2, W + 2, hidden), jnp.float32)],
        compiler_params=pltpu.CompilerParams(dimension_semantics=("parallel",)),
    )(x, target,
      params["g1"].reshape(1, C), params["b1"].reshape(1, C),
      params["wq"], wkv, params["w_proj"], params["b_proj"].reshape(1, C),
      params["g2"].reshape(1, C), params["b2"].reshape(1, C),
      params["w_fc1"], params["b_fc1"].reshape(1, hidden),
      params["w_dw"], params["b_dw"].reshape(1, hidden),
      params["w_fc2"], params["b_fc2"].reshape(1, C))


# --------------------------------------------------------------------------
# Pure-JAX reference (same math, for a correctness check)
# --------------------------------------------------------------------------
def reference_forward(x, target, H, W, p):
    def ln(z, g, b):
        mu = z.mean(-1, keepdims=True)
        var = ((z - mu) ** 2).mean(-1, keepdims=True)
        return (z - mu) / jnp.sqrt(var + 1e-5) * g + b

    B, N, C = x.shape
    nh = p["num_heads"]
    d = C // nh
    xn = ln(x, p["g1"], p["b1"])
    tn = ln(target, p["g1"], p["b1"])
    q = (xn @ p["wq"]).reshape(B, N, nh, d).transpose(0, 2, 1, 3)
    k = (tn @ p["wk"]).reshape(B, -1, nh, d).transpose(0, 2, 1, 3)
    v = (tn @ p["wv"]).reshape(B, -1, nh, d).transpose(0, 2, 1, 3)
    s = jnp.einsum("bhnd,bhmd->bhnm", q, k) * (d ** -0.5)
    a = jax.nn.softmax(s, axis=-1)
    o = jnp.einsum("bhnm,bhmd->bhnd", a, v).transpose(0, 2, 1, 3).reshape(B, N, C)
    x1 = x + o @ p["w_proj"] + p["b_proj"]

    x2n = ln(x1, p["g2"], p["b2"])
    h = jnp.maximum(x2n @ p["w_fc1"] + p["b_fc1"], 0.0)
    hid = h.shape[-1]
    himg = h.reshape(B, H, W, hid)
    hp = jnp.pad(himg, ((0, 0), (1, 1), (1, 1), (0, 0)))
    conv = jnp.zeros_like(himg)
    for ky in range(3):
        for kx in range(3):
            conv = conv + hp[:, ky:ky + H, kx:kx + W, :] * p["w_dw"][ky * 3 + kx]
    conv = conv + p["b_dw"]
    g = jax.nn.gelu(conv, approximate=True).reshape(B, N, hid)
    y = g @ p["w_fc2"] + p["b_fc2"]
    return x1 + y


# --------------------------------------------------------------------------
# Deterministic parameter construction + driver
# --------------------------------------------------------------------------
if __name__ == "__main__":
    B, Himg, Wimg = 2, 8, 8
    dim, num_heads, mlp_ratio = 32, 4, 4.0
    N = Himg * Wimg
    hidden = int(dim * mlp_ratio)

    key = jax.random.PRNGKey(0)
    keys = jax.random.split(key, 10)

    def tnorm(k, shape, std=0.02):
        # trunc_normal_(std=0.02) approximated by normal (synthetic weights)
        return (std * jax.random.normal(k, shape)).astype(jnp.float32)

    params = {
        "num_heads": num_heads,
        # LayerNorm: weight=1, bias=0 (per _init_weights)
        "g1": jnp.ones((dim,), jnp.float32), "b1": jnp.zeros((dim,), jnp.float32),
        "g2": jnp.ones((dim,), jnp.float32), "b2": jnp.zeros((dim,), jnp.float32),
        # attention projections (qkv_bias=False default)
        "wq": tnorm(keys[0], (dim, dim)),
        "wk": tnorm(keys[1], (dim, dim)),
        "wv": tnorm(keys[2], (dim, dim)),
        "w_proj": tnorm(keys[3], (dim, dim)),
        "b_proj": jnp.zeros((dim,), jnp.float32),
        # MLP
        "w_fc1": tnorm(keys[4], (dim, hidden)),
        "b_fc1": jnp.zeros((hidden,), jnp.float32),
        # depthwise conv: fan_out = 3*3*hidden/hidden = 9, normal(0, sqrt(2/9))
        "w_dw": (math.sqrt(2.0 / 9.0)
                 * jax.random.normal(keys[5], (9, hidden))).astype(jnp.float32),
        "b_dw": jnp.zeros((hidden,), jnp.float32),
        "w_fc2": tnorm(keys[6], (hidden, dim)),
        "b_fc2": jnp.zeros((dim,), jnp.float32),
    }

    x = jax.random.normal(keys[7], (B, N, dim), jnp.float32)
    target = jax.random.normal(keys[8], (B, N, dim), jnp.float32)

    out = quadtree_block_forward(x, target, Himg, Wimg, params)
    out = jax.block_until_ready(out)
    assert out.shape == (B, N, dim) and out.dtype == jnp.float32

    ref = jax.block_until_ready(reference_forward(x, target, Himg, Wimg, params))
    err = float(jnp.max(jnp.abs(out - ref)))
    assert err < 1e-2, f"max abs err vs reference: {err}"
    print("KERNEL_OK")
</pallas_src>

<mosaic_0001>
module attributes {stable_mosaic.version = 11 : i64} {
  func.func @_quadtree_block_kernel(%arg0: i32, %arg1: memref<1x64x32xf32, #tpu.memory_space<vmem>>, %arg2: memref<1x64x32xf32, #tpu.memory_space<vmem>>, %arg3: memref<1x32xf32, #tpu.memory_space<vmem>>, %arg4: memref<1x32xf32, #tpu.memory_space<vmem>>, %arg5: memref<32x32xf32, #tpu.memory_space<vmem>>, %arg6: memref<32x64xf32, #tpu.memory_space<vmem>>, %arg7: memref<32x32xf32, #tpu.memory_space<vmem>>, %arg8: memref<1x32xf32, #tpu.memory_space<vmem>>, %arg9: memref<1x32xf32, #tpu.memory_space<vmem>>, %arg10: memref<1x32xf32, #tpu.memory_space<vmem>>, %arg11: memref<32x128xf32, #tpu.memory_space<vmem>>, %arg12: memref<1x128xf32, #tpu.memory_space<vmem>>, %arg13: memref<9x128xf32, #tpu.memory_space<vmem>>, %arg14: memref<1x128xf32, #tpu.memory_space<vmem>>, %arg15: memref<128x32xf32, #tpu.memory_space<vmem>>, %arg16: memref<1x32xf32, #tpu.memory_space<vmem>>, %arg17: memref<1x64x32xf32, #tpu.memory_space<vmem>>, %arg18: memref<10x10x128xf32, #tpu.memory_space<vmem>>) attributes {dimension_semantics = [#tpu.dimension_semantics<parallel>], iteration_bounds = array<i64: 2>, scalar_prefetch = 0 : i64, scratch_operands = 1 : i64, tpu.core_type = #tpu.core_type<tc>, window_params = [{transform_indices = @transform_0, window_bounds = array<i64: 1, 64, 32>}, {transform_indices = @transform_1, window_bounds = array<i64: 1, 64, 32>}, {pipeline_mode = #tpu.pipeline_mode<synchronous>, transform_indices = @transform_2, window_bounds = array<i64: 1, 32>}, {pipeline_mode = #tpu.pipeline_mode<synchronous>, transform_indices = @transform_3, window_bounds = array<i64: 1, 32>}, {pipeline_mode = #tpu.pipeline_mode<synchronous>, transform_indices = @transform_4, window_bounds = array<i64: 32, 32>}, {pipeline_mode = #tpu.pipeline_mode<synchronous>, transform_indices = @transform_5, window_bounds = array<i64: 32, 64>}, {pipeline_mode = #tpu.pipeline_mode<synchronous>, transform_indices = @transform_6, window_bounds = array<i64: 32, 32>}, {pipeline_mode = #tpu.pipeline_mode<synchronous>, transform_indices = @transform_7, window_bounds = array<i64: 1, 32>}, {pipeline_mode = #tpu.pipeline_mode<synchronous>, transform_indices = @transform_8, window_bounds = array<i64: 1, 32>}, {pipeline_mode = #tpu.pipeline_mode<synchronous>, transform_indices = @transform_9, window_bounds = array<i64: 1, 32>}, {pipeline_mode = #tpu.pipeline_mode<synchronous>, transform_indices = @transform_10, window_bounds = array<i64: 32, 128>}, {pipeline_mode = #tpu.pipeline_mode<synchronous>, transform_indices = @transform_11, window_bounds = array<i64: 1, 128>}, {pipeline_mode = #tpu.pipeline_mode<synchronous>, transform_indices = @transform_12, window_bounds = array<i64: 9, 128>}, {pipeline_mode = #tpu.pipeline_mode<synchronous>, transform_indices = @transform_13, window_bounds = array<i64: 1, 128>}, {pipeline_mode = #tpu.pipeline_mode<synchronous>, transform_indices = @transform_14, window_bounds = array<i64: 128, 32>}, {pipeline_mode = #tpu.pipeline_mode<synchronous>, transform_indices = @transform_15, window_bounds = array<i64: 1, 32>}, {transform_indices = @transform_16, window_bounds = array<i64: 1, 64, 32>}]} {
    %c0 = arith.constant 0 : index
    %c0_0 = arith.constant 0 : index
    %c0_1 = arith.constant 0 : index
    %0 = vector.load %arg1[%c0, %c0_0, %c0_1] : memref<1x64x32xf32, #tpu.memory_space<vmem>>, vector<1x64x32xf32>
    %1 = vector.shape_cast %0 : vector<1x64x32xf32> to vector<64x32xf32>
    %c0_2 = arith.constant 0 : index
    %c0_3 = arith.constant 0 : index
    %c0_4 = arith.constant 0 : index
    %2 = vector.load %arg2[%c0_2, %c0_3, %c0_4] : memref<1x64x32xf32, #tpu.memory_space<vmem>>, vector<1x64x32xf32>
    %3 = vector.shape_cast %2 : vector<1x64x32xf32> to vector<64x32xf32>
    %c0_5 = arith.constant 0 : index
    %c0_6 = arith.constant 0 : index
    %4 = vector.load %arg3[%c0_5, %c0_6] : memref<1x32xf32, #tpu.memory_space<vmem>>, vector<1x32xf32>
    %c0_7 = arith.constant 0 : index
    %c0_8 = arith.constant 0 : index
    %5 = vector.load %arg4[%c0_7, %c0_8] : memref<1x32xf32, #tpu.memory_space<vmem>>, vector<1x32xf32>
    %cst = arith.constant dense<0.000000e+00> : vector<64xf32>
    %6 = vector.multi_reduction <add>, %1, %cst [1] : vector<64x32xf32> to vector<64xf32>
    %7 = vector.shape_cast %6 : vector<64xf32> to vector<64x1xf32>
    %cst_9 = arith.constant 3.200000e+01 : f32
    %8 = vector.broadcast %cst_9 : f32 to vector<64x1xf32>
    %9 = arith.divf %7, %8 : vector<64x1xf32>
    %10 = vector.broadcast %9 : vector<64x1xf32> to vector<64x32xf32>
    %11 = arith.subf %1, %10 : vector<64x32xf32>
    %12 = arith.mulf %11, %11 : vector<64x32xf32>
    %cst_10 = arith.constant dense<0.000000e+00> : vector<64xf32>
    %13 = vector.multi_reduction <add>, %12, %cst_10 [1] : vector<64x32xf32> to vector<64xf32>
    %14 = vector.shape_cast %13 : vector<64xf32> to vector<64x1xf32>
    %cst_11 = arith.constant 3.200000e+01 : f32
    %15 = vector.broadcast %cst_11 : f32 to vector<64x1xf32>
    %16 = arith.divf %14, %15 : vector<64x1xf32>
    %17 = vector.broadcast %9 : vector<64x1xf32> to vector<64x32xf32>
    %18 = arith.subf %1, %17 : vector<64x32xf32>
    %cst_12 = arith.constant 9.99999974E-6 : f32
    %19 = vector.broadcast %cst_12 : f32 to vector<64x1xf32>
    %20 = arith.addf %16, %19 : vector<64x1xf32>
    %21 = math.rsqrt %20 : vector<64x1xf32>
    %22 = vector.broadcast %21 : vector<64x1xf32> to vector<64x32xf32>
    %23 = arith.mulf %18, %22 : vector<64x32xf32>
    %24 = vector.broadcast %4 : vector<1x32xf32> to vector<64x32xf32>
    %25 = arith.mulf %23, %24 : vector<64x32xf32>
    %26 = vector.broadcast %5 : vector<1x32xf32> to vector<64x32xf32>
    %27 = arith.addf %25, %26 : vector<64x32xf32>
    %cst_13 = arith.constant dense<0.000000e+00> : vector<64xf32>
    %28 = vector.multi_reduction <add>, %3, %cst_13 [1] : vector<64x32xf32> to vector<64xf32>
    %29 = vector.shape_cast %28 : vector<64xf32> to vector<64x1xf32>
    %cst_14 = arith.constant 3.200000e+01 : f32
    %30 = vector.broadcast %cst_14 : f32 to vector<64x1xf32>
    %31 = arith.divf %29, %30 : vector<64x1xf32>
    %32 = vector.broadcast %31 : vector<64x1xf32> to vector<64x32xf32>
    %33 = arith.subf %3, %32 : vector<64x32xf32>
    %34 = arith.mulf %33, %33 : vector<64x32xf32>
    %cst_15 = arith.constant dense<0.000000e+00> : vector<64xf32>
    %35 = vector.multi_reduction <add>, %34, %cst_15 [1] : vector<64x32xf32> to vector<64xf32>
    %36 = vector.shape_cast %35 : vector<64xf32> to vector<64x1xf32>
    %cst_16 = arith.constant 3.200000e+01 : f32
    %37 = vector.broadcast %cst_16 : f32 to vector<64x1xf32>
    %38 = arith.divf %36, %37 : vector<64x1xf32>
    %39 = vector.broadcast %31 : vector<64x1xf32> to vector<64x32xf32>
    %40 = arith.subf %3, %39 : vector<64x32xf32>
    %cst_17 = arith.constant 9.99999974E-6 : f32
    %41 = vector.broadcast %cst_17 : f32 to vector<64x1xf32>
    %42 = arith.addf %38, %41 : vector<64x1xf32>
    %43 = math.rsqrt %42 : vector<64x1xf32>
    %44 = vector.broadcast %43 : vector<64x1xf32> to vector<64x32xf32>
    %45 = arith.mulf %40, %44 : vector<64x32xf32>
    %46 = vector.broadcast %4 : vector<1x32xf32> to vector<64x32xf32>
    %47 = arith.mulf %45, %46 : vector<64x32xf32>
    %48 = vector.broadcast %5 : vector<1x32xf32> to vector<64x32xf32>
    %49 = arith.addf %47, %48 : vector<64x32xf32>
    %c0_18 = arith.constant 0 : index
    %c0_19 = arith.constant 0 : index
    %50 = vector.load %arg5[%c0_18, %c0_19] : memref<32x32xf32, #tpu.memory_space<vmem>>, vector<32x32xf32>
    %cst_20 = arith.constant dense<0.000000e+00> : vector<64x32xf32>
    %51 = tpu.matmul %27, %50, %cst_20 {dimension_numbers = #tpu.dot_dimension_numbers<[1], [0], [0], [1], [0, 0, 1, 1], [], []>} : vector<64x32xf32>, vector<32x32xf32>, vector<64x32xf32> -> vector<64x32xf32>
    %c0_21 = arith.constant 0 : index
    %c0_22 = arith.constant 0 : index
    %52 = vector.load %arg6[%c0_21, %c0_22] : memref<32x64xf32, #tpu.memory_space<vmem>>, vector<32x64xf32>
    %cst_23 = arith.constant dense<0.000000e+00> : vector<64x64xf32>
    %53 = tpu.matmul %49, %52, %cst_23 {dimension_numbers = #tpu.dot_dimension_numbers<[1], [0], [0], [1], [0, 0, 1, 1], [], []>} : vector<64x32xf32>, vector<32x64xf32>, vector<64x64xf32> -> vector<64x64xf32>
    %54 = vector.extract_strided_slice %53 {offsets = [0, 0], sizes = [64, 32], strides = [1, 1]} : vector<64x64xf32> to vector<64x32xf32>
    %55 = vector.extract_strided_slice %53 {offsets = [0, 32], sizes = [64, 32], strides = [1, 1]} : vector<64x64xf32> to vector<64x32xf32>
    %c0_24 = arith.constant 0 : index
    %c0_25 = arith.constant 0 : index
    %56 = vector.load %arg7[%c0_24, %c0_25] : memref<32x32xf32, #tpu.memory_space<vmem>>, vector<32x32xf32>
    %cst_26 = arith.constant 0.000000e+00 : f32
    %57 = vector.broadcast %cst_26 : f32 to vector<64x32xf32>
    %58 = vector.extract_strided_slice %51 {offsets = [0, 0], sizes = [64, 8], strides = [1, 1]} : vector<64x32xf32> to vector<64x8xf32>
    %59 = vector.extract_strided_slice %54 {offsets = [0, 0], sizes = [64, 8], strides = [1, 1]} : vector<64x32xf32> to vector<64x8xf32>
    %60 = vector.extract_strided_slice %55 {offsets = [0, 0], sizes = [64, 8], strides = [1, 1]} : vector<64x32xf32> to vector<64x8xf32>
    %cst_27 = arith.constant dense<0.000000e+00> : vector<64x64xf32>
    %61 = tpu.matmul %58, %59, %cst_27 {dimension_numbers = #tpu.dot_dimension_numbers<[1], [1], [0], [0], [0, 0, 1, 0], [], []>} : vector<64x8xf32>, vector<64x8xf32>, vector<64x64xf32> -> vector<64x64xf32>
    %cst_28 = arith.constant 0.353553385 : f32
    %62 = vector.broadcast %cst_28 : f32 to vector<64x64xf32>
    %63 = arith.mulf %61, %62 : vector<64x64xf32>
    %cst_29 = arith.constant dense<0xFF800000> : vector<64xf32>
    %64 = vector.multi_reduction <maximumf>, %63, %cst_29 [1] : vector<64x64xf32> to vector<64xf32>
    %65 = vector.shape_cast %64 : vector<64xf32> to vector<64x1xf32>
    %66 = vector.broadcast %65 : vector<64x1xf32> to vector<64x64xf32>
    %67 = arith.subf %63, %66 : vector<64x64xf32>
    %68 = math.exp %67 : vector<64x64xf32>
    %cst_30 = arith.constant dense<0.000000e+00> : vector<64xf32>
    %69 = vector.multi_reduction <add>, %68, %cst_30 [1] : vector<64x64xf32> to vector<64xf32>
    %70 = vector.shape_cast %69 : vector<64xf32> to vector<64x1xf32>
    %71 = tpu.reciprocal %70 {approx = true} : vector<64x1xf32> -> vector<64x1xf32>
    %72 = vector.broadcast %71 : vector<64x1xf32> to vector<64x64xf32>
    %73 = arith.mulf %68, %72 : vector<64x64xf32>
    %cst_31 = arith.constant dense<0.000000e+00> : vector<64x8xf32>
    %74 = tpu.matmul %73, %60, %cst_31 {dimension_numbers = #tpu.dot_dimension_numbers<[1], [0], [0], [1], [0, 0, 1, 1], [], []>} : vector<64x64xf32>, vector<64x8xf32>, vector<64x8xf32> -> vector<64x8xf32>
    %75 = vector.extract_strided_slice %56 {offsets = [0, 0], sizes = [8, 32], strides = [1, 1]} : vector<32x32xf32> to vector<8x32xf32>
    %cst_32 = arith.constant dense<0.000000e+00> : vector<64x32xf32>
    %76 = tpu.matmul %74, %75, %cst_32 {dimension_numbers = #tpu.dot_dimension_numbers<[1], [0], [0], [1], [0, 0, 1, 1], [], []>} : vector<64x8xf32>, vector<8x32xf32>, vector<64x32xf32> -> vector<64x32xf32>
    %77 = arith.addf %57, %76 : vector<64x32xf32>
    %78 = vector.extract_strided_slice %51 {offsets = [0, 8], sizes = [64, 8], strides = [1, 1]} : vector<64x32xf32> to vector<64x8xf32>
    %79 = vector.extract_strided_slice %54 {offsets = [0, 8], sizes = [64, 8], strides = [1, 1]} : vector<64x32xf32> to vector<64x8xf32>
    %80 = vector.extract_strided_slice %55 {offsets = [0, 8], sizes = [64, 8], strides = [1, 1]} : vector<64x32xf32> to vector<64x8xf32>
    %cst_33 = arith.constant dense<0.000000e+00> : vector<64x64xf32>
    %81 = tpu.matmul %78, %79, %cst_33 {dimension_numbers = #tpu.dot_dimension_numbers<[1], [1], [0], [0], [0, 0, 1, 0], [], []>} : vector<64x8xf32>, vector<64x8xf32>, vector<64x64xf32> -> vector<64x64xf32>
    %cst_34 = arith.constant 0.353553385 : f32
    %82 = vector.broadcast %cst_34 : f32 to vector<64x64xf32>
    %83 = arith.mulf %81, %82 : vector<64x64xf32>
    %cst_35 = arith.constant dense<0xFF800000> : vector<64xf32>
    %84 = vector.multi_reduction <maximumf>, %83, %cst_35 [1] : vector<64x64xf32> to vector<64xf32>
    %85 = vector.shape_cast %84 : vector<64xf32> to vector<64x1xf32>
    %86 = vector.broadcast %85 : vector<64x1xf32> to vector<64x64xf32>
    %87 = arith.subf %83, %86 : vector<64x64xf32>
    %88 = math.exp %87 : vector<64x64xf32>
    %cst_36 = arith.constant dense<0.000000e+00> : vector<64xf32>
    %89 = vector.multi_reduction <add>, %88, %cst_36 [1] : vector<64x64xf32> to vector<64xf32>
    %90 = vector.shape_cast %89 : vector<64xf32> to vector<64x1xf32>
    %91 = tpu.reciprocal %90 {approx = true} : vector<64x1xf32> -> vector<64x1xf32>
    %92 = vector.broadcast %91 : vector<64x1xf32> to vector<64x64xf32>
    %93 = arith.mulf %88, %92 : vector<64x64xf32>
    %cst_37 = arith.constant dense<0.000000e+00> : vector<64x8xf32>
    %94 = tpu.matmul %93, %80, %cst_37 {dimension_numbers = #tpu.dot_dimension_numbers<[1], [0], [0], [1], [0, 0, 1, 1], [], []>} : vector<64x64xf32>, vector<64x8xf32>, vector<64x8xf32> -> vector<64x8xf32>
    %95 = vector.extract_strided_slice %56 {offsets = [8, 0], sizes = [8, 32], strides = [1, 1]} : vector<32x32xf32> to vector<8x32xf32>
    %cst_38 = arith.constant dense<0.000000e+00> : vector<64x32xf32>
    %96 = tpu.matmul %94, %95, %cst_38 {dimension_numbers = #tpu.dot_dimension_numbers<[1], [0], [0], [1], [0, 0, 1, 1], [], []>} : vector<64x8xf32>, vector<8x32xf32>, vector<64x32xf32> -> vector<64x32xf32>
    %97 = arith.addf %77, %96 : vector<64x32xf32>
    %98 = vector.extract_strided_slice %51 {offsets = [0, 16], sizes = [64, 8], strides = [1, 1]} : vector<64x32xf32> to vector<64x8xf32>
    %99 = vector.extract_strided_slice %54 {offsets = [0, 16], sizes = [64, 8], strides = [1, 1]} : vector<64x32xf32> to vector<64x8xf32>
    %100 = vector.extract_strided_slice %55 {offsets = [0, 16], sizes = [64, 8], strides = [1, 1]} : vector<64x32xf32> to vector<64x8xf32>
    %cst_39 = arith.constant dense<0.000000e+00> : vector<64x64xf32>
    %101 = tpu.matmul %98, %99, %cst_39 {dimension_numbers = #tpu.dot_dimension_numbers<[1], [1], [0], [0], [0, 0, 1, 0], [], []>} : vector<64x8xf32>, vector<64x8xf32>, vector<64x64xf32> -> vector<64x64xf32>
    %cst_40 = arith.constant 0.353553385 : f32
    %102 = vector.broadcast %cst_40 : f32 to vector<64x64xf32>
    %103 = arith.mulf %101, %102 : vector<64x64xf32>
    %cst_41 = arith.constant dense<0xFF800000> : vector<64xf32>
    %104 = vector.multi_reduction <maximumf>, %103, %cst_41 [1] : vector<64x64xf32> to vector<64xf32>
    %105 = vector.shape_cast %104 : vector<64xf32> to vector<64x1xf32>
    %106 = vector.broadcast %105 : vector<64x1xf32> to vector<64x64xf32>
    %107 = arith.subf %103, %106 : vector<64x64xf32>
    %108 = math.exp %107 : vector<64x64xf32>
    %cst_42 = arith.constant dense<0.000000e+00> : vector<64xf32>
    %109 = vector.multi_reduction <add>, %108, %cst_42 [1] : vector<64x64xf32> to vector<64xf32>
    %110 = vector.shape_cast %109 : vector<64xf32> to vector<64x1xf32>
    %111 = tpu.reciprocal %110 {approx = true} : vector<64x1xf32> -> vector<64x1xf32>
    %112 = vector.broadcast %111 : vector<64x1xf32> to vector<64x64xf32>
    %113 = arith.mulf %108, %112 : vector<64x64xf32>
    %cst_43 = arith.constant dense<0.000000e+00> : vector<64x8xf32>
    %114 = tpu.matmul %113, %100, %cst_43 {dimension_numbers = #tpu.dot_dimension_numbers<[1], [0], [0], [1], [0, 0, 1, 1], [], []>} : vector<64x64xf32>, vector<64x8xf32>, vector<64x8xf32> -> vector<64x8xf32>
    %115 = vector.extract_strided_slice %56 {offsets = [16, 0], sizes = [8, 32], strides = [1, 1]} : vector<32x32xf32> to vector<8x32xf32>
    %cst_44 = arith.constant dense<0.000000e+00> : vector<64x32xf32>
    %116 = tpu.matmul %114, %115, %cst_44 {dimension_numbers = #tpu.dot_dimension_numbers<[1], [0], [0], [1], [0, 0, 1, 1], [], []>} : vector<64x8xf32>, vector<8x32xf32>, vector<64x32xf32> -> vector<64x32xf32>
    %117 = arith.addf %97, %116 : vector<64x32xf32>
    %118 = vector.extract_strided_slice %51 {offsets = [0, 24], sizes = [64, 8], strides = [1, 1]} : vector<64x32xf32> to vector<64x8xf32>
    %119 = vector.extract_strided_slice %54 {offsets = [0, 24], sizes = [64, 8], strides = [1, 1]} : vector<64x32xf32> to vector<64x8xf32>
    %120 = vector.extract_strided_slice %55 {offsets = [0, 24], sizes = [64, 8], strides = [1, 1]} : vector<64x32xf32> to vector<64x8xf32>
    %cst_45 = arith.constant dense<0.000000e+00> : vector<64x64xf32>
    %121 = tpu.matmul %118, %119, %cst_45 {dimension_numbers = #tpu.dot_dimension_numbers<[1], [1], [0], [0], [0, 0, 1, 0], [], []>} : vector<64x8xf32>, vector<64x8xf32>, vector<64x64xf32> -> vector<64x64xf32>
    %cst_46 = arith.constant 0.353553385 : f32
    %122 = vector.broadcast %cst_46 : f32 to vector<64x64xf32>
    %123 = arith.mulf %121, %122 : vector<64x64xf32>
    %cst_47 = arith.constant dense<0xFF800000> : vector<64xf32>
    %124 = vector.multi_reduction <maximumf>, %123, %cst_47 [1] : vector<64x64xf32> to vector<64xf32>
    %125 = vector.shape_cast %124 : vector<64xf32> to vector<64x1xf32>
    %126 = vector.broadcast %125 : vector<64x1xf32> to vector<64x64xf32>
    %127 = arith.subf %123, %126 : vector<64x64xf32>
    %128 = math.exp %127 : vector<64x64xf32>
    %cst_48 = arith.constant dense<0.000000e+00> : vector<64xf32>
    %129 = vector.multi_reduction <add>, %128, %cst_48 [1] : vector<64x64xf32> to vector<64xf32>
    %130 = vector.shape_cast %129 : vector<64xf32> to vector<64x1xf32>
    %131 = tpu.reciprocal %130 {approx = true} : vector<64x1xf32> -> vector<64x1xf32>
    %132 = vector.broadcast %131 : vector<64x1xf32> to vector<64x64xf32>
    %133 = arith.mulf %128, %132 : vector<64x64xf32>
    %cst_49 = arith.constant dense<0.000000e+00> : vector<64x8xf32>
    %134 = tpu.matmul %133, %120, %cst_49 {dimension_numbers = #tpu.dot_dimension_numbers<[1], [0], [0], [1], [0, 0, 1, 1], [], []>} : vector<64x64xf32>, vector<64x8xf32>, vector<64x8xf32> -> vector<64x8xf32>
    %135 = vector.extract_strided_slice %56 {offsets = [24, 0], sizes = [8, 32], strides = [1, 1]} : vector<32x32xf32> to vector<8x32xf32>
    %cst_50 = arith.constant dense<0.000000e+00> : vector<64x32xf32>
    %136 = tpu.matmul %134, %135, %cst_50 {dimension_numbers = #tpu.dot_dimension_numbers<[1], [0], [0], [1], [0, 0, 1, 1], [], []>} : vector<64x8xf32>, vector<8x32xf32>, vector<64x32xf32> -> vector<64x32xf32>
    %137 = arith.addf %117, %136 : vector<64x32xf32>
    %138 = arith.addf %1, %137 : vector<64x32xf32>
    %c0_51 = arith.constant 0 : index
    %c0_52 = arith.constant 0 : index
    %139 = vector.load %arg8[%c0_51, %c0_52] : memref<1x32xf32, #tpu.memory_space<vmem>>, vector<1x32xf32>
    %140 = vector.broadcast %139 : vector<1x32xf32> to vector<64x32xf32>
    %141 = arith.addf %138, %140 : vector<64x32xf32>
    %c0_53 = arith.constant 0 : index
    %c0_54 = arith.constant 0 : index
    %142 = vector.load %arg9[%c0_53, %c0_54] : memref<1x32xf32, #tpu.memory_space<vmem>>, vector<1x32xf32>
    %c0_55 = arith.constant 0 : index
    %c0_56 = arith.constant 0 : index
    %143 = vector.load %arg10[%c0_55, %c0_56] : memref<1x32xf32, #tpu.memory_space<vmem>>, vector<1x32xf32>
    %cst_57 = arith.constant dense<0.000000e+00> : vector<64xf32>
    %144 = vector.multi_reduction <add>, %141, %cst_57 [1] : vector<64x32xf32> to vector<64xf32>
    %145 = vector.shape_cast %144 : vector<64xf32> to vector<64x1xf32>
    %cst_58 = arith.constant 3.200000e+01 : f32
    %146 = vector.broadcast %cst_58 : f32 to vector<64x1xf32>
    %147 = arith.divf %145, %146 : vector<64x1xf32>
    %148 = vector.broadcast %147 : vector<64x1xf32> to vector<64x32xf32>
    %149 = arith.subf %141, %148 : vector<64x32xf32>
    %150 = arith.mulf %149, %149 : vector<64x32xf32>
    %cst_59 = arith.constant dense<0.000000e+00> : vector<64xf32>
    %151 = vector.multi_reduction <add>, %150, %cst_59 [1] : vector<64x32xf32> to vector<64xf32>
    %152 = vector.shape_cast %151 : vector<64xf32> to vector<64x1xf32>
    %cst_60 = arith.constant 3.200000e+01 : f32
    %153 = vector.broadcast %cst_60 : f32 to vector<64x1xf32>
    %154 = arith.divf %152, %153 : vector<64x1xf32>
    %155 = vector.broadcast %147 : vector<64x1xf32> to vector<64x32xf32>
    %156 = arith.subf %141, %155 : vector<64x32xf32>
    %cst_61 = arith.constant 9.99999974E-6 : f32
    %157 = vector.broadcast %cst_61 : f32 to vector<64x1xf32>
    %158 = arith.addf %154, %157 : vector<64x1xf32>
    %159 = math.rsqrt %158 : vector<64x1xf32>
    %160 = vector.broadcast %159 : vector<64x1xf32> to vector<64x32xf32>
    %161 = arith.mulf %156, %160 : vector<64x32xf32>
    %162 = vector.broadcast %142 : vector<1x32xf32> to vector<64x32xf32>
    %163 = arith.mulf %161, %162 : vector<64x32xf32>
    %164 = vector.broadcast %143 : vector<1x32xf32> to vector<64x32xf32>
    %165 = arith.addf %163, %164 : vector<64x32xf32>
    %c0_62 = arith.constant 0 : index
    %c0_63 = arith.constant 0 : index
    %166 = vector.load %arg11[%c0_62, %c0_63] : memref<32x128xf32, #tpu.memory_space<vmem>>, vector<32x128xf32>
    %cst_64 = arith.constant dense<0.000000e+00> : vector<64x128xf32>
    %167 = tpu.matmul %165, %166, %cst_64 {dimension_numbers = #tpu.dot_dimension_numbers<[1], [0], [0], [1], [0, 0, 1, 1], [], []>} : vector<64x32xf32>, vector<32x128xf32>, vector<64x128xf32> -> vector<64x128xf32>
    %c0_65 = arith.constant 0 : index
    %c0_66 = arith.constant 0 : index
    %168 = vector.load %arg12[%c0_65, %c0_66] : memref<1x128xf32, #tpu.memory_space<vmem>>, vector<1x128xf32>
    %169 = vector.broadcast %168 : vector<1x128xf32> to vector<64x128xf32>
    %170 = arith.addf %167, %169 : vector<64x128xf32>
    %cst_67 = arith.constant 0.000000e+00 : f32
    %171 = vector.broadcast %cst_67 : f32 to vector<64x128xf32>
    %172 = arith.maximumf %170, %171 : vector<64x128xf32>
    %cst_68 = arith.constant 0.000000e+00 : f32
    %173 = vector.broadcast %cst_68 : f32 to vector<10x10x128xf32>
    %c0_69 = arith.constant 0 : index
    %c0_70 = arith.constant 0 : index
    %c0_71 = arith.constant 0 : index
    %174 = vector.load %arg18[%c0_69, %c0_70, %c0_71] : memref<10x10x128xf32, #tpu.memory_space<vmem>>, vector<10x10x128xf32>
    tpu.vector_store %arg18[%c0_69, %c0_70, %c0_71], %173 {strides = array<i32>} : memref<10x10x128xf32, #tpu.memory_space<vmem>>, vector<10x10x128xf32>,
    %175 = vector.shape_cast %172 : vector<64x128xf32> to vector<8x8x128xf32>
    %c1 = arith.constant 1 : index
    %c1_72 = arith.constant 1 : index
    %c0_73 = arith.constant 0 : index
    %176 = vector.load %arg18[%c1, %c1_72, %c0_73] : memref<10x10x128xf32, #tpu.memory_space<vmem>>, vector<8x8x128xf32>
    tpu.vector_store %arg18[%c1, %c1_72, %c0_73], %175 {strides = array<i32>} : memref<10x10x128xf32, #tpu.memory_space<vmem>>, vector<8x8x128xf32>,
    %c0_74 = arith.constant 0 : index
    %c0_75 = arith.constant 0 : index
    %177 = vector.load %arg13[%c0_74, %c0_75] : memref<9x128xf32, #tpu.memory_space<vmem>>, vector<9x128xf32>
    %cst_76 = arith.constant 0.000000e+00 : f32
    %178 = vector.broadcast %cst_76 : f32 to vector<8x8x128xf32>
    %179 = vector.extract_strided_slice %177 {offsets = [0, 0], sizes = [1, 128], strides = [1, 1]} : vector<9x128xf32> to vector<1x128xf32>
    %180 = vector.shape_cast %179 : vector<1x128xf32> to vector<1x1x128xf32>
    %c0_77 = arith.constant 0 : index
    %c0_78 = arith.constant 0 : index
    %c0_79 = arith.constant 0 : index
    %181 = vector.load %arg18[%c0_77, %c0_78, %c0_79] : memref<10x10x128xf32, #tpu.memory_space<vmem>>, vector<8x8x128xf32>
    %182 = vector.broadcast %180 : vector<1x1x128xf32> to vector<8x8x128xf32>
    %183 = arith.mulf %181, %182 : vector<8x8x128xf32>
    %184 = arith.addf %178, %183 : vector<8x8x128xf32>
    %185 = vector.extract_strided_slice %177 {offsets = [1, 0], sizes = [1, 128], strides = [1, 1]} : vector<9x128xf32> to vector<1x128xf32>
    %186 = vector.shape_cast %185 : vector<1x128xf32> to vector<1x1x128xf32>
    %c0_80 = arith.constant 0 : index
    %c1_81 = arith.constant 1 : index
    %c0_82 = arith.constant 0 : index
    %187 = vector.load %arg18[%c0_80, %c1_81, %c0_82] : memref<10x10x128xf32, #tpu.memory_space<vmem>>, vector<8x8x128xf32>
    %188 = vector.broadcast %186 : vector<1x1x128xf32> to vector<8x8x128xf32>
    %189 = arith.mulf %187, %188 : vector<8x8x128xf32>
    %190 = arith.addf %184, %189 : vector<8x8x128xf32>
    %191 = vector.extract_strided_slice %177 {offsets = [2, 0], sizes = [1, 128], strides = [1, 1]} : vector<9x128xf32> to vector<1x128xf32>
    %192 = vector.shape_cast %191 : vector<1x128xf32> to vector<1x1x128xf32>
    %c0_83 = arith.constant 0 : index
    %c2 = arith.constant 2 : index
    %c0_84 = arith.constant 0 : index
    %193 = vector.load %arg18[%c0_83, %c2, %c0_84] : memref<10x10x128xf32, #tpu.memory_space<vmem>>, vector<8x8x128xf32>
    %194 = vector.broadcast %192 : vector<1x1x128xf32> to vector<8x8x128xf32>
    %195 = arith.mulf %193, %194 : vector<8x8x128xf32>
    %196 = arith.addf %190, %195 : vector<8x8x128xf32>
    %197 = vector.extract_strided_slice %177 {offsets = [3, 0], sizes = [1, 128], strides = [1, 1]} : vector<9x128xf32> to vector<1x128xf32>
    %198 = vector.shape_cast %197 : vector<1x128xf32> to vector<1x1x128xf32>
    %c1_85 = arith.constant 1 : index
    %c0_86 = arith.constant 0 : index
    %c0_87 = arith.constant 0 : index
    %199 = vector.load %arg18[%c1_85, %c0_86, %c0_87] : memref<10x10x128xf32, #tpu.memory_space<vmem>>, vector<8x8x128xf32>
    %200 = vector.broadcast %198 : vector<1x1x128xf32> to vector<8x8x128xf32>
    %201 = arith.mulf %199, %200 : vector<8x8x128xf32>
    %202 = arith.addf %196, %201 : vector<8x8x128xf32>
    %203 = vector.extract_strided_slice %177 {offsets = [4, 0], sizes = [1, 128], strides = [1, 1]} : vector<9x128xf32> to vector<1x128xf32>
    %204 = vector.shape_cast %203 : vector<1x128xf32> to vector<1x1x128xf32>
    %c1_88 = arith.constant 1 : index
    %c1_89 = arith.constant 1 : index
    %c0_90 = arith.constant 0 : index
    %205 = vector.load %arg18[%c1_88, %c1_89, %c0_90] : memref<10x10x128xf32, #tpu.memory_space<vmem>>, vector<8x8x128xf32>
    %206 = vector.broadcast %204 : vector<1x1x128xf32> to vector<8x8x128xf32>
    %207 = arith.mulf %205, %206 : vector<8x8x128xf32>
    %208 = arith.addf %202, %207 : vector<8x8x128xf32>
    %209 = vector.extract_strided_slice %177 {offsets = [5, 0], sizes = [1, 128], strides = [1, 1]} : vector<9x128xf32> to vector<1x128xf32>
    %210 = vector.shape_cast %209 : vector<1x128xf32> to vector<1x1x128xf32>
    %c1_91 = arith.constant 1 : index
    %c2_92 = arith.constant 2 : index
    %c0_93 = arith.constant 0 : index
    %211 = vector.load %arg18[%c1_91, %c2_92, %c0_93] : memref<10x10x128xf32, #tpu.memory_space<vmem>>, vector<8x8x128xf32>
    %212 = vector.broadcast %210 : vector<1x1x128xf32> to vector<8x8x128xf32>
    %213 = arith.mulf %211, %212 : vector<8x8x128xf32>
    %214 = arith.addf %208, %213 : vector<8x8x128xf32>
    %215 = vector.extract_strided_slice %177 {offsets = [6, 0], sizes = [1, 128], strides = [1, 1]} : vector<9x128xf32> to vector<1x128xf32>
    %216 = vector.shape_cast %215 : vector<1x128xf32> to vector<1x1x128xf32>
    %c2_94 = arith.constant 2 : index
    %c0_95 = arith.constant 0 : index
    %c0_96 = arith.constant 0 : index
    %217 = vector.load %arg18[%c2_94, %c0_95, %c0_96] : memref<10x10x128xf32, #tpu.memory_space<vmem>>, vector<8x8x128xf32>
    %218 = vector.broadcast %216 : vector<1x1x128xf32> to vector<8x8x128xf32>
    %219 = arith.mulf %217, %218 : vector<8x8x128xf32>
    %220 = arith.addf %214, %219 : vector<8x8x128xf32>
    %221 = vector.extract_strided_slice %177 {offsets = [7, 0], sizes = [1, 128], strides = [1, 1]} : vector<9x128xf32> to vector<1x128xf32>
    %222 = vector.shape_cast %221 : vector<1x128xf32> to vector<1x1x128xf32>
    %c2_97 = arith.constant 2 : index
    %c1_98 = arith.constant 1 : index
    %c0_99 = arith.constant 0 : index
    %223 = vector.load %arg18[%c2_97, %c1_98, %c0_99] : memref<10x10x128xf32, #tpu.memory_space<vmem>>, vector<8x8x128xf32>
    %224 = vector.broadcast %222 : vector<1x1x128xf32> to vector<8x8x128xf32>
    %225 = arith.mulf %223, %224 : vector<8x8x128xf32>
    %226 = arith.addf %220, %225 : vector<8x8x128xf32>
    %227 = vector.extract_strided_slice %177 {offsets = [8, 0], sizes = [1, 128], strides = [1, 1]} : vector<9x128xf32> to vector<1x128xf32>
    %228 = vector.shape_cast %227 : vector<1x128xf32> to vector<1x1x128xf32>
    %c2_100 = arith.constant 2 : index
    %c2_101 = arith.constant 2 : index
    %c0_102 = arith.constant 0 : index
    %229 = vector.load %arg18[%c2_100, %c2_101, %c0_102] : memref<10x10x128xf32, #tpu.memory_space<vmem>>, vector<8x8x128xf32>
    %230 = vector.broadcast %228 : vector<1x1x128xf32> to vector<8x8x128xf32>
    %231 = arith.mulf %229, %230 : vector<8x8x128xf32>
    %232 = arith.addf %226, %231 : vector<8x8x128xf32>
    %c0_103 = arith.constant 0 : index
    %c0_104 = arith.constant 0 : index
    %233 = vector.load %arg14[%c0_103, %c0_104] : memref<1x128xf32, #tpu.memory_space<vmem>>, vector<1x128xf32>
    %234 = vector.shape_cast %233 : vector<1x128xf32> to vector<1x1x128xf32>
    %235 = vector.broadcast %234 : vector<1x1x128xf32> to vector<8x8x128xf32>
    %236 = arith.addf %232, %235 : vector<8x8x128xf32>
    %237 = arith.mulf %236, %236 : vector<8x8x128xf32>
    %238 = arith.mulf %236, %237 : vector<8x8x128xf32>
    %cst_105 = arith.constant 4.471500e-02 : f32
    %239 = vector.broadcast %cst_105 : f32 to vector<8x8x128xf32>
    %240 = arith.mulf %239, %238 : vector<8x8x128xf32>
    %241 = arith.addf %236, %240 : vector<8x8x128xf32>
    %cst_106 = arith.constant 0.797884583 : f32
    %242 = vector.broadcast %cst_106 : f32 to vector<8x8x128xf32>
    %243 = arith.mulf %242, %241 : vector<8x8x128xf32>
    %244 = math.tanh %243 : vector<8x8x128xf32>
    %cst_107 = arith.constant 1.000000e+00 : f32
    %245 = vector.broadcast %cst_107 : f32 to vector<8x8x128xf32>
    %246 = arith.addf %245, %244 : vector<8x8x128xf32>
    %cst_108 = arith.constant 5.000000e-01 : f32
    %247 = vector.broadcast %cst_108 : f32 to vector<8x8x128xf32>
    %248 = arith.mulf %247, %246 : vector<8x8x128xf32>
    %249 = arith.mulf %236, %248 : vector<8x8x128xf32>
    %250 = vector.shape_cast %249 : vector<8x8x128xf32> to vector<64x128xf32>
    %c0_109 = arith.constant 0 : index
    %c0_110 = arith.constant 0 : index
    %251 = vector.load %arg15[%c0_109, %c0_110] : memref<128x32xf32, #tpu.memory_space<vmem>>, vector<128x32xf32>
    %cst_111 = arith.constant dense<0.000000e+00> : vector<64x32xf32>
    %252 = tpu.matmul %250, %251, %cst_111 {dimension_numbers = #tpu.dot_dimension_numbers<[1], [0], [0], [1], [0, 0, 1, 1], [], []>} : vector<64x128xf32>, vector<128x32xf32>, vector<64x32xf32> -> vector<64x32xf32>
    %c0_112 = arith.constant 0 : index
    %c0_113 = arith.constant 0 : index
    %253 = vector.load %arg16[%c0_112, %c0_113] : memref<1x32xf32, #tpu.memory_space<vmem>>, vector<1x32xf32>
    %254 = vector.broadcast %253 : vector<1x32xf32> to vector<64x32xf32>
    %255 = arith.addf %252, %254 : vector<64x32xf32>
    %256 = arith.addf %141, %255 : vector<64x32xf32>
    %c0_114 = arith.constant 0 : index
    %c0_115 = arith.constant 0 : index
    %c0_116 = arith.constant 0 : index
    %257 = vector.load %arg17[%c0_114, %c0_115, %c0_116] : memref<1x64x32xf32, #tpu.memory_space<vmem>>, vector<1x64x32xf32>
    %258 = vector.shape_cast %257 : vector<1x64x32xf32> to vector<64x32xf32>
    %259 = vector.shape_cast %256 : vector<64x32xf32> to vector<1x64x32xf32>
    tpu.vector_store %arg17[%c0_114, %c0_115, %c0_116], %259 {strides = array<i32>} : memref<1x64x32xf32, #tpu.memory_space<vmem>>, vector<1x64x32xf32>,
    return
  }
  func.func @transform_0(%arg0: i32) -> (i32, i32, i32) {
    %c0_i32 = arith.constant 0 : i32
    %c0_i32_0 = arith.constant 0 : i32
    %c0_i32_1 = arith.constant 0 : i32
    return %arg0, %c0_i32, %c0_i32_0 : i32, i32, i32
  }
  func.func @transform_1(%arg0: i32) -> (i32, i32, i32) {
    %c0_i32 = arith.constant 0 : i32
    %c0_i32_0 = arith.constant 0 : i32
    %c0_i32_1 = arith.constant 0 : i32
    return %arg0, %c0_i32, %c0_i32_0 : i32, i32, i32
  }
  func.func @transform_2(%arg0: i32) -> (i32, i32) {
    %c0_i32 = arith.constant 0 : i32
    %c0_i32_0 = arith.constant 0 : i32
    %c0_i32_1 = arith.constant 0 : i32
    return %c0_i32, %c0_i32_0 : i32, i32
  }
  func.func @transform_3(%arg0: i32) -> (i32, i32) {
    %c0_i32 = arith.constant 0 : i32
    %c0_i32_0 = arith.constant 0 : i32
    %c0_i32_1 = arith.constant 0 : i32
    return %c0_i32, %c0_i32_0 : i32, i32
  }
  func.func @transform_4(%arg0: i32) -> (i32, i32) {
    %c0_i32 = arith.constant 0 : i32
    %c0_i32_0 = arith.constant 0 : i32
    %c0_i32_1 = arith.constant 0 : i32
    return %c0_i32, %c0_i32_0 : i32, i32
  }
  func.func @transform_5(%arg0: i32) -> (i32, i32) {
    %c0_i32 = arith.constant 0 : i32
    %c0_i32_0 = arith.constant 0 : i32
    %c0_i32_1 = arith.constant 0 : i32
    return %c0_i32, %c0_i32_0 : i32, i32
  }
  func.func @transform_6(%arg0: i32) -> (i32, i32) {
    %c0_i32 = arith.constant 0 : i32
    %c0_i32_0 = arith.constant 0 : i32
    %c0_i32_1 = arith.constant 0 : i32
    return %c0_i32, %c0_i32_0 : i32, i32
  }
  func.func @transform_7(%arg0: i32) -> (i32, i32) {
    %c0_i32 = arith.constant 0 : i32
    %c0_i32_0 = arith.constant 0 : i32
    %c0_i32_1 = arith.constant 0 : i32
    return %c0_i32, %c0_i32_0 : i32, i32
  }
  func.func @transform_8(%arg0: i32) -> (i32, i32) {
    %c0_i32 = arith.constant 0 : i32
    %c0_i32_0 = arith.constant 0 : i32
    %c0_i32_1 = arith.constant 0 : i32
    return %c0_i32, %c0_i32_0 : i32, i32
  }
  func.func @transform_9(%arg0: i32) -> (i32, i32) {
    %c0_i32 = arith.constant 0 : i32
    %c0_i32_0 = arith.constant 0 : i32
    %c0_i32_1 = arith.constant 0 : i32
    return %c0_i32, %c0_i32_0 : i32, i32
  }
  func.func @transform_10(%arg0: i32) -> (i32, i32) {
    %c0_i32 = arith.constant 0 : i32
    %c0_i32_0 = arith.constant 0 : i32
    %c0_i32_1 = arith.constant 0 : i32
    return %c0_i32, %c0_i32_0 : i32, i32
  }
  func.func @transform_11(%arg0: i32) -> (i32, i32) {
    %c0_i32 = arith.constant 0 : i32
    %c0_i32_0 = arith.constant 0 : i32
    %c0_i32_1 = arith.constant 0 : i32
    return %c0_i32, %c0_i32_0 : i32, i32
  }
  func.func @transform_12(%arg0: i32) -> (i32, i32) {
    %c0_i32 = arith.constant 0 : i32
    %c0_i32_0 = arith.constant 0 : i32
    %c0_i32_1 = arith.constant 0 : i32
    return %c0_i32, %c0_i32_0 : i32, i32
  }
  func.func @transform_13(%arg0: i32) -> (i32, i32) {
    %c0_i32 = arith.constant 0 : i32
    %c0_i32_0 = arith.constant 0 : i32
    %c0_i32_1 = arith.constant 0 : i32
    return %c0_i32, %c0_i32_0 : i32, i32
  }
  func.func @transform_14(%arg0: i32) -> (i32, i32) {
    %c0_i32 = arith.constant 0 : i32
    %c0_i32_0 = arith.constant 0 : i32
    %c0_i32_1 = arith.constant 0 : i32
    return %c0_i32, %c0_i32_0 : i32, i32
  }
  func.func @transform_15(%arg0: i32) -> (i32, i32) {
    %c0_i32 = arith.constant 0 : i32
    %c0_i32_0 = arith.constant 0 : i32
    %c0_i32_1 = arith.constant 0 : i32
    return %c0_i32, %c0_i32_0 : i32, i32
  }
  func.func @transform_16(%arg0: i32) -> (i32, i32, i32) {
    %c0_i32 = arith.constant 0 : i32
    %c0_i32_0 = arith.constant 0 : i32
    %c0_i32_1 = arith.constant 0 : i32
    return %arg0, %c0_i32, %c0_i32_0 : i32, i32, i32
  }
}

</mosaic_0001>

<bundles_post_ra>
// kernel: tpu_custom_call.1
= control target key start
LH: loop header
LB: loop body
LE: loop exit
PB: predicated region body
PF: predicated region fallthrough
CT: control target
= control target key end

     0   :  { %s5643_s21 = smov 0   ;;  %s6889_s0 = inlined_call_operand.vmem [shape: f32[2,64,32], index: 0, kind: input, shape index: {}]   ;;  %s6890_s1 = inlined_call_operand.vmem [shape: f32[2,64,32], index: 1, kind: input, shape index: {}]   ;;  %s6891_s2 = inlined_call_operand.vmem [shape: f32[1,32], index: 2, kind: input, shape index: {}]   ;;  %s6892_s3 = inlined_call_operand.vmem [shape: f32[1,32], index: 3, kind: input, shape index: {}]   ;;  %s6893_s4 = inlined_call_operand.vmem [shape: f32[32,32], index: 4, kind: input, shape index: {}]   ;;  %s6894_s5 = inlined_call_operand.vmem [shape: f32[32,64], index: 5, kind: input, shape index: {}]   ;;  %s6895_s6 = inlined_call_operand.vmem [shape: f32[32,32], index: 6, kind: input, shape index: {}]   ;;  %s6896_s7 = inlined_call_operand.vmem [shape: f32[1,32], index: 7, kind: input, shape index: {}]   ;;  %s6897_s8 = inlined_call_operand.vmem [shape: f32[1,32], index: 8, kind: input, shape index: {}]   ;;  %s6898_s9 = inlined_call_operand.vmem [shape: f32[1,32], index: 9, kind: input, shape index: {}]   ;;  %s6899_s10 = inlined_call_operand.vmem [shape: f32[32,128], index: 10, kind: input, shape index: {}]   ;;  %s6900_s11 = inlined_call_operand.vmem [shape: f32[1,128], index: 11, kind: input, shape index: {}]   ;;  %s6901_s12 = inlined_call_operand.vmem [shape: f32[9,128], index: 12, kind: input, shape index: {}]   ;;  %s6902_s13 = inlined_call_operand.vmem [shape: f32[1,128], index: 13, kind: input, shape index: {}]   ;;  %s6903_s14 = inlined_call_operand.vmem [shape: f32[128,32], index: 14, kind: input, shape index: {}]   ;;  %s6904_s15 = inlined_call_operand.vmem [shape: f32[1,32], index: 15, kind: input, shape index: {}]   ;;  %s6905_s16 = inlined_call_operand.vmem [shape: f32[2,64,32], index: 16, kind: output, shape index: {}]  }
   0x1   :  { %6906 = sst [smem:[#allocation3_spill]] %s6889_s0 }
   0x2 LB: > { %s4161_s22 = sadd.s32 4294967295, %s5548_s21   ;;  %p4165_p0 = scmp.ge.s32.totalorder %s5548_s21, 1  ;;  %s5548_s21 = sphi %s5643_s21, %s26_s21  }
   0x3   : > { %p472_p1 = scmp.lt.s32.totalorder %s5548_s21, 3 }
   0x5   : > { %p473_p2 = pnand %p4165_p0, %p472_p1 }
   0x6   : > { %p527_p3 = scmp.lt.s32.totalorder (!%p473_p2), %s4161_s22, 1  ;;  %vm560_vm0 = vcmask (!%p473_p2), 261120   ;;  %s6907_s29 = sld [smem:[#allocation3_spill]] (!%p473_p2)  ;;  %vm1084_vm1 = vcmask (!%p473_p2), 64512   ;;  %vm1246_vm3 = vcmask (!%p473_p2), 523264  }
   0x7   : > { %476 = sbr.rel (%p473_p2) target bundleno = 3567 (0xdef), region = 84  ;;  %vm5907_vm2 = vmpackc.low (!%p473_p2), %vm1084_vm1, %vm1084_vm1  ;;  %s5551_s27 = smov (!%p473_p2), 120  }
   0x8   : > { %s5552_s28 = smov (!%p473_p2), 112   ;;  %s5554_s0 = smov (!%p473_p2), 104  }
   0x9   : > { %s5555_s17 = smov (!%p473_p2), 80   ;;  %s5556_s24 = smov (!%p473_p2), 72  }
   0xe   : > { %s6911_s22 = smov (!%p527_p3, %s4161_s22), 1 }
   0xf   : > { %s5651_s23 = sshll.u32 %s6911_s22, 6 }
  0x10   : > { %s536_s26 = scalar_lea.vmem %s6890_s1, %s5651_s23  ;;  %s5671_s30 = scalar_lea.vmem %s6907_s29, %s5651_s23 }
  0x11   : > { %v550_v0 = vld [vmem:[%s536_s26] sm:$0xff]  ;;  %v552_v1 = vld [vmem:[%s536_s26 + $0x10] sm:$0xff]  ;;  %v551_v2 = vld [vmem:[%s536_s26 + $0x8] sm:$0xff]  ;;  %s5553_s29 = smov 88   ;;  %s541_s20 = scalar_lea.vmem %s6905_s16, %s5651_s23 }
  0x12   : > { %v694_v3 = vsel %vm560_vm0, %v550_v0, 0.0  ;;  %v700_v4 = vsel %vm560_vm0, %v552_v1, 0.0  ;;  %v553_v5 = vld [vmem:[%s536_s26 + $0x18] sm:$0xff]  ;;  %v697_v6 = vsel %vm560_vm0, %v551_v2, 0.0  ;;  %v554_v8 = vld [vmem:[%s536_s26 + $0x20] sm:$0xff]  ;;  %v555_v9 = vld [vmem:[%s536_s26 + $0x28] sm:$0xff] }
  0x13   : > { %695 = vadd.xlane.f32.xlu0 %v694_v3  ;;  %701 = vadd.xlane.f32.xlu1 %v700_v4  ;;  %v703_v7 = vsel %vm560_vm0, %v553_v5, 0.0  ;;  %v706_v10 = vsel %vm560_vm0, %v554_v8, 0.0  ;;  %v709_v11 = vsel %vm560_vm0, %v555_v9, 0.0  ;;  %v5663_v12 = vld [vmem:[%s536_s26 + $0x30] sm:$0xff]  ;;  %v5665_v13 = vld [vmem:[%s536_s26 + $0x38] sm:$0xff]  ;;  %v5678_v16 = vld [vmem:[%s5671_s30] sm:$0xff] }
  0x14   : > { %v712_v14 = vsel %vm560_vm0, %v5663_v12, 0.0  ;;  %v715_v15 = vsel %vm560_vm0, %v5665_v13, 0.0  ;;  %v5681_v17 = vld [vmem:[%s5671_s30 + $0x8] sm:$0xff]  ;;  %v561_v18 = vsel %vm560_vm0, %v5678_v16, 0.0  ;;  %v5688_v20 = vld [vmem:[%s5671_s30 + $0x10] sm:$0xff]  ;;  %v5691_v21 = vld [vmem:[%s5671_s30 + $0x18] sm:$0xff] }
  0x15   : > { %v564_v19 = vsel %vm560_vm0, %v5681_v17, 0.0  ;;  %v567_v22 = vsel %vm560_vm0, %v5688_v20, 0.0  ;;  %v570_v23 = vsel %vm560_vm0, %v5691_v21, 0.0  ;;  %v5698_v24 = vld [vmem:[%s5671_s30 + $0x20] sm:$0xff]  ;;  %v5701_v25 = vld [vmem:[%s5671_s30 + $0x28] sm:$0xff]  ;;  %v5708_v28 = vld [vmem:[%s5671_s30 + $0x30] sm:$0xff] }
  0x16   : > { %v573_v26 = vsel %vm560_vm0, %v5698_v24, 0.0  ;;  %v576_v27 = vsel %vm560_vm0, %v5701_v25, 0.0  ;;  %v5711_v29 = vld [vmem:[%s5671_s30 + $0x38] sm:$0xff]  ;;  %v579_v30 = vsel %vm560_vm0, %v5708_v28, 0.0  ;;  %s5550_s26 = smov 96  }
  0x17   : > { %698 = vadd.xlane.f32.xlu0 %v697_v6  ;;  %704 = vadd.xlane.f32.xlu1 %v703_v7  ;;  %v582_v31 = vsel %vm560_vm0, %v5711_v29, 0.0 }
  0x1b   : > { %707 = vadd.xlane.f32.xlu0 %v706_v10  ;;  %710 = vadd.xlane.f32.xlu1 %v709_v11 }
  0x1f   : > { %713 = vadd.xlane.f32.xlu0 %v712_v14  ;;  %716 = vadd.xlane.f32.xlu1 %v715_v15 }
  0x23   : > { %562 = vadd.xlane.f32.xlu0 %v561_v18  ;;  %565 = vadd.xlane.f32.xlu1 %v564_v19 }
  0x27   : > { %568 = vadd.xlane.f32.xlu0 %v567_v22  ;;  %571 = vadd.xlane.f32.xlu1 %v570_v23 }
  0x2b   : > { %574 = vadd.xlane.f32.xlu0 %v573_v26  ;;  %577 = vadd.xlane.f32.xlu1 %v576_v27 }
  0x2f   : > { %580 = vadd.xlane.f32.xlu0 %v579_v30  ;;  %583 = vadd.xlane.f32.xlu1 %v582_v31 }
  0xa0   : > { %v696_v32 = vpop.xlane.xlu0 %695  ;;  %v702_v33 = vpop.xlane.xlu1 %701 }
  0xa1   : > { %v718_v34 = vmul.f32 0.03125, %v696_v32  ;;  %v720_v35 = vmul.f32 0.03125, %v702_v33 }
  0xa3   : > { %v5717_v36 = vsub.f32 %v550_v0, %v718_v34  ;;  %v5719_v37 = vsub.f32 %v552_v1, %v720_v35 }
  0xa4   : > { %v699_v38 = vpop.xlane.xlu0 %698  ;;  %v705_v39 = vpop.xlane.xlu1 %704 }
  0xa5   : > { %v719_v40 = vmul.f32 0.03125, %v699_v38  ;;  %v721_v41 = vmul.f32 0.03125, %v705_v39  ;;  %v734_v42 = vmul.f32 %v5717_v36, %v5717_v36  ;;  %v736_v43 = vmul.f32 %v5719_v37, %v5719_v37 }
  0xa7   : > { %v5725_v44 = vsub.f32 %v551_v2, %v719_v40  ;;  %v5727_v45 = vsub.f32 %v553_v5, %v721_v41  ;;  %v742_v46 = vsel %vm560_vm0, %v734_v42, 0.0  ;;  %v748_v49 = vsel %vm560_vm0, %v736_v43, 0.0 }
  0xa8   : > { %v708_v47 = vpop.xlane.xlu0 %707  ;;  %743 = vadd.xlane.f32.xlu0 %v742_v46  ;;  %v711_v48 = vpop.xlane.xlu1 %710 }
  0xa9   : > { %v722_v50 = vmul.f32 0.03125, %v708_v47  ;;  %v723_v51 = vmul.f32 0.03125, %v711_v48  ;;  %v735_v52 = vmul.f32 %v5725_v44, %v5725_v44  ;;  %v737_v53 = vmul.f32 %v5727_v45, %v5727_v45 }
  0xab   : > { %v5735_v54 = vsub.f32 %v554_v8, %v722_v50  ;;  %v5737_v55 = vsub.f32 %v555_v9, %v723_v51  ;;  %v745_v56 = vsel %vm560_vm0, %v735_v52, 0.0  ;;  %v751_v59 = vsel %vm560_vm0, %v737_v53, 0.0  ;;  %v948_v53 = vld [vmem:[%s6894_s5 + $0x8] sm:$0xff] }
  0xac   : > { %v714_v57 = vpop.xlane.xlu0 %713  ;;  %746 = vadd.xlane.f32.xlu1 %v745_v56  ;;  %749 = vadd.xlane.f32.xlu0 %v748_v49  ;;  %v717_v58 = vpop.xlane.xlu1 %716 }
  0xad   : > { %v724_v60 = vmul.f32 0.03125, %v714_v57  ;;  %v725_v61 = vmul.f32 0.03125, %v717_v58  ;;  %v738_v62 = vmul.f32 %v5735_v54, %v5735_v54  ;;  %v739_v63 = vmul.f32 %v5737_v55, %v5737_v55  ;;  %v949_v57 = vld [vmem:[%s6894_s5 + $0x10] sm:$0xff]  ;;  %v950_v58 = vld [vmem:[%s6894_s5 + $0x18] sm:$0xff] }
  0xaf   : > { %v5746_v0 = vsub.f32 %v5663_v12, %v724_v60  ;;  %v5749_v1 = vsub.f32 %v5665_v13, %v725_v61  ;;  %v754_v2 = vsel %vm560_vm0, %v738_v62, 0.0  ;;  %v757_v4 = vsel %vm560_vm0, %v739_v63, 0.0  ;;  %v814_v60 = vld [vmem:[%s6893_s4] sm:$0xff]  ;;  %v815_v61 = vld [vmem:[%s6893_s4 + $0x8] sm:$0xff]  ;;  %v816_v63 = vld [vmem:[%s6893_s4 + $0x10] sm:$0xff] }
  0xb0   : > { %752 = vadd.xlane.f32.xlu1 %v751_v59  ;;  %755 = vadd.xlane.f32.xlu0 %v754_v2  ;;  %v563_v3 = vpop.xlane.xlu0 %562  ;;  %v566_v5 = vpop.xlane.xlu1 %565  ;;  %v4958_v59 = vpack.c.bf16 %v950_v58, %v949_v57  ;;  %v4946_v62 = vpack.c.bf16 %v815_v61, %v814_v60  ;;  %v817_v2 = vld [vmem:[%s6893_s4 + $0x18] sm:$0xff] }
  0xb1   : > { %v586_v6 = vmul.f32 0.03125, %v563_v3  ;;  %v587_v7 = vmul.f32 0.03125, %v566_v5  ;;  %v740_v8 = vmul.f32 %v5746_v0, %v5746_v0  ;;  %v741_v9 = vmul.f32 %v5749_v1, %v5749_v1 }
  0xb2   : > { %4947 = vmatprep.subr.bf16.mxu0 %v4946_v62  ;;  %v4950_v3 = vpack.c.bf16 %v817_v2, %v816_v63 }
  0xb3   : > { %v5758_v10 = vsub.f32 %v5678_v16, %v586_v6  ;;  %v5761_v11 = vsub.f32 %v5681_v17, %v587_v7  ;;  %v760_v12 = vsel %vm560_vm0, %v740_v8, 0.0  ;;  %v763_v14 = vsel %vm560_vm0, %v741_v9, 0.0  ;;  %4949 = vmatpush3.bf16.msra.mxu0 %v4946_v62 }
  0xb4   : > { %758 = vadd.xlane.f32.xlu1 %v757_v4  ;;  %761 = vadd.xlane.f32.xlu0 %v760_v12  ;;  %v569_v13 = vpop.xlane.xlu0 %568  ;;  %v572_v15 = vpop.xlane.xlu1 %571 }
  0xb5   : > { %v588_v18 = vmul.f32 0.03125, %v569_v13  ;;  %v589_v19 = vmul.f32 0.03125, %v572_v15  ;;  %v602_v22 = vmul.f32 %v5758_v10, %v5758_v10  ;;  %v603_v16 = vmul.f32 %v5761_v11, %v5761_v11  ;;  %4951 = vmatprep.subr.bf16.mxu0 %v4950_v3 }
  0xb7   : > { %v5770_v23 = vsub.f32 %v5688_v20, %v588_v18  ;;  %v5773_v17 = vsub.f32 %v5691_v21, %v589_v19  ;;  %v610_v26 = vsel %vm560_vm0, %v602_v22, 0.0  ;;  %v613_v30 = vsel %vm560_vm0, %v603_v16, 0.0  ;;  %4953 = vmatpush3.bf16.msra.mxu0 %v4950_v3 }
  0xb8   : > { %764 = vadd.xlane.f32.xlu1 %v763_v14  ;;  %611 = vadd.xlane.f32.xlu0 %v610_v26  ;;  %v575_v27 = vpop.xlane.xlu0 %574  ;;  %v578_v31 = vpop.xlane.xlu1 %577 }
  0xb9   : > { %v590_v32 = vmul.f32 0.03125, %v575_v27  ;;  %v591_v33 = vmul.f32 0.03125, %v578_v31  ;;  %v604_v34 = vmul.f32 %v5770_v23, %v5770_v23  ;;  %v605_v20 = vmul.f32 %v5773_v17, %v5773_v17 }
  0xbb   : > { %v5782_v35 = vsub.f32 %v5698_v24, %v590_v32  ;;  %v5785_v21 = vsub.f32 %v5701_v25, %v591_v33  ;;  %v616_v38 = vsel %vm560_vm0, %v604_v34, 0.0  ;;  %v619_v40 = vsel %vm560_vm0, %v605_v20, 0.0 }
  0xbc   : > { %614 = vadd.xlane.f32.xlu1 %v613_v30  ;;  %617 = vadd.xlane.f32.xlu0 %v616_v38  ;;  %v581_v39 = vpop.xlane.xlu0 %580  ;;  %v584_v41 = vpop.xlane.xlu1 %583  ;;  %v5834_v38 = vld [vmem:[%s6891_s2] ss:$0 sm:$0xff] }
  0xbd   : > { %v592_v42 = vmul.f32 0.03125, %v581_v39  ;;  %v593_v43 = vmul.f32 0.03125, %v584_v41  ;;  %v606_v46 = vmul.f32 %v5782_v35, %v5782_v35  ;;  %v607_v24 = vmul.f32 %v5785_v21, %v5785_v21 }
  0xbf   : > { %v5794_v47 = vsub.f32 %v5708_v28, %v592_v42  ;;  %v5797_v25 = vsub.f32 %v5711_v29, %v593_v43  ;;  %v622_v48 = vsel %vm560_vm0, %v606_v46, 0.0  ;;  %v625_v49 = vsel %vm560_vm0, %v607_v24, 0.0  ;;  %v947_v29 = vld [vmem:[%s6894_s5] sm:$0xff] }
  0xc0   : > { %620 = vadd.xlane.f32.xlu1 %v619_v40  ;;  %623 = vadd.xlane.f32.xlu0 %v622_v48  ;;  %v4954_v56 = vpack.c.bf16 %v948_v53, %v947_v29  ;;  %v5840_v46 = vld [vmem:[%s6892_s3] ss:$0 sm:$0xff] }
  0xc1   : > { %v608_v50 = vmul.f32 %v5794_v47, %v5794_v47  ;;  %v609_v51 = vmul.f32 %v5797_v25, %v5797_v25 }
  0xc2   : > { %4955 = vmatprep.subr.bf16.mxu1 %v4954_v56 }
  0xc3   : > { %v628_v52 = vsel %vm560_vm0, %v608_v50, 0.0  ;;  %v631_v28 = vsel %vm560_vm0, %v609_v51, 0.0  ;;  %4957 = vmatpush3.bf16.msra.mxu1 %v4954_v56 }
  0xc4   : > { %626 = vadd.xlane.f32.xlu1 %v625_v49  ;;  %629 = vadd.xlane.f32.xlu0 %v628_v52 }
  0xc5   : > { %4959 = vmatprep.subr.bf16.mxu1 %v4958_v59 }
  0xc7   : > { %4961 = vmatpush3.bf16.msra.mxu1 %v4958_v59 }
  0xc8   : > { %632 = vadd.xlane.f32.xlu1 %v631_v28 }
 0x135   : > { %v744_v4 = vpop.xlane.xlu0 %743 }
 0x136   : > { %v766_v5 = vmul.f32 0.03125, %v744_v4 }
 0x138   : > { %v774_v6 = vadd.f32 1e-05, %v766_v5 }
 0x139   : > { %v747_v7 = vpop.xlane.xlu1 %746  ;;  %v750_v8 = vpop.xlane.xlu0 %749 }
 0x13a   : > { %5342 = vrsqrt.f32 %v774_v6  ;;  %v767_v9 = vmul.f32 0.03125, %v747_v7  ;;  %v768_v12 = vmul.f32 0.03125, %v750_v8 }
 0x13c   : > { %v775_v13 = vadd.f32 1e-05, %v767_v9  ;;  %v776_v14 = vadd.f32 1e-05, %v768_v12 }
 0x13d   : > { %v753_v15 = vpop.xlane.xlu1 %752  ;;  %v756_v18 = vpop.xlane.xlu0 %755 }
 0x13e   : > { %5344 = vrsqrt.f32 %v775_v13  ;;  %v769_v19 = vmul.f32 0.03125, %v753_v15  ;;  %v770_v22 = vmul.f32 0.03125, %v756_v18 }
 0x13f   : > { %5346 = vrsqrt.f32 %v776_v14 }
 0x140   : > { %v777_v16 = vadd.f32 1e-05, %v769_v19  ;;  %v778_v26 = vadd.f32 1e-05, %v770_v22 }
 0x141   : > { %v759_v27 = vpop.xlane.xlu1 %758  ;;  %v762_v30 = vpop.xlane.xlu0 %761 }
 0x142   : > { %5348 = vrsqrt.f32 %v777_v16  ;;  %v771_v31 = vmul.f32 0.03125, %v759_v27  ;;  %v772_v32 = vmul.f32 0.03125, %v762_v30 }
 0x143   : > { %5350 = vrsqrt.f32 %v778_v26 }
 0x144   : > { %v5343_v33 = vpop.eup %5342  ;;  %v779_v34 = vadd.f32 1e-05, %v771_v31  ;;  %v780_v20 = vadd.f32 1e-05, %v772_v32 }
 0x145   : > { %v765_v39 = vpop.xlane.xlu1 %764  ;;  %v612_v40 = vpop.xlane.xlu0 %611  ;;  %v790_v41 = vmul.f32 %v5343_v33, %v5717_v36 }
 0x146   : > { %5352 = vrsqrt.f32 %v779_v34  ;;  %v773_v42 = vmul.f32 0.03125, %v765_v39  ;;  %v634_v43 = vmul.f32 0.03125, %v612_v40 }
 0x147   : > { %5354 = vrsqrt.f32 %v780_v20  ;;  %v798_v24 = vmul.f32 %v5834_v38, %v790_v41 }
 0x148   : > { %v5345_v48 = vpop.eup %5344  ;;  %v781_v49 = vadd.f32 1e-05, %v773_v42  ;;  %v642_v50 = vadd.f32 1e-05, %v634_v43 }
 0x149   : > { %v5347_v51 = vpop.eup %5346  ;;  %v615_v52 = vpop.xlane.xlu1 %614  ;;  %v806_v29 = vadd.f32 %v5840_v46, %v798_v24  ;;  %v791_v36 = vmul.f32 %v5345_v48, %v5725_v44 }
 0x14a   : > { %v618_v28 = vpop.xlane.xlu0 %617  ;;  %5356 = vrsqrt.f32 %v781_v49  ;;  %v635_v53 = vmul.f32 0.03125, %v615_v52  ;;  %v792_v57 = vmul.f32 %v5347_v51, %v5719_v37 }
 0x14b   : > { %v636_v56 = vmul.f32 0.03125, %v618_v28  ;;  %5358 = vrsqrt.f32 %v642_v50  ;;  %4590 = vmatprep.mubr.msk.f32.mxu1 %vm560_vm0, %v806_v29  ;;  %v799_v58 = vmul.f32 %v5834_v38, %v791_v36 }
 0x14c   : > { %v5349_v59 = vpop.eup %5348  ;;  %v643_v60 = vadd.f32 1e-05, %v635_v53  ;;  %v800_v62 = vmul.f32 %v5834_v38, %v792_v57 }
 0x14d   : > { %v644_v61 = vadd.f32 1e-05, %v636_v56  ;;  %v5351_v63 = vpop.eup %5350  ;;  %v621_v2 = vpop.xlane.xlu1 %620  ;;  %v807_v44 = vadd.f32 %v5840_v46, %v799_v58  ;;  %v793_v4 = vmul.f32 %v5349_v59, %v5727_v45 }
 0x14e   : > { %v624_v3 = vpop.xlane.xlu0 %623  ;;  %5360 = vrsqrt.f32 %v643_v60  ;;  %v637_v5 = vmul.f32 0.03125, %v621_v2  ;;  %v808_v6 = vadd.f32 %v5840_v46, %v800_v62  ;;  %v794_v8 = vmul.f32 %v5351_v63, %v5735_v54 }
 0x14f   : > { %v638_v37 = vmul.f32 0.03125, %v624_v3  ;;  %5362 = vrsqrt.f32 %v644_v61  ;;  %4591 = vmatmul.mubr.msk.f32.vlgmr.msra.gmra.mrb[0].mxu1 %vm560_vm0, %v807_v44  ;;  %v801_v7 = vmul.f32 %v5834_v38, %v793_v4 }
 0x150   : > { %v5353_v9 = vpop.eup %5352  ;;  %v645_v12 = vadd.f32 1e-05, %v637_v5  ;;  %4593 = vmatprep.mubr.msk.f32.mxu1 %vm560_vm0, %v808_v6  ;;  %v802_v19 = vmul.f32 %v5834_v38, %v794_v8 }
 0x151   : > { %v646_v13 = vadd.f32 1e-05, %v638_v37  ;;  %v5355_v14 = vpop.eup %5354  ;;  %v627_v15 = vpop.xlane.xlu1 %626  ;;  %v809_v18 = vadd.f32 %v5840_v46, %v801_v7  ;;  %v795_v22 = vmul.f32 %v5353_v9, %v5737_v55 }
 0x152   : > { %v630_v45 = vpop.xlane.xlu0 %629  ;;  %5364 = vrsqrt.f32 %v645_v12  ;;  %v639_v16 = vmul.f32 0.03125, %v627_v15  ;;  %v796_v27 = vmul.f32 %v5355_v14, %v5746_v0  ;;  %v810_v54 = vadd.f32 %v5840_v46, %v802_v19 }
 0x153   : > { %v640_v26 = vmul.f32 0.03125, %v630_v45  ;;  %5366 = vrsqrt.f32 %v646_v13  ;;  %4594 = vmatmul.mubr.msk.f32.gmra.mrb[2].mxu1 %vm560_vm0, %v809_v18  ;;  %v803_v30 = vmul.f32 %v5834_v38, %v795_v22 }
 0x154   : > { %v5357_v31 = vpop.eup %5356  ;;  %v647_v32 = vadd.f32 1e-05, %v639_v16  ;;  %v804_v34 = vmul.f32 %v5834_v38, %v796_v27  ;;  %4596 = vmatprep.mubr.msk.f32.mxu1 %vm560_vm0, %v810_v54 }
 0x155   : > { %v648_v33 = vadd.f32 1e-05, %v640_v26  ;;  %v5359_v20 = vpop.eup %5358  ;;  %v633_v55 = vpop.xlane.xlu1 %632  ;;  %v811_v39 = vadd.f32 %v5840_v46, %v803_v30  ;;  %v797_v0 = vmul.f32 %v5357_v31, %v5749_v1 }
 0x156   : > { %5368 = vrsqrt.f32 %v647_v32  ;;  %v641_v40 = vmul.f32 0.03125, %v633_v55  ;;  %v812_v41 = vadd.f32 %v5840_v46, %v804_v34  ;;  %v658_v42 = vmul.f32 %v5359_v20, %v5758_v10 }
 0x157   : > { %5370 = vrsqrt.f32 %v648_v33  ;;  %4597 = vmatmul.mubr.msk.f32.gmra.mrb[4].mxu1 %vm560_vm0, %v811_v39  ;;  %v805_v43 = vmul.f32 %v5834_v38, %v797_v0 }
 0x158   : > { %v5361_v24 = vpop.eup %5360  ;;  %v649_v48 = vadd.f32 1e-05, %v641_v40  ;;  %4599 = vmatprep.mubr.msk.f32.mxu1 %vm560_vm0, %v812_v41  ;;  %v672_v49 = vmul.f32 %v5834_v38, %v658_v42 }
 0x159   : > { %v5363_v50 = vpop.eup %5362  ;;  %v813_v1 = vadd.f32 %v5840_v46, %v805_v43  ;;  %v659_v51 = vmul.f32 %v5361_v24, %v5761_v11 }
 0x15a   : > { %5372 = vrsqrt.f32 %v649_v48  ;;  %v686_v52 = vadd.f32 %v5840_v46, %v672_v49  ;;  %v660_v10 = vmul.f32 %v5363_v50, %v5770_v23 }
 0x15b   : > { %4600 = vmatmul.mubr.msk.f32.gmra.mrb[6].mxu1 %vm560_vm0, %v813_v1  ;;  %v673_v28 = vmul.f32 %v5834_v38, %v659_v51 }
 0x15c   : > { %v5365_v29 = vpop.eup %5364  ;;  %4570 = vmatprep.mubr.msk.f32.mxu0 %vm560_vm0, %v686_v52  ;;  %v674_v36 = vmul.f32 %v5834_v38, %v660_v10 }
 0x15d   : > { %v5367_v53 = vpop.eup %5366  ;;  %v687_v56 = vadd.f32 %v5840_v46, %v673_v28  ;;  %v661_v57 = vmul.f32 %v5365_v29, %v5773_v17 }
 0x15e   : > { %v688_v11 = vadd.f32 %v5840_v46, %v674_v36  ;;  %v662_v58 = vmul.f32 %v5367_v53, %v5782_v35 }
 0x15f   : > { %4571 = vmatmul.mubr.msk.f32.vlgmr.msra.gmra.mrb[0].mxu0 %vm560_vm0, %v687_v56  ;;  %v675_v23 = vmul.f32 %v5834_v38, %v661_v57 }
 0x160   : > { %v5369_v59 = vpop.eup %5368  ;;  %4573 = vmatprep.mubr.msk.f32.mxu0 %vm560_vm0, %v688_v11  ;;  %v676_v60 = vmul.f32 %v5834_v38, %v662_v58 }
 0x161   : > { %v5371_v61 = vpop.eup %5370  ;;  %v689_v62 = vadd.f32 %v5840_v46, %v675_v23  ;;  %v663_v63 = vmul.f32 %v5369_v59, %v5785_v21 }
 0x162   : > { %v690_v17 = vadd.f32 %v5840_v46, %v676_v60  ;;  %v664_v2 = vmul.f32 %v5371_v61, %v5794_v47 }
 0x163   : > { %4574 = vmatmul.mubr.msk.f32.gmra.mrb[2].mxu0 %vm560_vm0, %v689_v62  ;;  %v677_v35 = vmul.f32 %v5834_v38, %v663_v63 }
 0x164   : > { %v5373_v3 = vpop.eup %5372  ;;  %4576 = vmatprep.mubr.msk.f32.mxu0 %vm560_vm0, %v690_v17  ;;  %v678_v44 = vmul.f32 %v5834_v38, %v664_v2 }
 0x165   : > { %v691_v4 = vadd.f32 %v5840_v46, %v677_v35  ;;  %v665_v5 = vmul.f32 %v5373_v3, %v5797_v25 }
 0x166   : > { %v692_v37 = vadd.f32 %v5840_v46, %v678_v44 }
 0x167   : > { %4577 = vmatmul.mubr.msk.f32.gmra.mrb[4].mxu0 %vm560_vm0, %v691_v4  ;;  %v679_v21 = vmul.f32 %v5834_v38, %v665_v5 }
 0x168   : > { %4579 = vmatprep.mubr.msk.f32.mxu0 %vm560_vm0, %v692_v37 }
 0x169   : > { %v693_v47 = vadd.f32 %v5840_v46, %v679_v21 }
 0x16b   : > { %4580 = vmatmul.mubr.msk.f32.gmra.mrb[6].mxu0 %vm560_vm0, %v693_v47 }
 0x222   : > { %v4592_v6 = vpop.f32.mrb[0].mxu1 }
 0x223   : > { %v1041_v7 = vpop.f32.mrb[1].mxu1 }
 0x224   : > { %v4962_v25 = vpack.c.bf16 %v4592_v6, %v1041_v7  ;;  %v5911_v9 = vpack.i.bf16 %v4592_v6, %v1041_v7 }
 0x226   : > { %v4595_v12 = vpop.f32.mrb[2].mxu1  ;;  %4964 = vmatprep.subr.msk.bf16.mxu0 %vm5907_vm2, %v4962_v25 }
 0x227   : > { %v1051_v38 = vpop.f32.mrb[3].mxu1  ;;  %4967 = vmatpush3.bf16.xpose.msk.msra.mxu0 %vm5907_vm2, %v4962_v25 }
 0x228   : > { %v4968_v46 = vpack.c.bf16 %v4595_v12, %v1051_v38  ;;  %v5917_v13 = vpack.i.bf16 %v4595_v12, %v1051_v38 }
 0x22a   : > { %v4598_v14 = vpop.f32.mrb[4].mxu1  ;;  %4970 = vmatprep.subr.msk.bf16.mxu0 %vm5907_vm2, %v4968_v46 }
 0x22b   : > { %v1061_v15 = vpop.f32.mrb[5].mxu1 }
 0x22c   : > { %v4974_v45 = vpack.c.bf16 %v4598_v14, %v1061_v15  ;;  %v5921_v18 = vpack.i.bf16 %v4598_v14, %v1061_v15 }
 0x22e   : > { %v4601_v19 = vpop.f32.mrb[6].mxu1 }
 0x22f   : > { %v1071_v22 = vpop.f32.mrb[7].mxu1  ;;  %4973 = vmatpush3.bf16.xpose.msk.msra.mxu0 %vm5907_vm2, %v4968_v46 }
 0x230   : > { %4976 = vmatprep.subr.msk.bf16.mxu0 %vm5907_vm2, %v4974_v45  ;;  %v4980_v16 = vpack.c.bf16 %v4601_v19, %v1071_v22  ;;  %v5927_v26 = vpack.i.bf16 %v4601_v19, %v1071_v22 }
 0x232   : > { %v5929_v27 = vpop.f32.mrb[0].mxu0 }
 0x233   : > { %v5931_v54 = vpop.f32.mrb[1].mxu0 }
 0x234   : > { %4618 = vmatprep.mubr.msk.f32.mxu0 %vm1084_vm1, %v5931_v54 }
 0x236   : > { %v5935_v30 = vpop.f32.mrb[2].mxu0 }
 0x237   : > { %v5937_v31 = vpop.f32.mrb[3].mxu0  ;;  %4979 = vmatpush3.bf16.xpose.msk.msra.mxu0 %vm5907_vm2, %v4974_v45 }
 0x238   : > { %4982 = vmatprep.subr.msk.bf16.mxu0 %vm5907_vm2, %v4980_v16 }
 0x23a   : > { %v5943_v32 = vpop.f32.mrb[4].mxu0 }
 0x23b   : > { %v5945_v33 = vpop.f32.mrb[5].mxu0 }
 0x23e   : > { %v5947_v34 = vpop.f32.mrb[6].mxu0 }
 0x23f   : > { %v5949_v20 = vpop.f32.mrb[7].mxu0  ;;  %4985 = vmatpush3.bf16.xpose.msk.msra.mxu0 %vm5907_vm2, %v4980_v16 }
 0x246   : > { %4619 = vmatmul.mubr.msk.f32.vlgmr.msra.gmra.mrb[8].mxu0 %vm1084_vm1, %v5929_v27 }
 0x247   : > { %4621 = vmatprep.mubr.msk.f32.mxu0 %vm1084_vm1, %v5937_v31 }
 0x24a   : > { %4622 = vmatmul.mubr.msk.f32.gmra.mrb[10].mxu0 %vm1084_vm1, %v5935_v30 }
 0x24b   : > { %4624 = vmatprep.mubr.msk.f32.mxu0 %vm1084_vm1, %v5945_v33 }
 0x24e   : > { %4625 = vmatmul.mubr.msk.f32.gmra.mrb[12].mxu0 %vm1084_vm1, %v5943_v32 }
 0x24f   : > { %4627 = vmatprep.mubr.msk.f32.mxu0 %vm1084_vm1, %v5949_v20 }
 0x252   : > { %4628 = vmatmul.mubr.msk.f32.gmra.mrb[14].mxu0 %vm1084_vm1, %v5947_v34 }
 0x319   : > { %v4620_v55 = vpop.f32.mrb[8].mxu0 }
 0x31a   : > { %v1239_v39 = vmul.f32 0.35355338, %v4620_v55  ;;  %v1199_v0 = vpop.f32.mrb[9].mxu0 }
 0x31b   : > { %v1238_v40 = vmul.f32 0.35355338, %v1199_v0 }
 0x31c   : > { %v1250_v41 = vsel %vm1246_vm3, %v1239_v39, -inf }
 0x31d   : > { %1251 = vmax.xlane.f32.xlu1 %v1250_v41  ;;  %v4623_v42 = vpop.f32.mrb[10].mxu0  ;;  %v1247_v43 = vsel %vm1246_vm3, %v1238_v40, -inf }
 0x31e   : > { %v1241_v24 = vmul.f32 0.35355338, %v4623_v42  ;;  %1248 = vmax.xlane.f32.xlu0 %v1247_v43  ;;  %v1209_v48 = vpop.f32.mrb[11].mxu0 }
 0x31f   : > { %v1240_v49 = vmul.f32 0.35355338, %v1209_v48 }
 0x320   : > { %v1256_v50 = vsel %vm1246_vm3, %v1241_v24, -inf }
 0x321   : > { %1257 = vmax.xlane.f32.xlu1 %v1256_v50  ;;  %v4626_v1 = vpop.f32.mrb[12].mxu0  ;;  %v1253_v51 = vsel %vm1246_vm3, %v1240_v49, -inf }
 0x322   : > { %v1243_v52 = vmul.f32 0.35355338, %v4626_v1  ;;  %1254 = vmax.xlane.f32.xlu0 %v1253_v51  ;;  %v1219_v10 = vpop.f32.mrb[13].mxu0 }
 0x323   : > { %v1242_v28 = vmul.f32 0.35355338, %v1219_v10 }
 0x324   : > { %v1262_v29 = vsel %vm1246_vm3, %v1243_v52, -inf }
 0x325   : > { %1263 = vmax.xlane.f32.xlu1 %v1262_v29  ;;  %v4629_v36 = vpop.f32.mrb[14].mxu0  ;;  %v1259_v53 = vsel %vm1246_vm3, %v1242_v28, -inf }
 0x326   : > { %v5973_v56 = vmul.f32 0.35355338, %v4629_v36  ;;  %1260 = vmax.xlane.f32.xlu0 %v1259_v53  ;;  %v1229_v57 = vpop.f32.mrb[15].mxu0 }
 0x327   : > { %v5975_v11 = vmul.f32 0.35355338, %v1229_v57 }
 0x328   : > { %v1268_v58 = vsel %vm1246_vm3, %v5973_v56, -inf }
 0x329   : > { %1269 = vmax.xlane.f32.xlu1 %v1268_v58  ;;  %v1265_v23 = vsel %vm1246_vm3, %v5975_v11, -inf }
 0x32a   : > { %1266 = vmax.xlane.f32.xlu0 %v1265_v23 }
 0x33a   : > { %5208 = vrot.lane.b32.xlu1 %v5917_v13, %s5550_s26 }
 0x33e   : > { %5213 = vrot.lane.b32.xlu1 %v5921_v18, %s5550_s26 }
 0x340   : > { %5203 = vrot.lane.b32.xlu0 %v5911_v9, %s5550_s26 }
 0x342   : > { %5218 = vrot.lane.b32.xlu1 %v5927_v26, %s5550_s26 }
 0x344   : > { %5223 = vrot.lane.b32.xlu0 %v5911_v9, %s5551_s27 }
 0x346   : > { %5228 = vrot.lane.b32.xlu1 %v5917_v13, %s5551_s27 }
 0x3aa   : > { %v1252_v59 = vpop.xlane.xlu1 %1251 }
 0x3ab   : > { %v1272_v60 = vsub.f32 %v1239_v39, %v1252_v59  ;;  %v1249_v61 = vpop.xlane.xlu0 %1248 }
 0x3ac   : > { %v1271_v62 = vsub.f32 %v1238_v40, %v1249_v61 }
 0x3ad   : > { %v1281_v63 = vmul.f32 1.442695, %v1272_v60 }
 0x3ae   : > { %v1279_v17 = vmul.f32 1.442695, %v1271_v62  ;;  %v1258_v2 = vpop.xlane.xlu1 %1257 }
 0x3af   : > { %5374 = vpow2.f32 %v1281_v63  ;;  %v1274_v35 = vsub.f32 %v1241_v24, %v1258_v2  ;;  %v1255_v3 = vpop.xlane.xlu0 %1254 }
 0x3b0   : > { %5376 = vpow2.f32 %v1279_v17  ;;  %v1273_v44 = vsub.f32 %v1240_v49, %v1255_v3 }
 0x3b1   : > { %v1285_v4 = vmul.f32 1.442695, %v1274_v35 }
 0x3b2   : > { %v1283_v5 = vmul.f32 1.442695, %v1273_v44  ;;  %v1264_v37 = vpop.xlane.xlu1 %1263 }
 0x3b3   : > { %5378 = vpow2.f32 %v1285_v4  ;;  %v1276_v21 = vsub.f32 %v1243_v52, %v1264_v37  ;;  %v1261_v47 = vpop.xlane.xlu0 %1260 }
 0x3b4   : > { %5380 = vpow2.f32 %v1283_v5  ;;  %v1275_v6 = vsub.f32 %v1242_v28, %v1261_v47 }
 0x3b5   : > { %v1289_v7 = vmul.f32 1.442695, %v1276_v21 }
 0x3b6   : > { %v1287_v25 = vmul.f32 1.442695, %v1275_v6  ;;  %v1270_v12 = vpop.xlane.xlu1 %1269 }
 0x3b7   : > { %5382 = vpow2.f32 %v1289_v7  ;;  %v1267_v38 = vpop.xlane.xlu0 %1266  ;;  %v1278_v62 = vsub.f32 %v5973_v56, %v1270_v12 }
 0x3b8   : > { %5384 = vpow2.f32 %v1287_v25  ;;  %v1277_v17 = vsub.f32 %v5975_v11, %v1267_v38 }
 0x3b9   : > { %v5989_v46 = vpop.eup %5374  ;;  %v1293_v63 = vmul.f32 1.442695, %v1278_v62 }
 0x3ba   : > { %v5991_v14 = vpop.eup %5376  ;;  %v5209_v15 = vpop.permute.xlu1 %5208  ;;  %v1298_v45 = vsel %vm1246_vm3, %v5989_v46, 0.0  ;;  %v1291_v2 = vmul.f32 1.442695, %v1277_v17 }
 0x3bb   : > { %1299 = vadd.xlane.f32.xlu1 %v1298_v45  ;;  %v5204_v19 = vpop.permute.xlu0 %5203  ;;  %v1295_v22 = vsel %vm1246_vm3, %v5991_v14, 0.0  ;;  %v5211_v16 = vunpack.i.h.bf16 %v5209_v15  ;;  %v5210_v55 = vunpack.i.l.bf16 %v5209_v15  ;;  %5386 = vpow2.f32 %v1293_v63 }
 0x3bc   : > { %v5206_v39 = vunpack.i.h.bf16 %v5204_v19  ;;  %v5205_v0 = vunpack.i.l.bf16 %v5204_v19  ;;  %1296 = vadd.xlane.f32.xlu0 %v1295_v22  ;;  %5388 = vpow2.f32 %v1291_v2 }
 0x3bd   : > { %v5997_v40 = vpop.eup %5378  ;;  %v4990_v1 = vpack.c.bf16 %v5211_v16, %v5210_v55 }
 0x3be   : > { %v5999_v41 = vpop.eup %5380  ;;  %v5214_v42 = vpop.permute.xlu1 %5213  ;;  %v1304_v43 = vsel %vm1246_vm3, %v5997_v40, 0.0  ;;  %v4986_v24 = vpack.c.bf16 %v5206_v39, %v5205_v0 }
 0x3bf   : > { %1305 = vadd.xlane.f32.xlu1 %v1304_v43  ;;  %v1301_v48 = vsel %vm1246_vm3, %v5999_v41, 0.0  ;;  %v5216_v49 = vunpack.i.h.bf16 %v5214_v42  ;;  %v5215_v50 = vunpack.i.l.bf16 %v5214_v42  ;;  %v5224_v57 = vpop.permute.xlu0 %5223 }
 0x3c0   : > { %1302 = vadd.xlane.f32.xlu0 %v1301_v48  ;;  %4987 = vmatprep.subr.bf16.mxu1 %v4986_v24  ;;  %v5226_v23 = vunpack.i.h.bf16 %v5224_v57  ;;  %v5225_v59 = vunpack.i.l.bf16 %v5224_v57 }
 0x3c1   : > { %v6005_v51 = vpop.eup %5382  ;;  %4989 = vmatpush3.bf16.msra.mxu1 %v4986_v24  ;;  %v4994_v53 = vpack.c.bf16 %v5216_v49, %v5215_v50 }
 0x3c2   : > { %v5219_v52 = vpop.permute.xlu1 %5218  ;;  %4991 = vmatprep.subr.bf16.mxu1 %v4990_v1  ;;  %v1310_v10 = vsel %vm1246_vm3, %v6005_v51, 0.0  ;;  %v6009_v28 = vpop.eup %5384  ;;  %v5002_v61 = vpack.c.bf16 %v5226_v23, %v5225_v59 }
 0x3c3   : > { %v5221_v29 = vunpack.i.h.bf16 %v5219_v52  ;;  %v5220_v36 = vunpack.i.l.bf16 %v5219_v52  ;;  %v1307_v58 = vsel %vm1246_vm3, %v6009_v28, 0.0 }
 0x3c4   : > { %1311 = vadd.xlane.f32.xlu0 %v1310_v10 }
 0x3c5   : > { %4993 = vmatpush3.bf16.msra.mxu1 %v4990_v1  ;;  %v4998_v60 = vpack.c.bf16 %v5221_v29, %v5220_v36  ;;  %v6032_v56 = vpop.eup %5386 }
 0x3c6   : > { %4995 = vmatprep.subr.bf16.mxu1 %v4994_v53  ;;  %v1316_v11 = vsel %vm1246_vm3, %v6032_v56, 0.0  ;;  %v6037_v35 = vpop.eup %5388  ;;  %v5229_v44 = vpop.permute.xlu1 %5228 }
 0x3c7   : > { %v1313_v3 = vsel %vm1246_vm3, %v6037_v35, 0.0  ;;  %v5231_v25 = vunpack.i.h.bf16 %v5229_v44  ;;  %v5230_v12 = vunpack.i.l.bf16 %v5229_v44 }
 0x3c8   : > { %1308 = vadd.xlane.f32.xlu0 %v1307_v58 }
 0x3c9   : > { %4997 = vmatpush3.bf16.msra.mxu1 %v4994_v53  ;;  %v5008_v16 = vpack.c.bf16 %v5231_v25, %v5230_v12 }
 0x3ca   : > { %4999 = vmatprep.subr.bf16.mxu1 %v4998_v60 }
 0x3cd   : > { %5001 = vmatpush3.bf16.msra.mxu1 %v4998_v60 }
 0x3ce   : > { %5004 = vmatprep.subr.msk.bf16.mxu1 %vm5907_vm2, %v5002_v61 }
 0x3d0   : > { %5238 = vrot.lane.b32.xlu1 %v5927_v26, %s5551_s27 }
 0x3d4   : > { %1490 = vrot.lane.b32.xlu1 %v5929_v27, %s5551_s27 }
 0x3de   : > { %5233 = vrot.lane.b32.xlu0 %v5921_v18, %s5551_s27 }
 0x3e2   : > { %1488 = vrot.lane.b32.xlu0 %v5931_v54, %s5551_s27 }
 0x3e6   : > { %1492 = vrot.lane.b32.xlu0 %v5937_v31, %s5551_s27 }
 0x3ea   : > { %1496 = vrot.lane.b32.xlu0 %v5945_v33, %s5551_s27 }
 0x3ee   : > { %1500 = vrot.lane.b32.xlu0 %v5949_v20, %s5551_s27 }
 0x3f2   : > { %5243 = vrot.lane.b32.xlu0 %v5911_v9, %s5552_s28 }
 0x3f6   : > { %5253 = vrot.lane.b32.xlu0 %v5921_v18, %s5552_s28 }
 0x3f8   : > { %1317 = vadd.xlane.f32.xlu1 %v1316_v11 }
 0x3fa   : > { %2164 = vrot.lane.b32.xlu0 %v5931_v54, %s5552_s28 }
 0x3fc   : > { %1314 = vadd.xlane.f32.xlu1 %v1313_v3 }
 0x3fe   : > { %2168 = vrot.lane.b32.xlu0 %v5937_v31, %s5552_s28 }
 0x402   : > { %2172 = vrot.lane.b32.xlu0 %v5945_v33, %s5552_s28 }
 0x406   : > { %2176 = vrot.lane.b32.xlu0 %v5949_v20, %s5552_s28 }
 0x40d   : > { %1494 = vrot.lane.b32.xlu1 %v5935_v30, %s5551_s27 }
 0x411   : > { %1498 = vrot.lane.b32.xlu1 %v5943_v32, %s5551_s27 }
 0x415   : > { %1502 = vrot.lane.b32.xlu1 %v5947_v34, %s5551_s27 }
 0x419   : > { %5248 = vrot.lane.b32.xlu1 %v5917_v13, %s5552_s28 }
 0x41d   : > { %5258 = vrot.lane.b32.xlu1 %v5927_v26, %s5552_s28 }
 0x421   : > { %2166 = vrot.lane.b32.xlu1 %v5929_v27, %s5552_s28 }
 0x425   : > { %2170 = vrot.lane.b32.xlu1 %v5935_v30, %s5552_s28 }
 0x429   : > { %2174 = vrot.lane.b32.xlu1 %v5943_v32, %s5552_s28 }
 0x42d   : > { %2178 = vrot.lane.b32.xlu1 %v5947_v34, %s5552_s28 }
 0x448   : > { %v1300_v4 = vpop.xlane.xlu1 %1299 }
 0x449   : > { %5390 = vrcp.f32 %v1300_v4  ;;  %v1297_v5 = vpop.xlane.xlu0 %1296 }
 0x44a   : > { %5392 = vrcp.f32 %v1297_v5 }
 0x44c   : > { %v1306_v37 = vpop.xlane.xlu1 %1305 }
 0x44d   : > { %5394 = vrcp.f32 %v1306_v37  ;;  %v1303_v21 = vpop.xlane.xlu0 %1302 }
 0x44e   : > { %5396 = vrcp.f32 %v1303_v21 }
 0x450   : > { %v5239_v49 = vpop.permute.xlu1 %5238 }
 0x451   : > { %v1312_v47 = vpop.xlane.xlu0 %1311  ;;  %v5241_v1 = vunpack.i.h.bf16 %v5239_v49  ;;  %v5240_v52 = vunpack.i.l.bf16 %v5239_v49 }
 0x452   : > { %5398 = vrcp.f32 %v1312_v47 }
 0x453   : > { %v5391_v6 = vpop.eup %5390  ;;  %v5020_v29 = vpack.c.bf16 %v5241_v1, %v5240_v52 }
 0x454   : > { %v5393_v7 = vpop.eup %5392  ;;  %v1328_v45 = vmul.f32 %v5391_v6, %v5989_v46 }
 0x455   : > { %v1309_v38 = vpop.xlane.xlu0 %1308  ;;  %v1327_v15 = vmul.f32 %v5393_v7, %v5991_v14 }
 0x456   : > { %5400 = vrcp.f32 %v1309_v38 }
 0x457   : > { %v5395_v19 = vpop.eup %5394  ;;  %4646 = vmatprep.mubr.msk.f32.mxu1 %vm1246_vm3, %v1327_v15 }
 0x458   : > { %v5397_v22 = vpop.eup %5396  ;;  %4647 = vmatmul.mubr.msk.f32.vlgmr.msra.gmra.mrb[8].mxu1 %vm1246_vm3, %v1328_v45  ;;  %v1330_v14 = vmul.f32 %v5395_v19, %v5997_v40 }
 0x459   : > { %5007 = vmatpush3.bf16.xpose.msk.msra.mxu1 %vm5907_vm2, %v5002_v61  ;;  %v5234_v55 = vpop.permute.xlu0 %5233  ;;  %v1329_v39 = vmul.f32 %v5397_v22, %v5999_v41 }
 0x45a   : > { %5010 = vmatprep.subr.msk.bf16.mxu1 %vm5907_vm2, %v5008_v16  ;;  %v5236_v46 = vunpack.i.h.bf16 %v5234_v55  ;;  %v5235_v0 = vunpack.i.l.bf16 %v5234_v55 }
 0x45b   : > { %4649 = vmatprep.mubr.msk.f32.mxu1 %vm1246_vm3, %v1329_v39 }
 0x45c   : > { %4650 = vmatmul.mubr.msk.f32.gmra.mrb[10].mxu1 %vm1246_vm3, %v1330_v14  ;;  %v5399_v43 = vpop.eup %5398  ;;  %v5014_v48 = vpack.c.bf16 %v5236_v46, %v5235_v0 }
 0x45d   : > { %v1489_v42 = vpop.permute.xlu0 %1488  ;;  %v1332_v40 = vmul.f32 %v5399_v43, %v6005_v51  ;;  %v1491_v51 = vpop.permute.xlu1 %1490 }
 0x460   : > { %v5401_v24 = vpop.eup %5400 }
 0x461   : > { %5013 = vmatpush3.bf16.xpose.msk.msra.mxu1 %vm5907_vm2, %v5008_v16  ;;  %v1493_v41 = vpop.permute.xlu0 %1492  ;;  %v1331_v50 = vmul.f32 %v5401_v24, %v6009_v28 }
 0x462   : > { %5016 = vmatprep.subr.msk.bf16.mxu1 %vm5907_vm2, %v5014_v48 }
 0x463   : > { %4652 = vmatprep.mubr.msk.f32.mxu1 %vm1246_vm3, %v1331_v50 }
 0x464   : > { %4653 = vmatmul.mubr.msk.f32.gmra.mrb[12].mxu1 %vm1246_vm3, %v1332_v40 }
 0x465   : > { %v1497_v10 = vpop.permute.xlu0 %1496 }
 0x469   : > { %5019 = vmatpush3.bf16.xpose.msk.msra.mxu1 %vm5907_vm2, %v5014_v48  ;;  %v1501_v36 = vpop.permute.xlu0 %1500 }
 0x46a   : > { %5022 = vmatprep.subr.msk.bf16.mxu1 %vm5907_vm2, %v5020_v29 }
 0x46d   : > { %v5244_v28 = vpop.permute.xlu0 %5243 }
 0x46e   : > { %v5246_v53 = vunpack.i.h.bf16 %v5244_v28  ;;  %v5245_v57 = vunpack.i.l.bf16 %v5244_v28 }
 0x470   : > { %v5042_v58 = vpack.c.bf16 %v5246_v53, %v5245_v57 }
 0x471   : > { %5025 = vmatpush3.bf16.xpose.msk.msra.mxu1 %vm5907_vm2, %v5020_v29  ;;  %v5254_v37 = vpop.permute.xlu0 %5253 }
 0x472   : > { %5044 = vmatprep.subr.msk.bf16.mxu1 %vm5907_vm2, %v5042_v58 }
 0x475   : > { %v2165_v6 = vpop.permute.xlu0 %2164 }
 0x479   : > { %v2169_v15 = vpop.permute.xlu0 %2168 }
 0x47d   : > { %v2173_v19 = vpop.permute.xlu0 %2172 }
 0x481   : > { %v2177_v16 = vpop.permute.xlu0 %2176 }
 0x485   : > { %v1318_v23 = vpop.xlane.xlu1 %1317 }
 0x486   : > { %5402 = vrcp.f32 %v1318_v23 }
 0x489   : > { %v1315_v59 = vpop.xlane.xlu1 %1314 }
 0x48a   : > { %5404 = vrcp.f32 %v1315_v59 }
 0x48d   : > { %v1495_v60 = vpop.permute.xlu1 %1494 }
 0x490   : > { %v5403_v62 = vpop.eup %5402 }
 0x491   : > { %v1499_v61 = vpop.permute.xlu1 %1498  ;;  %v1334_v11 = vmul.f32 %v5403_v62, %v6032_v56  ;;  %v5256_v56 = vunpack.i.h.bf16 %v5254_v37 }
 0x494   : > { %v5405_v63 = vpop.eup %5404 }
 0x495   : > { %v1503_v17 = vpop.permute.xlu1 %1502  ;;  %v1333_v2 = vmul.f32 %v5405_v63, %v6037_v35  ;;  %v5255_v35 = vunpack.i.l.bf16 %v5254_v37 }
 0x497   : > { %4655 = vmatprep.mubr.msk.f32.mxu1 %vm1246_vm3, %v1333_v2  ;;  %v5054_v21 = vpack.c.bf16 %v5256_v56, %v5255_v35 }
 0x498   : > { %4656 = vmatmul.mubr.msk.f32.gmra.mrb[14].mxu1 %vm1246_vm3, %v1334_v11 }
 0x499   : > { %v5249_v3 = vpop.permute.xlu1 %5248  ;;  %4674 = vmatprep.mubr.msk.f32.mxu1 %vm1084_vm1, %v1489_v42 }
 0x49a   : > { %v5251_v44 = vunpack.i.h.bf16 %v5249_v3  ;;  %v5250_v4 = vunpack.i.l.bf16 %v5249_v3 }
 0x49c   : > { %v5048_v5 = vpack.c.bf16 %v5251_v44, %v5250_v4  ;;  %4675 = vmatmul.mubr.msk.f32.vlgmr.msra.gmra.mrb[16].mxu1 %vm1084_vm1, %v1491_v51 }
 0x49d   : > { %5047 = vmatpush3.bf16.xpose.msk.msra.mxu1 %vm5907_vm2, %v5042_v58  ;;  %4677 = vmatprep.mubr.msk.f32.mxu1 %vm1084_vm1, %v1493_v41  ;;  %v5259_v47 = vpop.permute.xlu1 %5258 }
 0x49e   : > { %5050 = vmatprep.subr.msk.bf16.mxu1 %vm5907_vm2, %v5048_v5  ;;  %v5261_v7 = vunpack.i.h.bf16 %v5259_v47  ;;  %v5260_v25 = vunpack.i.l.bf16 %v5259_v47 }
 0x4a0   : > { %4678 = vmatmul.mubr.msk.f32.gmra.mrb[18].mxu1 %vm1084_vm1, %v1495_v60  ;;  %v5060_v12 = vpack.c.bf16 %v5261_v7, %v5260_v25 }
 0x4a1   : > { %4680 = vmatprep.mubr.msk.f32.mxu1 %vm1084_vm1, %v1497_v10  ;;  %v2167_v38 = vpop.permute.xlu1 %2166 }
 0x4a4   : > { %4681 = vmatmul.mubr.msk.f32.gmra.mrb[20].mxu1 %vm1084_vm1, %v1499_v61 }
 0x4a5   : > { %5053 = vmatpush3.bf16.xpose.msk.msra.mxu1 %vm5907_vm2, %v5048_v5  ;;  %4683 = vmatprep.mubr.msk.f32.mxu1 %vm1084_vm1, %v1501_v36  ;;  %v2171_v45 = vpop.permute.xlu1 %2170 }
 0x4a6   : > { %5056 = vmatprep.subr.msk.bf16.mxu1 %vm5907_vm2, %v5054_v21 }
 0x4a8   : > { %4684 = vmatmul.mubr.msk.f32.gmra.mrb[22].mxu1 %vm1084_vm1, %v1503_v17 }
 0x4a9   : > { %4758 = vmatprep.mubr.msk.f32.mxu1 %vm1084_vm1, %v2165_v6  ;;  %v2175_v22 = vpop.permute.xlu1 %2174 }
 0x4ad   : > { %5059 = vmatpush3.bf16.xpose.msk.msra.mxu1 %vm5907_vm2, %v5054_v21  ;;  %v2179_v55 = vpop.permute.xlu1 %2178 }
 0x4ae   : > { %5062 = vmatprep.subr.msk.bf16.mxu1 %vm5907_vm2, %v5060_v12 }
 0x4b5   : > { %5065 = vmatpush3.bf16.xpose.msk.msra.mxu1 %vm5907_vm2, %v5060_v12 }
 0x4bc   : > { %4759 = vmatmul.mubr.msk.f32.vlgmr.msra.gmra.mrb[24].mxu1 %vm1084_vm1, %v2167_v38 }
 0x4bd   : > { %4761 = vmatprep.mubr.msk.f32.mxu1 %vm1084_vm1, %v2169_v15 }
 0x4c0   : > { %4762 = vmatmul.mubr.msk.f32.gmra.mrb[26].mxu1 %vm1084_vm1, %v2171_v45 }
 0x4c1   : > { %4764 = vmatprep.mubr.msk.f32.mxu1 %vm1084_vm1, %v2173_v19 }
 0x4c4   : > { %4765 = vmatmul.mubr.msk.f32.gmra.mrb[28].mxu1 %vm1084_vm1, %v2175_v22 }
 0x4c5   : > { %4767 = vmatprep.mubr.msk.f32.mxu1 %vm1084_vm1, %v2177_v16 }
 0x4c8   : > { %4768 = vmatmul.mubr.msk.f32.gmra.mrb[30].mxu1 %vm1084_vm1, %v2179_v55 }
 0x52b   : > { %v6119_v39 = vpop.f32.mrb[8].mxu1 }
 0x52c   : > { %v6121_v14 = vpop.f32.mrb[9].mxu1 }
 0x52f   : > { %v6123_v46 = vpop.f32.mrb[10].mxu1 }
 0x530   : > { %v6125_v0 = vpop.f32.mrb[11].mxu1 }
 0x537   : > { %v6127_v42 = vpop.f32.mrb[12].mxu1 }
 0x538   : > { %v6129_v43 = vpop.f32.mrb[13].mxu1 }
 0x56b   : > { %v6131_v24 = vpop.f32.mrb[14].mxu1 }
 0x56c   : > { %v6133_v48 = vpop.f32.mrb[15].mxu1 }
 0x56f   : > { %v4676_v49 = vpop.f32.mrb[16].mxu1 }
 0x570   : > { %v1658_v41 = vmul.f32 0.35355338, %v4676_v49  ;;  %v1618_v50 = vpop.f32.mrb[17].mxu1 }
 0x571   : > { %v1657_v40 = vmul.f32 0.35355338, %v1618_v50 }
 0x572   : > { %v1668_v1 = vsel %vm1246_vm3, %v1658_v41, -inf }
 0x573   : > { %1669 = vmax.xlane.f32.xlu1 %v1668_v1  ;;  %v4679_v52 = vpop.f32.mrb[18].mxu1  ;;  %v1665_v10 = vsel %vm1246_vm3, %v1657_v40, -inf }
 0x574   : > { %v1660_v29 = vmul.f32 0.35355338, %v4679_v52  ;;  %1666 = vmax.xlane.f32.xlu0 %v1665_v10  ;;  %v1628_v36 = vpop.f32.mrb[19].mxu1 }
 0x575   : > { %v1659_v53 = vmul.f32 0.35355338, %v1628_v36 }
 0x576   : > { %v1674_v28 = vsel %vm1246_vm3, %v1660_v29, -inf }
 0x577   : > { %v4682_v57 = vpop.f32.mrb[20].mxu1  ;;  %v1671_v61 = vsel %vm1246_vm3, %v1659_v53, -inf }
 0x578   : > { %v1662_v58 = vmul.f32 0.35355338, %v4682_v57  ;;  %1675 = vmax.xlane.f32.xlu0 %v1674_v28  ;;  %v1638_v51 = vpop.f32.mrb[21].mxu1 }
 0x579   : > { %v1661_v59 = vmul.f32 0.35355338, %v1638_v51 }
 0x57a   : > { %v1680_v23 = vsel %vm1246_vm3, %v1662_v58, -inf }
 0x57b   : > { %1681 = vmax.xlane.f32.xlu1 %v1680_v23  ;;  %v4685_v60 = vpop.f32.mrb[22].mxu1  ;;  %v1677_v11 = vsel %vm1246_vm3, %v1661_v59, -inf }
 0x57c   : > { %v1664_v62 = vmul.f32 0.35355338, %v4685_v60  ;;  %1672 = vmax.xlane.f32.xlu0 %v1671_v61  ;;  %v1648_v63 = vpop.f32.mrb[23].mxu1 }
 0x57d   : > { %v1663_v2 = vmul.f32 0.35355338, %v1648_v63 }
 0x57e   : > { %v1686_v17 = vsel %vm1246_vm3, %v1664_v62, -inf }
 0x57f   : > { %1687 = vmax.xlane.f32.xlu1 %v1686_v17  ;;  %v1683_v3 = vsel %vm1246_vm3, %v1663_v2, -inf }
 0x580   : > { %1678 = vmax.xlane.f32.xlu0 %v1677_v11 }
 0x584   : > { %1684 = vmax.xlane.f32.xlu0 %v1683_v3 }
 0x58f   : > { %v6143_v44 = vpop.f32.mrb[24].mxu1 }
 0x590   : > { %v6145_v4 = vpop.f32.mrb[25].mxu1  ;;  %5268 = vrot.lane.b32.xlu1 %v5917_v13, %s5553_s29 }
 0x593   : > { %v6149_v5 = vpop.f32.mrb[26].mxu1 }
 0x594   : > { %v6151_v37 = vpop.f32.mrb[27].mxu1 }
 0x597   : > { %v6153_v56 = vpop.f32.mrb[28].mxu1 }
 0x598   : > { %v6155_v35 = vpop.f32.mrb[29].mxu1 }
 0x59a   : > { %5263 = vrot.lane.b32.xlu0 %v5911_v9, %s5553_s29 }
 0x59b   : > { %v6159_v21 = vpop.f32.mrb[30].mxu1 }
 0x59c   : > { %v6161_v47 = vpop.f32.mrb[31].mxu1 }
 0x600   : > { %v1670_v6 = vpop.xlane.xlu1 %1669 }
 0x601   : > { %v1690_v7 = vsub.f32 %v1658_v41, %v1670_v6  ;;  %v1667_v25 = vpop.xlane.xlu0 %1666 }
 0x602   : > { %v1689_v12 = vsub.f32 %v1657_v40, %v1667_v25 }
 0x603   : > { %v1699_v38 = vmul.f32 1.442695, %v1690_v7 }
 0x604   : > { %v1697_v15 = vmul.f32 1.442695, %v1689_v12 }
 0x605   : > { %5406 = vpow2.f32 %v1699_v38  ;;  %v1676_v45 = vpop.xlane.xlu0 %1675 }
 0x606   : > { %5408 = vpow2.f32 %v1697_v15  ;;  %v1692_v19 = vsub.f32 %v1660_v29, %v1676_v45 }
 0x608   : > { %v1703_v22 = vmul.f32 1.442695, %v1692_v19  ;;  %v1682_v16 = vpop.xlane.xlu1 %1681 }
 0x609   : > { %v1694_v55 = vsub.f32 %v1662_v58, %v1682_v16  ;;  %v1673_v49 = vpop.xlane.xlu0 %1672 }
 0x60a   : > { %5410 = vpow2.f32 %v1703_v22  ;;  %v1691_v50 = vsub.f32 %v1659_v53, %v1673_v49 }
 0x60b   : > { %v1707_v1 = vmul.f32 1.442695, %v1694_v55 }
 0x60c   : > { %v1701_v52 = vmul.f32 1.442695, %v1691_v50  ;;  %v1688_v10 = vpop.xlane.xlu1 %1687 }
 0x60d   : > { %5412 = vpow2.f32 %v1707_v1  ;;  %v1696_v36 = vsub.f32 %v1664_v62, %v1688_v10  ;;  %v1679_v41 = vpop.xlane.xlu0 %1678  ;;  %v6212_v1 = vmul.f32 0.35355338, %v6145_v4 }
 0x60e   : > { %5414 = vpow2.f32 %v1701_v52  ;;  %v1693_v40 = vsub.f32 %v1661_v59, %v1679_v41  ;;  %v6215_v52 = vmul.f32 0.35355338, %v6143_v44 }
 0x60f   : > { %v6163_v28 = vpop.eup %5406  ;;  %v1711_v57 = vmul.f32 1.442695, %v1696_v36 }
 0x610   : > { %v6165_v51 = vpop.eup %5408  ;;  %v1705_v29 = vmul.f32 1.442695, %v1693_v40  ;;  %v1716_v58 = vsel %vm1246_vm3, %v6163_v28, 0.0  ;;  %v5269_v59 = vpop.permute.xlu1 %5268 }
 0x611   : > { %5416 = vpow2.f32 %v1711_v57  ;;  %1717 = vadd.xlane.f32.xlu1 %v1716_v58  ;;  %v1685_v53 = vpop.xlane.xlu0 %1684  ;;  %v1713_v23 = vsel %vm1246_vm3, %v6165_v51, 0.0  ;;  %v5271_v7 = vunpack.i.h.bf16 %v5269_v59  ;;  %v5270_v25 = vunpack.i.l.bf16 %v5269_v59 }
 0x612   : > { %5418 = vpow2.f32 %v1705_v29  ;;  %v1695_v60 = vsub.f32 %v1663_v2, %v1685_v53  ;;  %1714 = vadd.xlane.f32.xlu0 %v1713_v23 }
 0x613   : > { %v5030_v19 = vpack.c.bf16 %v5271_v7, %v5270_v25 }
 0x614   : > { %v6171_v61 = vpop.eup %5410  ;;  %v1709_v62 = vmul.f32 1.442695, %v1695_v60 }
 0x615   : > { %v5264_v63 = vpop.permute.xlu0 %5263  ;;  %v1722_v17 = vsel %vm1246_vm3, %v6171_v61, 0.0 }
 0x616   : > { %5420 = vpow2.f32 %v1709_v62  ;;  %v5266_v11 = vunpack.i.h.bf16 %v5264_v63  ;;  %v5265_v3 = vunpack.i.l.bf16 %v5264_v63  ;;  %1723 = vadd.xlane.f32.xlu1 %v1722_v17 }
 0x617   : > { %v6175_v6 = vpop.eup %5412 }
 0x618   : > { %v6177_v12 = vpop.eup %5414  ;;  %v5026_v2 = vpack.c.bf16 %v5266_v11, %v5265_v3  ;;  %v1728_v38 = vsel %vm1246_vm3, %v6175_v6, 0.0 }
 0x619   : > { %v1719_v15 = vsel %vm1246_vm3, %v6177_v12, 0.0 }
 0x61a   : > { %1729 = vadd.xlane.f32.xlu1 %v1728_v38  ;;  %1720 = vadd.xlane.f32.xlu0 %v1719_v15 }
 0x61b   : > { %v6183_v45 = vpop.eup %5416  ;;  %5027 = vmatprep.subr.bf16.mxu0 %v5026_v2 }
 0x61c   : > { %v6185_v22 = vpop.eup %5418  ;;  %5029 = vmatpush3.bf16.msra.mxu0 %v5026_v2  ;;  %v1734_v16 = vsel %vm1246_vm3, %v6183_v45, 0.0 }
 0x61d   : > { %5031 = vmatprep.subr.bf16.mxu0 %v5030_v19  ;;  %v1725_v55 = vsel %vm1246_vm3, %v6185_v22, 0.0 }
 0x61e   : > { %1735 = vadd.xlane.f32.xlu1 %v1734_v16  ;;  %1726 = vadd.xlane.f32.xlu0 %v1725_v55 }
 0x620   : > { %v6191_v49 = vpop.eup %5420  ;;  %5033 = vmatpush3.bf16.msra.mxu0 %v5030_v19 }
 0x621   : > { %v1731_v50 = vsel %vm1246_vm3, %v6191_v49, 0.0 }
 0x622   : > { %1732 = vadd.xlane.f32.xlu1 %v1731_v50 }
 0x633   : > { %5278 = vrot.lane.b32.xlu1 %v5927_v26, %s5553_s29 }
 0x634   : > { %5273 = vrot.lane.b32.xlu0 %v5921_v18, %s5553_s29 }
 0x637   : > { %5288 = vrot.lane.b32.xlu1 %v5917_v13, %s5554_s0 }
 0x638   : > { %5283 = vrot.lane.b32.xlu0 %v5911_v9, %s5554_s0 }
 0x63b   : > { %5298 = vrot.lane.b32.xlu1 %v5927_v26, %s5554_s0 }
 0x63c   : > { %5293 = vrot.lane.b32.xlu0 %v5921_v18, %s5554_s0 }
 0x63f   : > { %2721 = vrot.lane.b32.xlu1 %v5929_v27, %s5554_s0  ;;  %v6218_v27 = vmul.f32 0.35355338, %v6151_v37 }
 0x640   : > { %2719 = vrot.lane.b32.xlu0 %v5931_v54, %s5554_s0  ;;  %v2341_v54 = vsel %vm1246_vm3, %v6212_v1, -inf }
 0x643   : > { %2725 = vrot.lane.b32.xlu1 %v5935_v30, %s5554_s0  ;;  %v6223_v30 = vmul.f32 0.35355338, %v6149_v5  ;;  %v6243_v5 = vmul.f32 0.35355338, %v6161_v47 }
 0x644   : > { %2723 = vrot.lane.b32.xlu0 %v5937_v31, %s5554_s0  ;;  %v6226_v31 = vmul.f32 0.35355338, %v6153_v56 }
 0x645   : > { %v2350_v44 = vsel %vm1246_vm3, %v6223_v30, -inf }
 0x646   : > { %v2356_v4 = vsel %vm1246_vm3, %v6226_v31, -inf }
 0x647   : > { %2729 = vrot.lane.b32.xlu1 %v5943_v32, %s5554_s0  ;;  %v2347_v32 = vsel %vm1246_vm3, %v6218_v27, -inf }
 0x648   : > { %2727 = vrot.lane.b32.xlu0 %v5945_v33, %s5554_s0  ;;  %v2344_v33 = vsel %vm1246_vm3, %v6215_v52, -inf }
 0x64b   : > { %2733 = vrot.lane.b32.xlu1 %v5947_v34, %s5554_s0  ;;  %v6233_v34 = vmul.f32 0.35355338, %v6155_v35  ;;  %v2359_v35 = vsel %vm1246_vm3, %v6243_v5, -inf }
 0x64c   : > { %2731 = vrot.lane.b32.xlu0 %v5949_v20, %s5554_s0  ;;  %v6236_v20 = vmul.f32 0.35355338, %v6159_v21 }
 0x64d   : > { %v2353_v37 = vsel %vm1246_vm3, %v6233_v34, -inf }
 0x64e   : > { %v2362_v56 = vsel %vm1246_vm3, %v6236_v20, -inf }
 0x66b   : > { %2342 = vmax.xlane.f32.xlu0 %v2341_v54 }
 0x66f   : > { %2348 = vmax.xlane.f32.xlu0 %v2347_v32  ;;  %2345 = vmax.xlane.f32.xlu1 %v2344_v33 }
 0x673   : > { %2351 = vmax.xlane.f32.xlu0 %v2350_v44  ;;  %2357 = vmax.xlane.f32.xlu1 %v2356_v4 }
 0x677   : > { %2354 = vmax.xlane.f32.xlu0 %v2353_v37  ;;  %2363 = vmax.xlane.f32.xlu1 %v2362_v56 }
 0x67b   : > { %2360 = vmax.xlane.f32.xlu0 %v2359_v35 }
 0x688   : > { %5308 = vrot.lane.b32.xlu1 %v5917_v13, %s5555_s17 }
 0x691   : > { %5303 = vrot.lane.b32.xlu0 %v5911_v9, %s5555_s17 }
 0x69e   : > { %v1718_v21 = vpop.xlane.xlu1 %1717 }
 0x69f   : > { %v1715_v47 = vpop.xlane.xlu0 %1714 }
 0x6a0   : > { %5422 = vrcp.f32 %v1715_v47 }
 0x6a1   : > { %5424 = vrcp.f32 %v1718_v21 }
 0x6a3   : > { %v1724_v10 = vpop.xlane.xlu1 %1723 }
 0x6a7   : > { %v1730_v36 = vpop.xlane.xlu1 %1729  ;;  %v1721_v41 = vpop.xlane.xlu0 %1720 }
 0x6a8   : > { %5426 = vrcp.f32 %v1721_v41 }
 0x6a9   : > { %5428 = vrcp.f32 %v1724_v10 }
 0x6aa   : > { %v5423_v40 = vpop.eup %5422 }
 0x6ab   : > { %v1736_v57 = vpop.xlane.xlu1 %1735  ;;  %v1727_v29 = vpop.xlane.xlu0 %1726  ;;  %v1745_v58 = vmul.f32 %v5423_v40, %v6165_v51 }
 0x6ac   : > { %5430 = vrcp.f32 %v1727_v29  ;;  %v5425_v38 = vpop.eup %5424 }
 0x6ad   : > { %4702 = vmatprep.mubr.msk.f32.mxu0 %vm1246_vm3, %v1745_v58  ;;  %5432 = vrcp.f32 %v1730_v36  ;;  %v1746_v54 = vmul.f32 %v5425_v38, %v6163_v28 }
 0x6af   : > { %v1733_v53 = vpop.xlane.xlu1 %1732  ;;  %v5274_v23 = vpop.permute.xlu0 %5273 }
 0x6b0   : > { %v5276_v60 = vunpack.i.h.bf16 %v5274_v23  ;;  %v5275_v59 = vunpack.i.l.bf16 %v5274_v23  ;;  %5434 = vrcp.f32 %v1733_v53 }
 0x6b1   : > { %5436 = vrcp.f32 %v1736_v57 }
 0x6b2   : > { %v5034_v62 = vpack.c.bf16 %v5276_v60, %v5275_v59  ;;  %v5427_v16 = vpop.eup %5426 }
 0x6b3   : > { %v5279_v63 = vpop.permute.xlu1 %5278  ;;  %v5284_v17 = vpop.permute.xlu0 %5283  ;;  %v1747_v4 = vmul.f32 %v5427_v16, %v6177_v12 }
 0x6b4   : > { %v5281_v11 = vunpack.i.h.bf16 %v5279_v63  ;;  %v5280_v3 = vunpack.i.l.bf16 %v5279_v63  ;;  %v5286_v7 = vunpack.i.h.bf16 %v5284_v17  ;;  %v5285_v25 = vunpack.i.l.bf16 %v5284_v17  ;;  %5035 = vmatprep.subr.bf16.mxu0 %v5034_v62  ;;  %v5429_v33 = vpop.eup %5428 }
 0x6b5   : > { %5037 = vmatpush3.bf16.msra.mxu0 %v5034_v62  ;;  %v1748_v21 = vmul.f32 %v5429_v33, %v6171_v61 }
 0x6b6   : > { %v5038_v51 = vpack.c.bf16 %v5281_v11, %v5280_v3  ;;  %v5082_v2 = vpack.c.bf16 %v5286_v7, %v5285_v25  ;;  %v5431_v37 = vpop.eup %5430 }
 0x6b7   : > { %v5289_v15 = vpop.permute.xlu1 %5288  ;;  %v5294_v19 = vpop.permute.xlu0 %5293  ;;  %v1749_v47 = vmul.f32 %v5431_v37, %v6185_v22 }
 0x6b8   : > { %v5291_v55 = vunpack.i.h.bf16 %v5289_v15  ;;  %v5290_v50 = vunpack.i.l.bf16 %v5289_v15  ;;  %5039 = vmatprep.subr.bf16.mxu0 %v5038_v51  ;;  %5084 = vmatprep.subr.msk.bf16.mxu1 %vm5907_vm2, %v5082_v2  ;;  %v5296_v56 = vunpack.i.h.bf16 %v5294_v19  ;;  %v5295_v35 = vunpack.i.l.bf16 %v5294_v19  ;;  %v5433_v28 = vpop.eup %5432 }
 0x6b9   : > { %5041 = vmatpush3.bf16.msra.mxu0 %v5038_v51  ;;  %5087 = vmatpush3.bf16.xpose.msk.msra.mxu1 %vm5907_vm2, %v5082_v2  ;;  %v1750_v41 = vmul.f32 %v5433_v28, %v6175_v6  ;;  %v1080_v28 = vld [vmem:[%s6895_s6] sm:$0xff] }
 0x6ba   : > { %v5088_v32 = vpack.c.bf16 %v5291_v55, %v5290_v50  ;;  %v5435_v10 = vpop.eup %5434  ;;  %v5094_v36 = vpack.c.bf16 %v5296_v56, %v5295_v35 }
 0x6bb   : > { %v2720_v44 = vpop.permute.xlu0 %2719  ;;  %v5299_v12 = vpop.permute.xlu1 %5298  ;;  %v1751_v61 = vmul.f32 %v5435_v10, %v6191_v49 }
 0x6bc   : > { %4703 = vmatmul.mubr.msk.f32.vlgmr.msra.gmra.mrb[16].mxu0 %vm1246_vm3, %v1746_v54  ;;  %5090 = vmatprep.subr.msk.bf16.mxu1 %vm5907_vm2, %v5088_v32  ;;  %v5437_v40 = vpop.eup %5436  ;;  %v5301_v57 = vunpack.i.h.bf16 %v5299_v12  ;;  %v5300_v22 = vunpack.i.l.bf16 %v5299_v12 }
 0x6bd   : > { %4828 = vmatprep.mubr.msk.f32.mxu1 %vm1084_vm1, %v2720_v44  ;;  %4705 = vmatprep.mubr.msk.f32.mxu0 %vm1246_vm3, %v1747_v4  ;;  %v1752_v29 = vmul.f32 %v5437_v40, %v6183_v45 }
 0x6be   : > { %v5100_v58 = vpack.c.bf16 %v5301_v57, %v5300_v22 }
 0x6bf   : > { %v2722_v6 = vpop.permute.xlu1 %2721  ;;  %v2724_v49 = vpop.permute.xlu0 %2723 }
 0x6c0   : > { %4706 = vmatmul.mubr.msk.f32.gmra.mrb[18].mxu0 %vm1246_vm3, %v1748_v21 }
 0x6c1   : > { %4708 = vmatprep.mubr.msk.f32.mxu0 %vm1246_vm3, %v1749_v47  ;;  %5093 = vmatpush3.bf16.xpose.msk.msra.mxu1 %vm5907_vm2, %v5088_v32 }
 0x6c2   : > { %5096 = vmatprep.subr.msk.bf16.mxu1 %vm5907_vm2, %v5094_v36 }
 0x6c3   : > { %v2726_v53 = vpop.permute.xlu1 %2725  ;;  %v2728_v45 = vpop.permute.xlu0 %2727 }
 0x6c4   : > { %4709 = vmatmul.mubr.msk.f32.gmra.mrb[20].mxu0 %vm1246_vm3, %v1750_v41 }
 0x6c5   : > { %4711 = vmatprep.mubr.msk.f32.mxu0 %vm1246_vm3, %v1751_v61 }
 0x6c7   : > { %v2730_v23 = vpop.permute.xlu1 %2729  ;;  %v2732_v60 = vpop.permute.xlu0 %2731 }
 0x6c8   : > { %4712 = vmatmul.mubr.msk.f32.gmra.mrb[22].mxu0 %vm1246_vm3, %v1752_v29 }
 0x6c9   : > { %5099 = vmatpush3.bf16.xpose.msk.msra.mxu1 %vm5907_vm2, %v5094_v36 }
 0x6ca   : > { %5102 = vmatprep.subr.msk.bf16.mxu1 %vm5907_vm2, %v5100_v58 }
 0x6cb   : > { %v2734_v59 = vpop.permute.xlu1 %2733 }
 0x6d1   : > { %5105 = vmatpush3.bf16.xpose.msk.msra.mxu1 %vm5907_vm2, %v5100_v58 }
 0x6d8   : > { %4829 = vmatmul.mubr.msk.f32.vlgmr.msra.gmra.mrb[32].mxu1 %vm1084_vm1, %v2722_v6 }
 0x6d9   : > { %4831 = vmatprep.mubr.msk.f32.mxu1 %vm1084_vm1, %v2724_v49 }
 0x6dc   : > { %4832 = vmatmul.mubr.msk.f32.gmra.mrb[34].mxu1 %vm1084_vm1, %v2726_v53 }
 0x6dd   : > { %4834 = vmatprep.mubr.msk.f32.mxu1 %vm1084_vm1, %v2728_v45 }
 0x6e0   : > { %4835 = vmatmul.mubr.msk.f32.gmra.mrb[36].mxu1 %vm1084_vm1, %v2730_v23 }
 0x6e1   : > { %4837 = vmatprep.mubr.msk.f32.mxu1 %vm1084_vm1, %v2732_v60 }
 0x6e4   : > { %4838 = vmatmul.mubr.msk.f32.gmra.mrb[38].mxu1 %vm1084_vm1, %v2734_v59 }
 0x6f8   : > { %v2343_v8 = vpop.xlane.xlu0 %2342 }
 0x6f9   : > { %v2365_v62 = vsub.f32 %v6212_v1, %v2343_v8 }
 0x6fb   : > { %v2373_v63 = vmul.f32 1.442695, %v2365_v62 }
 0x6fc   : > { %v2346_v17 = vpop.xlane.xlu1 %2345  ;;  %v2349_v11 = vpop.xlane.xlu0 %2348 }
 0x6fd   : > { %5438 = vpow2.f32 %v2373_v63  ;;  %v2366_v3 = vsub.f32 %v6215_v52, %v2346_v17  ;;  %v2367_v7 = vsub.f32 %v6218_v27, %v2349_v11 }
 0x6ff   : > { %v2375_v25 = vmul.f32 1.442695, %v2366_v3  ;;  %v2377_v51 = vmul.f32 1.442695, %v2367_v7 }
 0x700   : > { %v2358_v2 = vpop.xlane.xlu1 %2357  ;;  %v2352_v38 = vpop.xlane.xlu0 %2351 }
 0x701   : > { %5440 = vpow2.f32 %v2375_v25  ;;  %v2370_v15 = vsub.f32 %v6226_v31, %v2358_v2  ;;  %v2368_v19 = vsub.f32 %v6223_v30, %v2352_v38 }
 0x702   : > { %5442 = vpow2.f32 %v2377_v51 }
 0x703   : > { %v2379_v16 = vmul.f32 1.442695, %v2368_v19  ;;  %v2383_v1 = vmul.f32 1.442695, %v2370_v15 }
 0x704   : > { %v2364_v55 = vpop.xlane.xlu1 %2363  ;;  %v2355_v50 = vpop.xlane.xlu0 %2354 }
 0x705   : > { %v2372_v54 = vsub.f32 %v6236_v20, %v2364_v55  ;;  %v2369_v52 = vsub.f32 %v6233_v34, %v2355_v50  ;;  %5444 = vpow2.f32 %v2379_v16 }
 0x706   : > { %5446 = vpow2.f32 %v2383_v1 }
 0x707   : > { %v6302_v27 = vpop.eup %5438  ;;  %v2381_v32 = vmul.f32 1.442695, %v2369_v52  ;;  %v2387_v33 = vmul.f32 1.442695, %v2372_v54 }
 0x708   : > { %v2361_v44 = vpop.xlane.xlu0 %2360  ;;  %v2389_v31 = vsel %vm1246_vm3, %v6302_v27, 0.0  ;;  %v5309_v60 = vpop.permute.xlu1 %5308 }
 0x709   : > { %v2371_v30 = vsub.f32 %v6243_v5, %v2361_v44  ;;  %2390 = vadd.xlane.f32.xlu0 %v2389_v31  ;;  %5448 = vpow2.f32 %v2381_v32  ;;  %v1081_v5 = vld [vmem:[%s6895_s6 + $0x8] sm:$0xff]  ;;  %v5311_v3 = vunpack.i.h.bf16 %v5309_v60  ;;  %v5310_v7 = vunpack.i.l.bf16 %v5309_v60 }
 0x70a   : > { %5450 = vpow2.f32 %v2387_v33  ;;  %4714 = vmatprep.subr.mxu0 %v1081_v5 }
 0x70b   : > { %v6307_v4 = vpop.eup %5440  ;;  %v2385_v34 = vmul.f32 1.442695, %v2371_v30  ;;  %4715 = vmatpush3.msra.mxu0 %v1081_v5  ;;  %v5070_v2 = vpack.c.bf16 %v5311_v3, %v5310_v7 }
 0x70c   : > { %v6309_v37 = vpop.eup %5442  ;;  %v2392_v20 = vsel %vm1246_vm3, %v6307_v4, 0.0  ;;  %4728 = vmatprep.subr.mxu0 %v1080_v28  ;;  %v5304_v22 = vpop.permute.xlu0 %5303 }
 0x70d   : > { %2393 = vadd.xlane.f32.xlu1 %v2392_v20  ;;  %v2395_v56 = vsel %vm1246_vm3, %v6309_v37, 0.0  ;;  %5452 = vpow2.f32 %v2385_v34  ;;  %v5306_v29 = vunpack.i.h.bf16 %v5304_v22  ;;  %v5305_v58 = vunpack.i.l.bf16 %v5304_v22 }
 0x70e   : > { %2396 = vadd.xlane.f32.xlu0 %v2395_v56 }
 0x70f   : > { %v6318_v35 = vpop.eup %5444  ;;  %v5066_v53 = vpack.c.bf16 %v5306_v29, %v5305_v58 }
 0x710   : > { %v2398_v21 = vsel %vm1246_vm3, %v6318_v35, 0.0  ;;  %v6325_v47 = vpop.eup %5446 }
 0x711   : > { %2399 = vadd.xlane.f32.xlu1 %v2398_v21  ;;  %v2404_v36 = vsel %vm1246_vm3, %v6325_v47, 0.0 }
 0x713   : > { %v6327_v10 = vpop.eup %5448 }
 0x714   : > { %v2401_v12 = vsel %vm1246_vm3, %v6327_v10, 0.0  ;;  %v6333_v41 = vpop.eup %5450 }
 0x715   : > { %2405 = vadd.xlane.f32.xlu1 %v2404_v36  ;;  %2402 = vadd.xlane.f32.xlu0 %v2401_v12  ;;  %v2410_v40 = vsel %vm1246_vm3, %v6333_v41, 0.0 }
 0x717   : > { %v6337_v61 = vpop.eup %5452 }
 0x718   : > { %v2407_v57 = vsel %vm1246_vm3, %v6337_v61, 0.0 }
 0x719   : > { %2411 = vadd.xlane.f32.xlu1 %v2410_v40 }
 0x71d   : > { %2408 = vadd.xlane.f32.xlu1 %v2407_v57 }
 0x72b   : > { %5313 = vrot.lane.b32.xlu0 %v5921_v18, %s5555_s17 }
 0x72e   : > { %5318 = vrot.lane.b32.xlu1 %v5927_v26, %s5555_s17 }
 0x78f   : > { %v4704_v6 = vpop.f32.mrb[16].mxu0 }
 0x790   : > { %v1867_v49 = vpop.f32.mrb[17].mxu0 }
 0x791   : > { %4716 = vmatprep.mubr.msk.f32.mxu0 %vm1084_vm1, %v1867_v49 }
 0x792   : > { %4717 = vmatmul.mubr.msk.f32.vlgmr.msra.gmra.mrb[24].mxu0 %vm1084_vm1, %v4704_v6 }
 0x793   : > { %4729 = vmatpush3.msra.mxu0 %v1080_v28  ;;  %v4707_v45 = vpop.f32.mrb[18].mxu0 }
 0x794   : > { %5067 = vmatprep.subr.bf16.mxu0 %v5066_v53  ;;  %v1877_v23 = vpop.f32.mrb[19].mxu0 }
 0x795   : > { %4719 = vmatprep.mubr.msk.f32.mxu0 %vm1084_vm1, %v1877_v23 }
 0x796   : > { %4720 = vmatmul.mubr.msk.f32.gmra.mrb[26].mxu0 %vm1084_vm1, %v4707_v45  ;;  %v2391_v62 = vpop.xlane.xlu0 %2390 }
 0x797   : > { %v4710_v59 = vpop.f32.mrb[20].mxu0  ;;  %5454 = vrcp.f32 %v2391_v62 }
 0x798   : > { %v1887_v8 = vpop.f32.mrb[21].mxu0 }
 0x799   : > { %4722 = vmatprep.mubr.msk.f32.mxu0 %vm1084_vm1, %v1887_v8 }
 0x79a   : > { %v2394_v63 = vpop.xlane.xlu1 %2393  ;;  %4723 = vmatmul.mubr.msk.f32.gmra.mrb[28].mxu0 %vm1084_vm1, %v4710_v59 }
 0x79b   : > { %v4713_v17 = vpop.f32.mrb[22].mxu0  ;;  %v2397_v25 = vpop.xlane.xlu0 %2396  ;;  %5456 = vrcp.f32 %v2394_v63 }
 0x79c   : > { %v1897_v11 = vpop.f32.mrb[23].mxu0  ;;  %5458 = vrcp.f32 %v2397_v25 }
 0x79d   : > { %4725 = vmatprep.mubr.msk.f32.mxu0 %vm1084_vm1, %v1897_v11 }
 0x79e   : > { %4726 = vmatmul.mubr.msk.f32.gmra.mrb[30].mxu0 %vm1084_vm1, %v4713_v17  ;;  %v2400_v51 = vpop.xlane.xlu1 %2399 }
 0x79f   : > { %4730 = vmatprep.mubr.msk.f32.mxu0 %vm1084_vm1, %v6121_v14  ;;  %5460 = vrcp.f32 %v2400_v51 }
 0x7a2   : > { %4731 = vmatmul.mubr.msk.f32.vlgmr.msra.gmra.mrb[24].mxu0 %vm1084_vm1, %v6119_v39  ;;  %v2406_v38 = vpop.xlane.xlu1 %2405  ;;  %v2403_v15 = vpop.xlane.xlu0 %2402 }
 0x7a3   : > { %5069 = vmatpush3.bf16.msra.mxu0 %v5066_v53  ;;  %4733 = vmatprep.mubr.msk.f32.mxu0 %vm1084_vm1, %v6125_v0  ;;  %v5455_v39 = vpop.eup %5454  ;;  %5462 = vrcp.f32 %v2403_v15 }
 0x7a4   : > { %5071 = vmatprep.subr.bf16.mxu0 %v5070_v2  ;;  %v2421_v52 = vmul.f32 %v5455_v39, %v6302_v27  ;;  %5464 = vrcp.f32 %v2406_v38 }
 0x7a5   : > { %v5457_v34 = vpop.eup %5456 }
 0x7a6   : > { %4734 = vmatmul.mubr.msk.f32.gmra.mrb[26].mxu0 %vm1084_vm1, %v6123_v46  ;;  %v2412_v19 = vpop.xlane.xlu1 %2411  ;;  %v5314_v16 = vpop.permute.xlu0 %5313  ;;  %v2422_v12 = vmul.f32 %v5457_v34, %v6307_v4 }
 0x7a7   : > { %5073 = vmatpush3.bf16.msra.mxu0 %v5070_v2  ;;  %4736 = vmatprep.mubr.msk.f32.mxu0 %vm1084_vm1, %v6129_v43  ;;  %v5316_v14 = vunpack.i.h.bf16 %v5314_v16  ;;  %v5315_v1 = vunpack.i.l.bf16 %v5314_v16  ;;  %v5459_v21 = vpop.eup %5458 }
 0x7a8   : > { %v2423_v6 = vmul.f32 %v5459_v21, %v6309_v37 }
 0x7a9   : > { %v5074_v55 = vpack.c.bf16 %v5316_v14, %v5315_v1  ;;  %v5461_v57 = vpop.eup %5460 }
 0x7aa   : > { %4737 = vmatmul.mubr.msk.f32.gmra.mrb[28].mxu0 %vm1084_vm1, %v6127_v42  ;;  %v2409_v0 = vpop.xlane.xlu1 %2408  ;;  %v2424_v23 = vmul.f32 %v5461_v57, %v6318_v35 }
 0x7ab   : > { %4739 = vmatprep.mubr.msk.f32.mxu0 %vm1084_vm1, %v6133_v48  ;;  %v4830_v46 = vpop.f32.mrb[32].mxu1  ;;  %5075 = vmatprep.subr.bf16.mxu0 %v5074_v55  ;;  %5466 = vrcp.f32 %v2409_v0 }
 0x7ac   : > { %v6367_v50 = vmul.f32 0.35355338, %v4830_v46  ;;  %v2849_v54 = vpop.f32.mrb[33].mxu1  ;;  %5077 = vmatpush3.bf16.msra.mxu0 %v5074_v55  ;;  %5468 = vrcp.f32 %v2412_v19 }
 0x7ad   : > { %v6369_v43 = vmul.f32 0.35355338, %v2849_v54  ;;  %v5463_v49 = vpop.eup %5462 }
 0x7ae   : > { %4740 = vmatmul.mubr.msk.f32.gmra.mrb[30].mxu0 %vm1084_vm1, %v6131_v24  ;;  %v2899_v42 = vsel %vm1246_vm3, %v6367_v50, -inf  ;;  %v5319_v32 = vpop.permute.xlu1 %5318  ;;  %v5465_v60 = vpop.eup %5464  ;;  %v2425_v37 = vmul.f32 %v5463_v49, %v6327_v10 }
 0x7af   : > { %2900 = vmax.xlane.f32.xlu1 %v2899_v42  ;;  %4786 = vmatprep.mubr.msk.f32.mxu0 %vm1246_vm3, %v2421_v52  ;;  %v4833_v48 = vpop.f32.mrb[34].mxu1  ;;  %v2896_v33 = vsel %vm1246_vm3, %v6369_v43, -inf  ;;  %v5321_v44 = vunpack.i.h.bf16 %v5319_v32  ;;  %v5320_v31 = vunpack.i.l.bf16 %v5319_v32  ;;  %v2426_v63 = vmul.f32 %v5465_v60, %v6325_v47  ;;  %v1082_v47 = vld [vmem:[%s6895_s6 + $0x10] sm:$0xff] }
 0x7b0   : > { %2897 = vmax.xlane.f32.xlu0 %v2896_v33  ;;  %v2859_v30 = vpop.f32.mrb[35].mxu1  ;;  %v6381_v20 = vmul.f32 0.35355338, %v4833_v48 }
 0x7b1   : > { %v6379_v27 = vmul.f32 0.35355338, %v2859_v30  ;;  %v5078_v24 = vpack.c.bf16 %v5321_v44, %v5320_v31 }
 0x7b2   : > { %v2905_v58 = vsel %vm1246_vm3, %v6381_v20, -inf }
 0x7b3   : > { %v4836_v56 = vpop.f32.mrb[36].mxu1  ;;  %v2902_v5 = vsel %vm1246_vm3, %v6379_v27, -inf  ;;  %5079 = vmatprep.subr.bf16.mxu0 %v5078_v24 }
 0x7b4   : > { %v2893_v28 = vmul.f32 0.35355338, %v4836_v56  ;;  %2903 = vmax.xlane.f32.xlu0 %v2902_v5  ;;  %v2869_v36 = vpop.f32.mrb[37].mxu1  ;;  %5081 = vmatpush3.bf16.msra.mxu0 %v5078_v24 }
 0x7b5   : > { %v6387_v22 = vmul.f32 0.35355338, %v2869_v36  ;;  %v5467_v62 = vpop.eup %5466  ;;  %4798 = vmatprep.subr.mxu0 %v1082_v47 }
 0x7b6   : > { %v2911_v40 = vsel %vm1246_vm3, %v2893_v28, -inf  ;;  %v5469_v17 = vpop.eup %5468  ;;  %v2427_v35 = vmul.f32 %v5467_v62, %v6337_v61 }
 0x7b7   : > { %2912 = vmax.xlane.f32.xlu1 %v2911_v40  ;;  %v4839_v29 = vpop.f32.mrb[38].mxu1  ;;  %4787 = vmatmul.mubr.msk.f32.vlgmr.msra.gmra.mrb[32].mxu0 %vm1246_vm3, %v2422_v12  ;;  %v2908_v8 = vsel %vm1246_vm3, %v6387_v22, -inf  ;;  %v2428_v10 = vmul.f32 %v5469_v17, %v6333_v41 }
 0x7b8   : > { %v2895_v53 = vmul.f32 0.35355338, %v4839_v29  ;;  %2906 = vmax.xlane.f32.xlu0 %v2905_v58  ;;  %v2879_v45 = vpop.f32.mrb[39].mxu1  ;;  %4789 = vmatprep.mubr.msk.f32.mxu0 %vm1246_vm3, %v2423_v6 }
 0x7b9   : > { %v2894_v59 = vmul.f32 0.35355338, %v2879_v45  ;;  %4799 = vmatpush3.msra.mxu0 %v1082_v47 }
 0x7ba   : > { %v2917_v4 = vsel %vm1246_vm3, %v2895_v53, -inf }
 0x7bb   : > { %2918 = vmax.xlane.f32.xlu1 %v2917_v4  ;;  %4790 = vmatmul.mubr.msk.f32.gmra.mrb[34].mxu0 %vm1246_vm3, %v2424_v23  ;;  %v2914_v11 = vsel %vm1246_vm3, %v2894_v59, -inf }
 0x7bc   : > { %2909 = vmax.xlane.f32.xlu0 %v2908_v8  ;;  %4792 = vmatprep.mubr.msk.f32.mxu0 %vm1246_vm3, %v2425_v37 }
 0x7bf   : > { %4793 = vmatmul.mubr.msk.f32.gmra.mrb[36].mxu0 %vm1246_vm3, %v2426_v63 }
 0x7c0   : > { %2915 = vmax.xlane.f32.xlu0 %v2914_v11  ;;  %4795 = vmatprep.mubr.msk.f32.mxu0 %vm1246_vm3, %v2427_v35 }
 0x7c3   : > { %4796 = vmatmul.mubr.msk.f32.gmra.mrb[38].mxu0 %vm1246_vm3, %v2428_v10 }
 0x7cc   : > { %5328 = vrot.lane.b32.xlu1 %v5917_v13, %s5556_s24 }
 0x7d6   : > { %5323 = vrot.lane.b32.xlu0 %v5911_v9, %s5556_s24 }
 0x83c   : > { %v2901_v61 = vpop.xlane.xlu1 %2900 }
 0x83d   : > { %v2921_v3 = vsub.f32 %v6367_v50, %v2901_v61  ;;  %v2898_v7 = vpop.xlane.xlu0 %2897 }
 0x83e   : > { %v2920_v41 = vsub.f32 %v6369_v43, %v2898_v7 }
 0x83f   : > { %v2930_v25 = vmul.f32 1.442695, %v2921_v3 }
 0x840   : > { %v2928_v51 = vmul.f32 1.442695, %v2920_v41 }
 0x841   : > { %5470 = vpow2.f32 %v2930_v25  ;;  %v2904_v2 = vpop.xlane.xlu0 %2903 }
 0x842   : > { %5472 = vpow2.f32 %v2928_v51  ;;  %v2922_v13 = vsub.f32 %v6379_v27, %v2904_v2 }
 0x844   : > { %v2932_v38 = vmul.f32 1.442695, %v2922_v13  ;;  %v2913_v15 = vpop.xlane.xlu1 %2912 }
 0x845   : > { %v2925_v19 = vsub.f32 %v2893_v28, %v2913_v15  ;;  %v2907_v16 = vpop.xlane.xlu0 %2906 }
 0x846   : > { %5474 = vpow2.f32 %v2932_v38  ;;  %v2923_v9 = vsub.f32 %v6381_v20, %v2907_v16  ;;  %v1083_v16 = vld [vmem:[%s6895_s6 + $0x18] sm:$0xff] }
 0x847   : > { %v2938_v14 = vmul.f32 1.442695, %v2925_v19 }
 0x848   : > { %v2934_v1 = vmul.f32 1.442695, %v2923_v9  ;;  %v2919_v39 = vpop.xlane.xlu1 %2918 }
 0x849   : > { %v2927_v55 = vsub.f32 %v2895_v53, %v2919_v39  ;;  %v2910_v0 = vpop.xlane.xlu0 %2909 }
 0x84a   : > { %5476 = vpow2.f32 %v2934_v1  ;;  %v2924_v46 = vsub.f32 %v6387_v22, %v2910_v0 }
 0x84b   : > { %v6420_v50 = vpop.eup %5470  ;;  %5478 = vpow2.f32 %v2938_v14  ;;  %v2942_v43 = vmul.f32 1.442695, %v2927_v55 }
 0x84c   : > { %v6422_v54 = vpop.eup %5472  ;;  %v2936_v52 = vmul.f32 1.442695, %v2924_v46  ;;  %v2947_v42 = vsel %vm1246_vm3, %v6420_v50, 0.0  ;;  %v5329_v58 = vpop.permute.xlu1 %5328 }
 0x84d   : > { %2948 = vadd.xlane.f32.xlu1 %v2947_v42  ;;  %v2916_v32 = vpop.xlane.xlu0 %2915  ;;  %v2944_v48 = vsel %vm1246_vm3, %v6422_v54, 0.0  ;;  %v5331_v6 = vunpack.i.h.bf16 %v5329_v58  ;;  %v5330_v49 = vunpack.i.l.bf16 %v5329_v58 }
 0x84e   : > { %5480 = vpow2.f32 %v2936_v52  ;;  %v2926_v33 = vsub.f32 %v2894_v59, %v2916_v32  ;;  %2945 = vadd.xlane.f32.xlu0 %v2944_v48 }
 0x84f   : > { %5482 = vpow2.f32 %v2942_v43  ;;  %v5110_v4 = vpack.c.bf16 %v5331_v6, %v5330_v49 }
 0x850   : > { %v6428_v44 = vpop.eup %5474  ;;  %v2940_v31 = vmul.f32 1.442695, %v2926_v33 }
 0x851   : > { %v5324_v30 = vpop.permute.xlu0 %5323  ;;  %v2950_v27 = vsel %vm1246_vm3, %v6428_v44, 0.0 }
 0x852   : > { %v5326_v24 = vunpack.i.h.bf16 %v5324_v30  ;;  %v5325_v34 = vunpack.i.l.bf16 %v5324_v30  ;;  %2951 = vadd.xlane.f32.xlu0 %v2950_v27  ;;  %5484 = vpow2.f32 %v2940_v31 }
 0x854   : > { %v6432_v20 = vpop.eup %5476  ;;  %v5106_v56 = vpack.c.bf16 %v5326_v24, %v5325_v34 }
 0x855   : > { %v2953_v5 = vsel %vm1246_vm3, %v6432_v20, 0.0  ;;  %v6436_v21 = vpop.eup %5478 }
 0x856   : > { %2954 = vadd.xlane.f32.xlu1 %v2953_v5  ;;  %5107 = vmatprep.subr.bf16.mxu0 %v5106_v56  ;;  %v2959_v36 = vsel %vm1246_vm3, %v6436_v21, 0.0  ;;  %v5534_v5 = vld [vmem:[%s5671_s30 + $0x8] sm:$0xff] }
 0x858   : > { %v6438_v28 = vpop.eup %5480 }
 0x859   : > { %v2956_v12 = vsel %vm1246_vm3, %v6438_v28, 0.0  ;;  %v6444_v40 = vpop.eup %5482 }
 0x85a   : > { %2960 = vadd.xlane.f32.xlu1 %v2959_v36  ;;  %2957 = vadd.xlane.f32.xlu0 %v2956_v12  ;;  %v2965_v57 = vsel %vm1246_vm3, %v6444_v40, 0.0  ;;  %v5535_v36 = vld [vmem:[%s5671_s30] sm:$0xff] }
 0x85c   : > { %v6448_v22 = vpop.eup %5484 }
 0x85d   : > { %v2962_v29 = vsel %vm1246_vm3, %v6448_v22, 0.0 }
 0x85e   : > { %2966 = vadd.xlane.f32.xlu1 %v2965_v57 }
 0x862   : > { %2963 = vadd.xlane.f32.xlu1 %v2962_v29  ;;  %v5536_v29 = vld [vmem:[%s5671_s30 + $0x18] sm:$0xff] }
 0x870   : > { %5333 = vrot.lane.b32.xlu0 %v5921_v18, %s5556_s24 }
 0x873   : > { %5338 = vrot.lane.b32.xlu1 %v5927_v26, %s5556_s24 }
 0x88a   : > { %v4788_v53 = vpop.f32.mrb[32].mxu0 }
 0x88b   : > { %v2543_v45 = vpop.f32.mrb[33].mxu0 }
 0x88c   : > { %4800 = vmatprep.mubr.msk.f32.mxu0 %vm1084_vm1, %v2543_v45 }
 0x88d   : > { %4801 = vmatmul.mubr.msk.f32.vlgmr.msra.gmra.mrb[24].mxu0 %vm1084_vm1, %v4788_v53  ;;  %v5537_v53 = vld [vmem:[%s5671_s30 + $0x10] sm:$0xff] }
 0x88e   : > { %5109 = vmatpush3.bf16.msra.mxu0 %v5106_v56  ;;  %v4791_v23 = vpop.f32.mrb[34].mxu0  ;;  %v4318_v56 = vld [vmem:[%s6896_s7] ss:$0 sm:$0xff] }
 0x88f   : > { %5111 = vmatprep.subr.bf16.mxu0 %v5110_v4  ;;  %v2553_v60 = vpop.f32.mrb[35].mxu0 }
 0x890   : > { %4803 = vmatprep.mubr.msk.f32.mxu0 %vm1084_vm1, %v2553_v60 }
 0x891   : > { %4804 = vmatmul.mubr.msk.f32.gmra.mrb[26].mxu0 %vm1084_vm1, %v4791_v23 }
 0x892   : > { %5113 = vmatpush3.bf16.msra.mxu0 %v5110_v4  ;;  %v4794_v18 = vpop.f32.mrb[36].mxu0 }
 0x893   : > { %v2563_v26 = vpop.f32.mrb[37].mxu0 }
 0x894   : > { %4806 = vmatprep.mubr.msk.f32.mxu0 %vm1084_vm1, %v2563_v26 }
 0x895   : > { %4807 = vmatmul.mubr.msk.f32.gmra.mrb[28].mxu0 %vm1084_vm1, %v4794_v18  ;;  %v5538_v18 = vld [vmem:[%s5671_s30 + $0x28] sm:$0xff] }
 0x896   : > { %v4797_v59 = vpop.f32.mrb[38].mxu0 }
 0x897   : > { %v2573_v8 = vpop.f32.mrb[39].mxu0 }
 0x898   : > { %4809 = vmatprep.mubr.msk.f32.mxu0 %vm1084_vm1, %v2573_v8 }
 0x899   : > { %4810 = vmatmul.mubr.msk.f32.gmra.mrb[30].mxu0 %vm1084_vm1, %v4797_v59 }
 0x8da   : > { %v2949_v62 = vpop.xlane.xlu1 %2948 }
 0x8db   : > { %v2946_v37 = vpop.xlane.xlu0 %2945 }
 0x8dc   : > { %5486 = vrcp.f32 %v2946_v37 }
 0x8dd   : > { %5488 = vrcp.f32 %v2949_v62  ;;  %v5539_v62 = vld [vmem:[%s5671_s30 + $0x20] sm:$0xff] }
 0x8df   : > { %v2952_v63 = vpop.xlane.xlu0 %2951 }
 0x8e0   : > { %5490 = vrcp.f32 %v2952_v63 }
 0x8e3   : > { %v2955_v17 = vpop.xlane.xlu1 %2954 }
 0x8e4   : > { %5492 = vrcp.f32 %v2955_v17 }
 0x8e6   : > { %v5487_v11 = vpop.eup %5486 }
 0x8e7   : > { %v2961_v35 = vpop.xlane.xlu1 %2960  ;;  %v2958_v10 = vpop.xlane.xlu0 %2957  ;;  %v2976_v47 = vmul.f32 %v5487_v11, %v6422_v54 }
 0x8e8   : > { %5494 = vrcp.f32 %v2958_v10  ;;  %v5489_v19 = vpop.eup %5488 }
 0x8e9   : > { %4856 = vmatprep.mubr.msk.f32.mxu0 %vm1246_vm3, %v2976_v47  ;;  %5496 = vrcp.f32 %v2961_v35  ;;  %v2977_v14 = vmul.f32 %v5489_v19, %v6420_v50  ;;  %v5540_v35 = vld [vmem:[%s5671_s30 + $0x38] sm:$0xff] }
 0x8ea   : > { %v5491_v9 = vpop.eup %5490 }
 0x8eb   : > { %v2967_v61 = vpop.xlane.xlu1 %2966  ;;  %v5334_v3 = vpop.permute.xlu0 %5333  ;;  %v2978_v39 = vmul.f32 %v5491_v9, %v6428_v44 }
 0x8ec   : > { %v5336_v7 = vunpack.i.h.bf16 %v5334_v3  ;;  %v5335_v41 = vunpack.i.l.bf16 %v5334_v3 }
 0x8ee   : > { %v5114_v25 = vpack.c.bf16 %v5336_v7, %v5335_v41  ;;  %v5493_v1 = vpop.eup %5492  ;;  %v5541_v7 = vld [vmem:[%s5671_s30 + $0x30] sm:$0xff] }
 0x8ef   : > { %v2964_v51 = vpop.xlane.xlu1 %2963  ;;  %v2979_v0 = vmul.f32 %v5493_v1, %v6432_v20 }
 0x8f0   : > { %5115 = vmatprep.subr.bf16.mxu0 %v5114_v25  ;;  %5498 = vrcp.f32 %v2964_v51 }
 0x8f1   : > { %5117 = vmatpush3.bf16.msra.mxu0 %v5114_v25  ;;  %5500 = vrcp.f32 %v2967_v61 }
 0x8f2   : > { %v5495_v55 = vpop.eup %5494 }
 0x8f3   : > { %v5339_v2 = vpop.permute.xlu1 %5338  ;;  %v5497_v46 = vpop.eup %5496  ;;  %v2980_v54 = vmul.f32 %v5495_v55, %v6438_v28 }
 0x8f4   : > { %v5341_v13 = vunpack.i.h.bf16 %v5339_v2  ;;  %v5340_v38 = vunpack.i.l.bf16 %v5339_v2  ;;  %v2981_v50 = vmul.f32 %v5497_v46, %v6436_v21 }
 0x8f6   : > { %v5118_v15 = vpack.c.bf16 %v5341_v13, %v5340_v38 }
 0x8f8   : > { %5119 = vmatprep.subr.bf16.mxu0 %v5118_v15 }
 0x8f9   : > { %5121 = vmatpush3.bf16.msra.mxu0 %v5118_v15 }
 0x8fa   : > { %4868 = vmatprep.subr.mxu0 %v1083_v16  ;;  %v5499_v43 = vpop.eup %5498 }
 0x8fb   : > { %v5501_v52 = vpop.eup %5500  ;;  %v2982_v42 = vmul.f32 %v5499_v43, %v6448_v22 }
 0x8fc   : > { %4857 = vmatmul.mubr.msk.f32.vlgmr.msra.gmra.mrb[40].mxu0 %vm1246_vm3, %v2977_v14  ;;  %v2983_v32 = vmul.f32 %v5501_v52, %v6444_v40 }
 0x8fd   : > { %4859 = vmatprep.mubr.msk.f32.mxu0 %vm1246_vm3, %v2978_v39  ;;  %4869 = vmatpush3.msra.mxu0 %v1083_v16 }
 0x900   : > { %4860 = vmatmul.mubr.msk.f32.gmra.mrb[42].mxu0 %vm1246_vm3, %v2979_v0 }
 0x901   : > { %4862 = vmatprep.mubr.msk.f32.mxu0 %vm1246_vm3, %v2980_v54 }
 0x904   : > { %4863 = vmatmul.mubr.msk.f32.gmra.mrb[44].mxu0 %vm1246_vm3, %v2981_v50 }
 0x905   : > { %4865 = vmatprep.mubr.msk.f32.mxu0 %vm1246_vm3, %v2982_v42 }
 0x908   : > { %4866 = vmatmul.mubr.msk.f32.gmra.mrb[46].mxu0 %vm1246_vm3, %v2983_v32 }
 0x9cf   : > { %v4858_v48 = vpop.f32.mrb[40].mxu0 }
 0x9d0   : > { %v3098_v33 = vpop.f32.mrb[41].mxu0 }
 0x9d1   : > { %4870 = vmatprep.mubr.msk.f32.mxu0 %vm1084_vm1, %v3098_v33 }
 0x9d2   : > { %4871 = vmatmul.mubr.msk.f32.vlgmr.msra.gmra.mrb[24].mxu0 %vm1084_vm1, %v4858_v48 }
 0x9d3   : > { %v4861_v44 = vpop.f32.mrb[42].mxu0 }
 0x9d4   : > { %v3108_v31 = vpop.f32.mrb[43].mxu0 }
 0x9d5   : > { %4873 = vmatprep.mubr.msk.f32.mxu0 %vm1084_vm1, %v3108_v31 }
 0x9d6   : > { %4874 = vmatmul.mubr.msk.f32.gmra.mrb[26].mxu0 %vm1084_vm1, %v4861_v44 }
 0x9d7   : > { %v4864_v30 = vpop.f32.mrb[44].mxu0 }
 0x9d8   : > { %v3118_v27 = vpop.f32.mrb[45].mxu0 }
 0x9d9   : > { %4876 = vmatprep.mubr.msk.f32.mxu0 %vm1084_vm1, %v3118_v27 }
 0x9da   : > { %4877 = vmatmul.mubr.msk.f32.gmra.mrb[28].mxu0 %vm1084_vm1, %v4864_v30 }
 0x9db   : > { %v4867_v24 = vpop.f32.mrb[46].mxu0 }
 0x9dc   : > { %v3128_v34 = vpop.f32.mrb[47].mxu0 }
 0x9dd   : > { %4879 = vmatprep.mubr.msk.f32.mxu0 %vm1084_vm1, %v3128_v34 }
 0x9de   : > { %4880 = vmatmul.mubr.msk.f32.gmra.mrb[30].mxu0 %vm1084_vm1, %v4867_v24 }
 0xaa5   : > { %v4872_v20 = vpop.f32.mrb[24].mxu0 }
 0xaa6   : > { %v3275_v21 = vadd.f32 %v5534_v5, %v4872_v20  ;;  %v3227_v28 = vpop.f32.mrb[25].mxu0 }
 0xaa7   : > { %v3274_v12 = vadd.f32 %v5535_v36, %v3227_v28 }
 0xaa8   : > { %v6496_v40 = vadd.f32 %v4318_v56, %v3275_v21 }
 0xaa9   : > { %v6498_v57 = vadd.f32 %v4318_v56, %v3274_v12  ;;  %v4875_v22 = vpop.f32.mrb[26].mxu0 }
 0xaaa   : > { %v3277_v58 = vadd.f32 %v5536_v29, %v4875_v22  ;;  %v3237_v6 = vpop.f32.mrb[27].mxu0  ;;  %v3302_v49 = vsel %vm560_vm0, %v6496_v40, 0.0 }
 0xaab   : > { %v3276_v45 = vadd.f32 %v5537_v53, %v3237_v6  ;;  %3303 = vadd.xlane.f32.xlu1 %v3302_v49  ;;  %v3299_v4 = vsel %vm560_vm0, %v6498_v57, 0.0 }
 0xaac   : > { %v6506_v23 = vadd.f32 %v4318_v56, %v3277_v58  ;;  %3300 = vadd.xlane.f32.xlu0 %v3299_v4 }
 0xaad   : > { %v4878_v60 = vpop.f32.mrb[28].mxu0  ;;  %v6511_v37 = vadd.f32 %v4318_v56, %v3276_v45 }
 0xaae   : > { %v3279_v26 = vadd.f32 %v5538_v18, %v4878_v60  ;;  %v3247_v59 = vpop.f32.mrb[29].mxu0  ;;  %v3308_v8 = vsel %vm560_vm0, %v6506_v23, 0.0 }
 0xaaf   : > { %v3278_v63 = vadd.f32 %v5539_v62, %v3247_v59  ;;  %v3305_v25 = vsel %vm560_vm0, %v6511_v37, 0.0  ;;  %v3432_v59 = vld [vmem:[%s6899_s10 + $0x8] sm:$0xff]  ;;  %v3433_v62 = vld [vmem:[%s6899_s10 + $0x10] sm:$0xff] }
 0xab0   : > { %v6514_v17 = vadd.f32 %v4318_v56, %v3279_v26  ;;  %3309 = vadd.xlane.f32.xlu0 %v3308_v8  ;;  %v3431_v26 = vld [vmem:[%s6899_s10] sm:$0xff] }
 0xab1   : > { %v4881_v11 = vpop.f32.mrb[30].mxu0  ;;  %v6519_v3 = vadd.f32 %v4318_v56, %v3278_v63  ;;  %v5122_v8 = vpack.c.bf16 %v3432_v59, %v3431_v26  ;;  %v3434_v63 = vld [vmem:[%s6899_s10 + $0x18] sm:$0xff] }
 0xab2   : > { %v3281_v10 = vadd.f32 %v5540_v35, %v4881_v11  ;;  %v3257_v47 = vpop.f32.mrb[31].mxu0  ;;  %v3314_v61 = vsel %vm560_vm0, %v6514_v17, 0.0  ;;  %v5126_v11 = vpack.c.bf16 %v3434_v63, %v3433_v62 }
 0xab3   : > { %v3280_v41 = vadd.f32 %v5541_v7, %v3257_v47  ;;  %3315 = vadd.xlane.f32.xlu1 %v3314_v61  ;;  %v3311_v38 = vsel %vm560_vm0, %v6519_v3, 0.0  ;;  %5123 = vmatprep.subr.bf16.mxu1 %v5122_v8 }
 0xab4   : > { %v6524_v51 = vadd.f32 %v4318_v56, %v3281_v10  ;;  %3306 = vadd.xlane.f32.xlu0 %v3305_v25  ;;  %5125 = vmatpush3.bf16.msra.mxu1 %v5122_v8 }
 0xab5   : > { %v6528_v13 = vadd.f32 %v4318_v56, %v3280_v41  ;;  %5127 = vmatprep.subr.bf16.mxu1 %v5126_v11 }
 0xab6   : > { %v3320_v2 = vsel %vm560_vm0, %v6524_v51, 0.0 }
 0xab7   : > { %3321 = vadd.xlane.f32.xlu1 %v3320_v2  ;;  %v3317_v15 = vsel %vm560_vm0, %v6528_v13, 0.0 }
 0xab8   : > { %3312 = vadd.xlane.f32.xlu0 %v3311_v38  ;;  %5129 = vmatpush3.bf16.msra.mxu1 %v5126_v11 }
 0xabc   : > { %3318 = vadd.xlane.f32.xlu0 %v3317_v15 }
 0xb38   : > { %v3304_v19 = vpop.xlane.xlu1 %3303 }
 0xb39   : > { %v3324_v16 = vmul.f32 0.03125, %v3304_v19  ;;  %v3301_v9 = vpop.xlane.xlu0 %3300 }
 0xb3a   : > { %v3323_v14 = vmul.f32 0.03125, %v3301_v9 }
 0xb3b   : > { %v6535_v1 = vsub.f32 %v6496_v40, %v3324_v16 }
 0xb3c   : > { %v6538_v39 = vsub.f32 %v6498_v57, %v3323_v14 }
 0xb3d   : > { %v3310_v55 = vpop.xlane.xlu0 %3309  ;;  %v3340_v0 = vmul.f32 %v6535_v1, %v6535_v1 }
 0xb3e   : > { %v3326_v46 = vmul.f32 0.03125, %v3310_v55  ;;  %v3339_v54 = vmul.f32 %v6538_v39, %v6538_v39 }
 0xb3f   : > { %v3350_v43 = vsel %vm560_vm0, %v3340_v0, 0.0 }
 0xb40   : > { %v6546_v50 = vsub.f32 %v6506_v23, %v3326_v46  ;;  %v3316_v52 = vpop.xlane.xlu1 %3315  ;;  %3351 = vadd.xlane.f32.xlu1 %v3350_v43  ;;  %v3347_v42 = vsel %vm560_vm0, %v3339_v54, 0.0 }
 0xb41   : > { %v3328_v32 = vmul.f32 0.03125, %v3316_v52  ;;  %v3307_v48 = vpop.xlane.xlu0 %3306  ;;  %3348 = vadd.xlane.f32.xlu0 %v3347_v42  ;;  %v4319_v42 = vld [vmem:[%s6897_s8] ss:$0 sm:$0xff] }
 0xb42   : > { %v3325_v33 = vmul.f32 0.03125, %v3307_v48  ;;  %v3342_v44 = vmul.f32 %v6546_v50, %v6546_v50 }
 0xb43   : > { %v6552_v31 = vsub.f32 %v6514_v17, %v3328_v32 }
 0xb44   : > { %v6555_v30 = vsub.f32 %v6511_v37, %v3325_v33  ;;  %v3322_v27 = vpop.xlane.xlu1 %3321  ;;  %v3356_v24 = vsel %vm560_vm0, %v3342_v44, 0.0 }
 0xb45   : > { %v3330_v34 = vmul.f32 0.03125, %v3322_v27  ;;  %v3313_v20 = vpop.xlane.xlu0 %3312  ;;  %3357 = vadd.xlane.f32.xlu1 %v3356_v24  ;;  %v3344_v56 = vmul.f32 %v6552_v31, %v6552_v31 }
 0xb46   : > { %v3327_v5 = vmul.f32 0.03125, %v3313_v20  ;;  %v3341_v21 = vmul.f32 %v6555_v30, %v6555_v30 }
 0xb47   : > { %v6563_v28 = vsub.f32 %v6524_v51, %v3330_v34  ;;  %v3362_v36 = vsel %vm560_vm0, %v3344_v56, 0.0  ;;  %v4320_v34 = vld [vmem:[%s6898_s9] ss:$0 sm:$0xff] }
 0xb48   : > { %v6567_v12 = vsub.f32 %v6519_v3, %v3327_v5  ;;  %v3353_v22 = vsel %vm560_vm0, %v3341_v21, 0.0 }
 0xb49   : > { %3363 = vadd.xlane.f32.xlu1 %v3362_v36  ;;  %3354 = vadd.xlane.f32.xlu0 %v3353_v22  ;;  %v3319_v29 = vpop.xlane.xlu0 %3318  ;;  %v3346_v58 = vmul.f32 %v6563_v28, %v6563_v28 }
 0xb4a   : > { %v3329_v6 = vmul.f32 0.03125, %v3319_v29  ;;  %v3343_v49 = vmul.f32 %v6567_v12, %v6567_v12 }
 0xb4b   : > { %v3368_v53 = vsel %vm560_vm0, %v3346_v58, 0.0 }
 0xb4c   : > { %v6576_v45 = vsub.f32 %v6528_v13, %v3329_v6  ;;  %v3359_v4 = vsel %vm560_vm0, %v3343_v49, 0.0 }
 0xb4d   : > { %3369 = vadd.xlane.f32.xlu1 %v3368_v53  ;;  %3360 = vadd.xlane.f32.xlu0 %v3359_v4 }
 0xb4e   : > { %v3345_v60 = vmul.f32 %v6576_v45, %v6576_v45 }
 0xb50   : > { %v3365_v18 = vsel %vm560_vm0, %v3345_v60, 0.0 }
 0xb51   : > { %3366 = vadd.xlane.f32.xlu0 %v3365_v18 }
 0xbcd   : > { %v3352_v35 = vpop.xlane.xlu1 %3351 }
 0xbce   : > { %v3372_v10 = vmul.f32 0.03125, %v3352_v35  ;;  %v3349_v47 = vpop.xlane.xlu0 %3348 }
 0xbcf   : > { %v3371_v61 = vmul.f32 0.03125, %v3349_v47 }
 0xbd0   : > { %v3380_v7 = vadd.f32 1e-05, %v3372_v10 }
 0xbd1   : > { %v3379_v41 = vadd.f32 1e-05, %v3371_v61  ;;  %v5557_v61 = vmov 0.0  }
 0xbd2   : > { %5502 = vrsqrt.f32 %v3380_v7  ;;  %v3358_v25 = vpop.xlane.xlu1 %3357  ;;  %3583 = vst [vmem:[#allocation2 + $0x20] sm:$0xff] %v5557_v61  ;;  %3584 = vst [vmem:[#allocation2 + $0x28] sm:$0x3] %v5557_v61  ;;  %v3951_v7 = vld [vmem:[%s6903_s14 + $0x8] sm:$0xff] }
 0xbd3   : > { %5504 = vrsqrt.f32 %v3379_v41  ;;  %v3374_v2 = vmul.f32 0.03125, %v3358_v25  ;;  %3579 = vst [vmem:[#allocation2] sm:$0xff] %v5557_v61  ;;  %3580 = vst [vmem:[#allocation2 + $0x8] sm:$0x3] %v5557_v61  ;;  %v3952_v41 = vld [vmem:[%s6903_s14 + $0x10] sm:$0xff] }
 0xbd4   : > { %3581 = vst [vmem:[#allocation2 + $0x10] sm:$0xff] %v5557_v61  ;;  %3582 = vst [vmem:[#allocation2 + $0x18] sm:$0x3] %v5557_v61 }
 0xbd5   : > { %v3382_v38 = vadd.f32 1e-05, %v3374_v2  ;;  %3585 = vst [vmem:[#allocation2 + $0x30] sm:$0xff] %v5557_v61  ;;  %3586 = vst [vmem:[#allocation2 + $0x38] sm:$0x3] %v5557_v61  ;;  %v3953_v2 = vld [vmem:[%s6903_s14 + $0x18] sm:$0xff] }
 0xbd6   : > { %v3364_v15 = vpop.xlane.xlu1 %3363  ;;  %v3355_v19 = vpop.xlane.xlu0 %3354  ;;  %3587 = vst [vmem:[#allocation2 + $0x40] sm:$0xff] %v5557_v61  ;;  %3588 = vst [vmem:[#allocation2 + $0x48] sm:$0x3] %v5557_v61 }
 0xbd7   : > { %5506 = vrsqrt.f32 %v3382_v38  ;;  %v3376_v16 = vmul.f32 0.03125, %v3364_v15  ;;  %v3373_v9 = vmul.f32 0.03125, %v3355_v19  ;;  %3589 = vst [vmem:[#allocation2 + $0x50] sm:$0xff] %v5557_v61  ;;  %3590 = vst [vmem:[#allocation2 + $0x58] sm:$0x3] %v5557_v61  ;;  %v5134_v38 = vpack.c.bf16 %v3953_v2, %v3952_v41  ;;  %v3954_v15 = vld [vmem:[%s6903_s14 + $0x20] sm:$0xff] }
 0xbd8   : > { %3591 = vst [vmem:[#allocation2 + $0x60] sm:$0xff] %v5557_v61  ;;  %3592 = vst [vmem:[#allocation2 + $0x68] sm:$0x3] %v5557_v61  ;;  %v3955_v19 = vld [vmem:[%s6903_s14 + $0x28] sm:$0xff] }
 0xbd9   : > { %v3384_v14 = vadd.f32 1e-05, %v3376_v16  ;;  %v3381_v55 = vadd.f32 1e-05, %v3373_v9  ;;  %3593 = vst [vmem:[#allocation2 + $0x70] sm:$0xff] %v5557_v61  ;;  %3595 = vst [vmem:[#allocation2 + $0x80] sm:$0xff] %v5557_v61  ;;  %v5138_v16 = vpack.c.bf16 %v3955_v19, %v3954_v15 }
 0xbda   : > { %v3370_v0 = vpop.xlane.xlu1 %3369  ;;  %v3361_v46 = vpop.xlane.xlu0 %3360  ;;  %3594 = vst [vmem:[#allocation2 + $0x78] sm:$0x3] %v5557_v61  ;;  %3596 = vst [vmem:[#allocation2 + $0x88] sm:$0x3] %v5557_v61  ;;  %v3956_v9 = vld [vmem:[%s6903_s14 + $0x30] sm:$0xff] }
 0xbdb   : > { %5508 = vrsqrt.f32 %v3384_v14  ;;  %v3378_v54 = vmul.f32 0.03125, %v3370_v0  ;;  %v3375_v43 = vmul.f32 0.03125, %v3361_v46  ;;  %3597 = vst [vmem:[#allocation2 + $0x90] sm:$0xff] %v5557_v61  ;;  %3598 = vst [vmem:[#allocation2 + $0x98] sm:$0x3] %v5557_v61  ;;  %v3957_v14 = vld [vmem:[%s6903_s14 + $0x38] sm:$0xff] }
 0xbdc   : > { %v5503_v52 = vpop.eup %5502  ;;  %5510 = vrsqrt.f32 %v3381_v55  ;;  %v5142_v55 = vpack.c.bf16 %v3957_v14, %v3956_v9  ;;  %v3958_v0 = vld [vmem:[%s6903_s14 + $0x40] sm:$0xff]  ;;  %v3959_v46 = vld [vmem:[%s6903_s14 + $0x48] sm:$0xff] }
 0xbdd   : > { %v5505_v32 = vpop.eup %5504  ;;  %v3396_v48 = vmul.f32 %v5503_v52, %v6535_v1  ;;  %v3386_v33 = vadd.f32 1e-05, %v3378_v54  ;;  %v3383_v44 = vadd.f32 1e-05, %v3375_v43  ;;  %v5146_v54 = vpack.c.bf16 %v3959_v46, %v3958_v0  ;;  %v3960_v43 = vld [vmem:[%s6903_s14 + $0x50] sm:$0xff]  ;;  %v3961_v52 = vld [vmem:[%s6903_s14 + $0x58] sm:$0xff] }
 0xbde   : > { %v3367_v27 = vpop.xlane.xlu0 %3366  ;;  %v3395_v24 = vmul.f32 %v5505_v32, %v6538_v39  ;;  %v3962_v32 = vld [vmem:[%s6903_s14 + $0x60] sm:$0xff] }
 0xbdf   : > { %v3410_v20 = vmul.f32 %v4319_v42, %v3396_v48  ;;  %5512 = vrsqrt.f32 %v3386_v33  ;;  %v3377_v56 = vmul.f32 0.03125, %v3367_v27  ;;  %v3963_v48 = vld [vmem:[%s6903_s14 + $0x68] sm:$0xff]  ;;  %v3965_v27 = vld [vmem:[%s6903_s14 + $0x78] sm:$0xff] }
 0xbe0   : > { %5514 = vrsqrt.f32 %v3383_v44  ;;  %v3409_v5 = vmul.f32 %v4319_v42, %v3395_v24  ;;  %v5154_v33 = vpack.c.bf16 %v3963_v48, %v3962_v32  ;;  %v3964_v44 = vld [vmem:[%s6903_s14 + $0x70] sm:$0xff] }
 0xbe1   : > { %v5507_v21 = vpop.eup %5506  ;;  %v3385_v36 = vadd.f32 1e-05, %v3377_v56  ;;  %v3424_v29 = vadd.f32 %v4320_v34, %v3410_v20  ;;  %v5158_v24 = vpack.c.bf16 %v3965_v27, %v3964_v44 }
 0xbe2   : > { %v3423_v22 = vadd.f32 %v4320_v34, %v3409_v5  ;;  %v3398_v1 = vmul.f32 %v5507_v21, %v6546_v50  ;;  %v6667_v21 = vld [vmem:[%s6900_s11] ss:$0 sm:$0xff] }
 0xbe3   : > { %5516 = vrsqrt.f32 %v3385_v36  ;;  %v3608_v36 = vld [vmem:[%s6901_s12] sm:$0xff] }
 0xbe4   : > { %4890 = vmatprep.mubr.msk.f32.mxu1 %vm560_vm0, %v3423_v22  ;;  %v3412_v49 = vmul.f32 %v4319_v42, %v3398_v1 }
 0xbe5   : > { %v5509_v58 = vpop.eup %5508  ;;  %4891 = vmatmul.mubr.msk.f32.vlgmr.msra.gmra.mrb[40].mxu1 %vm560_vm0, %v3424_v29 }
 0xbe6   : > { %v5511_v39 = vpop.eup %5510  ;;  %v3400_v53 = vmul.f32 %v5509_v58, %v6552_v31  ;;  %v3426_v8 = vadd.f32 %v4320_v34, %v3412_v49  ;;  %v3638_v58 = vld [vmem:[#allocation2 + $0x1] sm:$0xff] }
 0xbe7   : > { %v3397_v6 = vmul.f32 %v5511_v39, %v6555_v30 }
 0xbe8   : > { %v3414_v62 = vmul.f32 %v4319_v42, %v3400_v53 }
 0xbe9   : > { %v5513_v4 = vpop.eup %5512  ;;  %v3411_v60 = vmul.f32 %v4319_v42, %v3397_v6 }
 0xbea   : > { %v5515_v18 = vpop.eup %5514  ;;  %v3402_v63 = vmul.f32 %v5513_v4, %v6563_v28  ;;  %v3428_v31 = vadd.f32 %v4320_v34, %v3414_v62 }
 0xbeb   : > { %v3425_v26 = vadd.f32 %v4320_v34, %v3411_v60  ;;  %v3399_v59 = vmul.f32 %v5515_v18, %v6567_v12 }
 0xbec   : > { %v3416_v47 = vmul.f32 %v4319_v42, %v3402_v63 }
 0xbed   : > { %v5517_v50 = vpop.eup %5516  ;;  %4893 = vmatprep.mubr.msk.f32.mxu1 %vm560_vm0, %v3425_v26  ;;  %v3413_v11 = vmul.f32 %v4319_v42, %v3399_v59 }
 0xbee   : > { %4894 = vmatmul.mubr.msk.f32.gmra.mrb[42].mxu1 %vm560_vm0, %v3426_v8  ;;  %v3401_v30 = vmul.f32 %v5517_v50, %v6576_v45  ;;  %v3430_v28 = vadd.f32 %v4320_v34, %v3416_v47  ;;  %v3950_v45 = vld [vmem:[%s6903_s14] sm:$0xff] }
 0xbef   : > { %v3427_v35 = vadd.f32 %v4320_v34, %v3413_v11  ;;  %v5130_v25 = vpack.c.bf16 %v3951_v7, %v3950_v45  ;;  %v3666_v8 = vld [vmem:[#allocation2 + $0x2] sm:$0xff] }
 0xbf0   : > { %v3415_v10 = vmul.f32 %v4319_v42, %v3401_v30  ;;  %v5150_v42 = vpack.c.bf16 %v3961_v52, %v3960_v43 }
 0xbf1   : > { %4896 = vmatprep.mubr.msk.f32.mxu1 %vm560_vm0, %v3427_v35  ;;  %5131 = vmatprep.subr.bf16.mxu1 %v5130_v25 }
 0xbf2   : > { %4897 = vmatmul.mubr.msk.f32.gmra.mrb[44].mxu1 %vm560_vm0, %v3428_v31  ;;  %v3429_v12 = vadd.f32 %v4320_v34, %v3415_v10  ;;  %v3618_v34 = vlaneseq }
 0xbf3   : > { %5133 = vmatpush3.bf16.msra.mxu1 %v5130_v25  ;;  %v6696_v25 = vld [vmem:[%s6901_s12 + $0x8] ss:$0 sm:$0xff] }
 0xbf4   : > { %4899 = vmatprep.mubr.msk.f32.mxu1 %vm560_vm0, %v3429_v12  ;;  %5135 = vmatprep.subr.bf16.mxu1 %v5134_v38  ;;  %v3619_v20 = vshrl.u32 %v3618_v34, 7 }
 0xbf6   : > { %4900 = vmatmul.mubr.msk.f32.gmra.mrb[46].mxu1 %vm560_vm0, %v3430_v28  ;;  %v3620_v56 = vsub.s32 0, %v3619_v20  ;;  %v3648_v5 = vsub.s32 1, %v3619_v20  ;;  %v3676_v29 = vsub.s32 2, %v3619_v20  ;;  %v3732_v62 = vsub.s32 4, %v3619_v20 }
 0xbf7   : > { %5137 = vmatpush3.bf16.msra.mxu1 %v5134_v38  ;;  %v3817_v63 = vsub.s32 7, %v3619_v20  ;;  %v3789_v50 = vsub.s32 6, %v3619_v20  ;;  %v3704_v11 = vsub.s32 3, %v3619_v20  ;;  %v3760_v31 = vsub.s32 5, %v3619_v20 }
 0xbf8   : > { %5139 = vmatprep.subr.bf16.mxu1 %v5138_v16  ;;  %v6672_v22 = vrot.slane %v3608_v36, %v3620_v56  ;;  %v6675_v49 = vrot.slane %v3608_v36, %v3648_v5  ;;  %v6680_v26 = vrot.slane %v3608_v36, %v3676_v29  ;;  %v6683_v10 = vrot.slane %v3608_v36, %v3732_v62 }
 0xbf9   : > { %v6685_v47 = vrot.slane %v3608_v36, %v3817_v63  ;;  %v6687_v28 = vrot.slane %v3608_v36, %v3789_v50  ;;  %v6690_v7 = vrot.slane %v3608_v36, %v3704_v11  ;;  %v6698_v38 = vrot.slane %v3608_v36, %v3760_v31 }
 0xbfa   : > { %v3622_v60 = vmul.f32 0.0, %v6672_v22  ;;  %v3650_v18 = vmul.f32 %v6675_v49, %v3638_v58  ;;  %v3678_v35 = vmul.f32 %v6680_v26, %v3666_v8 }
 0xbfb   : > { %5141 = vmatpush3.bf16.msra.mxu1 %v5138_v16 }
 0xbfc   : > { %5143 = vmatprep.subr.bf16.mxu1 %v5142_v55  ;;  %v3658_v30 = vadd.f32 %v3650_v18, %v3622_v60 }
 0xbfe   : > { %v3686_v2 = vadd.f32 %v3678_v35, %v3658_v30 }
 0xbff   : > { %5145 = vmatpush3.bf16.msra.mxu1 %v5142_v55 }
 0xc00   : > { %5147 = vmatprep.subr.bf16.mxu1 %v5146_v54 }
 0xc03   : > { %5149 = vmatpush3.bf16.msra.mxu1 %v5146_v54 }
 0xc04   : > { %5151 = vmatprep.subr.bf16.mxu1 %v5150_v42 }
 0xc07   : > { %5153 = vmatpush3.bf16.msra.mxu1 %v5150_v42 }
 0xc08   : > { %5155 = vmatprep.subr.bf16.mxu1 %v5154_v33 }
 0xc0b   : > { %5157 = vmatpush3.bf16.msra.mxu1 %v5154_v33 }
 0xc0c   : > { %5159 = vmatprep.subr.bf16.mxu1 %v5158_v24 }
 0xc0f   : > { %5161 = vmatpush3.bf16.msra.mxu1 %v5158_v24 }
 0xcb8   : > { %v4892_v1 = vpop.f32.mrb[40].mxu1 }
 0xcb9   : > { %v3538_v39 = vadd.f32 %v4892_v1, %v6667_v21  ;;  %v3532_v6 = vpop.f32.mrb[41].mxu1 }
 0xcba   : > { %v3533_v53 = vadd.f32 %v6667_v21, %v3532_v6 }
 0xcbb   : > { %v3572_v4 = vmax.f32 %v3538_v39, 0.0 }
 0xcbc   : > { %v3571_v59 = vmax.f32 %v3533_v53, 0.0 }
 0xcbd   : > { %3601 = vst [vmem:[#allocation2 + $0x21] sm:$0xff] %v3572_v4  ;;  %v6701_v16 = vmul.f32 %v6685_v47, %v3572_v4  ;;  %v3735_v14 = vmul.f32 %v6683_v10, %v3572_v4  ;;  %v3652_v55 = vmul.f32 %v6675_v49, %v3572_v4 }
 0xcbe   : > { %3600 = vst [vmem:[#allocation2 + $0x11] sm:$0xff] %v3571_v59  ;;  %v3734_v43 = vmul.f32 %v6683_v10, %v3571_v59  ;;  %v3651_v32 = vmul.f32 %v6675_v49, %v3571_v59 }
 0xcc1   : > { %v4895_v12 = vpop.f32.mrb[42].mxu1 }
 0xcc2   : > { %v3548_v61 = vadd.f32 %v4895_v12, %v6667_v21  ;;  %v3542_v45 = vpop.f32.mrb[43].mxu1 }
 0xcc3   : > { %v3543_v41 = vadd.f32 %v6667_v21, %v3542_v45 }
 0xcc4   : > { %v3574_v15 = vmax.f32 %v3548_v61, 0.0  ;;  %v3779_v19 = vld [vmem:[#allocation2 + $0x20] sm:$0xff] }
 0xcc5   : > { %v3835_v9 = vld [vmem:[#allocation2 + $0x22] sm:$0xff]  ;;  %v3611_v0 = vld [vmem:[#allocation2 + $0x10] sm:$0xff]  ;;  %v3573_v46 = vmax.f32 %v3543_v41, 0.0  ;;  %v4898_v54 = vpop.f32.mrb[44].mxu1  ;;  %v3791_v42 = vmul.f32 %v6687_v28, %v3779_v19  ;;  %v3707_v5 = vmul.f32 %v3779_v19, %v6690_v7  ;;  %v3624_v58 = vmul.f32 %v3779_v19, %v6672_v22 }
 0xcc6   : > { %v3750_v52 = vld [vmem:[#allocation2 + $0x12] sm:$0xff]  ;;  %3603 = vst [vmem:[#allocation2 + $0x41] sm:$0xff] %v3574_v15  ;;  %v3558_v48 = vadd.f32 %v4898_v54, %v6667_v21  ;;  %v3552_v33 = vpop.f32.mrb[45].mxu1  ;;  %v3706_v44 = vmul.f32 %v6690_v7, %v3611_v0  ;;  %v3847_v27 = vmul.f32 %v6696_v25, %v3835_v9  ;;  %v3623_v24 = vmul.f32 %v6672_v22, %v3611_v0 }
 0xcc7   : > { %3602 = vst [vmem:[#allocation2 + $0x31] sm:$0xff] %v3573_v46  ;;  %v3553_v34 = vadd.f32 %v6667_v21, %v3552_v33  ;;  %v3762_v20 = vmul.f32 %v6698_v38, %v3750_v52  ;;  %v3679_v56 = vmul.f32 %v3750_v52, %v6680_v26  ;;  %v3763_v53 = vmul.f32 %v3835_v9, %v6698_v38 }
 0xcc8   : > { %v6716_v36 = vmax.f32 %v3558_v48, 0.0  ;;  %v3714_v29 = vadd.f32 %v3706_v44, %v3686_v2  ;;  %v3659_v1 = vadd.f32 %v3651_v32, %v3623_v24  ;;  %v3820_v4 = vmul.f32 %v6685_v47, %v3573_v46 }
 0xcc9   : > { %v6719_v39 = vmax.f32 %v3553_v34, 0.0  ;;  %v4901_v6 = vpop.f32.mrb[46].mxu1  ;;  %v3680_v60 = vmul.f32 %v3835_v9, %v6680_v26  ;;  %v3660_v63 = vadd.f32 %v3652_v55, %v3624_v58  ;;  %v3736_v11 = vmul.f32 %v6683_v10, %v3573_v46 }
 0xcca   : > { %3605 = vst [vmem:[#allocation2 + $0x61] sm:$0xff] %v6716_v36  ;;  %v3568_v18 = vadd.f32 %v4901_v6, %v6667_v21  ;;  %v3562_v59 = vpop.f32.mrb[47].mxu1  ;;  %v3742_v8 = vadd.f32 %v3734_v43, %v3714_v29  ;;  %v3687_v62 = vadd.f32 %v3679_v56, %v3659_v1  ;;  %v6730_v30 = vmul.f32 %v6685_v47, %v3574_v15 }
 0xccb   : > { %3604 = vst [vmem:[#allocation2 + $0x51] sm:$0xff] %v6719_v39  ;;  %v3563_v50 = vadd.f32 %v6667_v21, %v3562_v59  ;;  %v3653_v35 = vmul.f32 %v6675_v49, %v3573_v46  ;;  %v3737_v45 = vmul.f32 %v6683_v10, %v3574_v15  ;;  %v3688_v2 = vadd.f32 %v3680_v60, %v3660_v63 }
 0xccc   : > { %v6733_v31 = vmax.f32 %v3568_v18, 0.0  ;;  %v3770_v12 = vadd.f32 %v3762_v20, %v3742_v8  ;;  %v3715_v61 = vadd.f32 %v3707_v5, %v3687_v62  ;;  %v6740_v21 = vmul.f32 %v6685_v47, %v6719_v39  ;;  %v6761_v20 = vld [vmem:[%s6902_s13] ss:$0 sm:$0xff] }
 0xccd   : > { %v6736_v41 = vmax.f32 %v3563_v50, 0.0  ;;  %v3781_v19 = vld [vmem:[#allocation2 + $0x40] sm:$0xff]  ;;  %v3654_v55 = vmul.f32 %v6675_v49, %v3574_v15  ;;  %v3738_v52 = vmul.f32 %v6683_v10, %v6719_v39  ;;  %v6748_v32 = vmul.f32 %v6685_v47, %v6716_v36 }
 0xcce   : > { %v3837_v9 = vld [vmem:[#allocation2 + $0x42] sm:$0xff]  ;;  %3607 = vst [vmem:[#allocation2 + $0x81] sm:$0xff] %v6733_v31  ;;  %v3799_v0 = vadd.f32 %v3791_v42, %v3770_v12  ;;  %v3743_v46 = vadd.f32 %v3735_v14, %v3715_v61  ;;  %v3780_v54 = vld [vmem:[#allocation2 + $0x30] sm:$0xff]  ;;  %v3793_v15 = vmul.f32 %v6687_v28, %v3781_v19  ;;  %v3626_v1 = vmul.f32 %v3781_v19, %v6672_v22 }
 0xccf   : > { %v3836_v43 = vld [vmem:[#allocation2 + $0x32] sm:$0xff]  ;;  %3606 = vst [vmem:[#allocation2 + $0x71] sm:$0xff] %v6736_v41  ;;  %v3792_v48 = vmul.f32 %v6687_v28, %v3780_v54  ;;  %v3708_v33 = vmul.f32 %v3780_v54, %v6690_v7  ;;  %v3849_v42 = vmul.f32 %v6696_v25, %v3837_v9  ;;  %v3625_v34 = vmul.f32 %v3780_v54, %v6672_v22 }
 0xcd0   : > { %v3827_v14 = vadd.f32 %v6701_v16, %v3799_v0  ;;  %v3771_v44 = vadd.f32 %v3763_v53, %v3743_v46  ;;  %v3848_v24 = vmul.f32 %v6696_v25, %v3836_v43  ;;  %v3764_v5 = vmul.f32 %v3836_v43, %v6698_v38 }
 0xcd1   : > { %v3716_v56 = vadd.f32 %v3708_v33, %v3688_v2  ;;  %v3681_v29 = vmul.f32 %v3836_v43, %v6680_v26  ;;  %v3661_v16 = vadd.f32 %v3653_v35, %v3625_v34  ;;  %v3709_v53 = vmul.f32 %v3781_v19, %v6690_v7  ;;  %v3783_v46 = vld [vmem:[#allocation2 + $0x60] sm:$0xff] }
 0xcd2   : > { %v3855_v58 = vadd.f32 %v3847_v27, %v3827_v14  ;;  %v3800_v6 = vadd.f32 %v3792_v48, %v3771_v44  ;;  %v3782_v60 = vld [vmem:[#allocation2 + $0x50] sm:$0xff]  ;;  %v3765_v8 = vmul.f32 %v3837_v9, %v6698_v38  ;;  %v3662_v62 = vadd.f32 %v3654_v55, %v3626_v1 }
 0xcd3   : > { %v3838_v18 = vld [vmem:[#allocation2 + $0x52] sm:$0xff]  ;;  %v3744_v59 = vadd.f32 %v3736_v11, %v3716_v56  ;;  %v3682_v63 = vmul.f32 %v3837_v9, %v6680_v26  ;;  %v3689_v61 = vadd.f32 %v3681_v29, %v3661_v16  ;;  %v3710_v2 = vmul.f32 %v3782_v60, %v6690_v7 }
 0xcd4   : > { %v6770_v50 = vadd.f32 %v6761_v20, %v3855_v58  ;;  %v3828_v12 = vadd.f32 %v3820_v4, %v3800_v6  ;;  %v3794_v35 = vmul.f32 %v6687_v28, %v3782_v60  ;;  %v3850_v19 = vmul.f32 %v6696_v25, %v3838_v18  ;;  %v3839_v4 = vld [vmem:[#allocation2 + $0x62] sm:$0xff] }
 0xcd5   : > { %v3772_v27 = vadd.f32 %v3764_v5, %v3744_v59  ;;  %v3690_v0 = vadd.f32 %v3682_v63, %v3662_v62  ;;  %v3717_v54 = vadd.f32 %v3709_v53, %v3689_v61  ;;  %v3766_v9 = vmul.f32 %v3838_v18, %v6698_v38 }
 0xcd6   : > { %v3878_v11 = vmul.f32 %v6770_v50, %v6770_v50  ;;  %v3856_v55 = vadd.f32 %v3848_v24, %v3828_v12  ;;  %v3627_v33 = vmul.f32 %v3782_v60, %v6672_v22  ;;  %v3655_v14 = vmul.f32 %v6675_v49, %v6719_v39  ;;  %v3784_v62 = vld [vmem:[#allocation2 + $0x70] sm:$0xff] }
 0xcd7   : > { %v3801_v43 = vadd.f32 %v3793_v15, %v3772_v27  ;;  %v3718_v48 = vadd.f32 %v3710_v2, %v3690_v0  ;;  %v3745_v56 = vadd.f32 %v3737_v45, %v3717_v54  ;;  %v3795_v5 = vmul.f32 %v6687_v28, %v3783_v46 }
 0xcd8   : > { %v3886_v44 = vmul.f32 %v3878_v11, %v6770_v50  ;;  %v6783_v34 = vadd.f32 %v6761_v20, %v3856_v55  ;;  %v3663_v1 = vadd.f32 %v3655_v14, %v3627_v33  ;;  %v3683_v15 = vmul.f32 %v3838_v18, %v6680_v26 }
 0xcd9   : > { %v3829_v24 = vadd.f32 %v6730_v30, %v3801_v43  ;;  %v3746_v29 = vadd.f32 %v3738_v52, %v3718_v48  ;;  %v3773_v16 = vadd.f32 %v3765_v8, %v3745_v56  ;;  %v3851_v39 = vmul.f32 %v6696_v25, %v3839_v4 }
 0xcda   : > { %v3894_v58 = vmul.f32 0.044715, %v3886_v44  ;;  %v3879_v6 = vmul.f32 %v6783_v34, %v6783_v34  ;;  %v3691_v59 = vadd.f32 %v3683_v15, %v3663_v1  ;;  %v3711_v45 = vmul.f32 %v3783_v46, %v6690_v7 }
 0xcdb   : > { %v3857_v53 = vadd.f32 %v3849_v42, %v3829_v24  ;;  %v3774_v60 = vadd.f32 %v3766_v9, %v3746_v29  ;;  %v3802_v52 = vadd.f32 %v3794_v35, %v3773_v16  ;;  %v3739_v18 = vmul.f32 %v6683_v10, %v6716_v36 }
 0xcdc   : > { %v3902_v63 = vadd.f32 %v3894_v58, %v6770_v50  ;;  %v3887_v30 = vmul.f32 %v3879_v6, %v6783_v34  ;;  %v3719_v61 = vadd.f32 %v3711_v45, %v3691_v59  ;;  %v3767_v42 = vmul.f32 %v3839_v4, %v6698_v38 }
 0xcdd   : > { %v6797_v12 = vadd.f32 %v6761_v20, %v3857_v53  ;;  %v3803_v8 = vadd.f32 %v3795_v5, %v3774_v60  ;;  %v3830_v0 = vadd.f32 %v6740_v21, %v3802_v52  ;;  %v3796_v11 = vmul.f32 %v6687_v28, %v3784_v62 }
 0xcde   : > { %v3910_v2 = vmul.f32 0.7978846, %v3902_v63  ;;  %v3895_v27 = vmul.f32 0.044715, %v3887_v30  ;;  %v3747_v54 = vadd.f32 %v3739_v18, %v3719_v61  ;;  %v3628_v9 = vmul.f32 %v3783_v46, %v6672_v22  ;;  %v3785_v63 = vld [vmem:[#allocation2 + $0x80] sm:$0xff] }
 0xcdf   : > { %v3880_v55 = vmul.f32 %v6797_v12, %v6797_v12  ;;  %v3831_v35 = vadd.f32 %v6748_v32, %v3803_v8  ;;  %v3858_v48 = vadd.f32 %v3850_v19, %v3830_v0  ;;  %v3656_v33 = vmul.f32 %v6675_v49, %v6716_v36  ;;  %v3840_v32 = vld [vmem:[#allocation2 + $0x72] sm:$0xff] }
 0xce0   : > { %5518 = vtanh.f32 %v3910_v2  ;;  %v3903_v43 = vadd.f32 %v3895_v27, %v6783_v34  ;;  %v3775_v44 = vadd.f32 %v3767_v42, %v3747_v54  ;;  %v3684_v56 = vmul.f32 %v3839_v4, %v6680_v26 }
 0xce1   : > { %v3888_v14 = vmul.f32 %v3880_v55, %v6797_v12  ;;  %v3859_v21 = vadd.f32 %v3851_v39, %v3831_v35  ;;  %v6812_v24 = vadd.f32 %v6761_v20, %v3858_v48  ;;  %v3664_v29 = vadd.f32 %v3656_v33, %v3628_v9 }
 0xce2   : > { %v3911_v5 = vmul.f32 0.7978846, %v3903_v43  ;;  %v3712_v46 = vmul.f32 %v3784_v62, %v6690_v7  ;;  %v3804_v15 = vadd.f32 %v3796_v11, %v3775_v44  ;;  %v3824_v36 = vmul.f32 %v6685_v47, %v6736_v41  ;;  %v3841_v43 = vld [vmem:[#allocation2 + $0x82] sm:$0xff] }
 0xce3   : > { %v3896_v1 = vmul.f32 0.044715, %v3888_v14  ;;  %v6816_v19 = vadd.f32 %v6761_v20, %v3859_v21  ;;  %v3881_v4 = vmul.f32 %v6812_v24, %v6812_v24  ;;  %v3692_v58 = vadd.f32 %v3684_v56, %v3664_v29 }
 0xce4   : > { %5520 = vtanh.f32 %v3911_v5  ;;  %v3832_v39 = vadd.f32 %v3824_v36, %v3804_v15  ;;  %v3852_v53 = vmul.f32 %v6696_v25, %v3840_v32  ;;  %v3740_v45 = vmul.f32 %v6683_v10, %v6736_v41 }
 0xce5   : > { %v3904_v6 = vadd.f32 %v3896_v1, %v6797_v12  ;;  %v3882_v16 = vmul.f32 %v6816_v19, %v6816_v19  ;;  %v3889_v60 = vmul.f32 %v3881_v4, %v6812_v24  ;;  %v3720_v59 = vadd.f32 %v3712_v46, %v3692_v58 }
 0xce6   : > { %v3860_v18 = vadd.f32 %v3852_v53, %v3832_v39  ;;  %v3629_v8 = vmul.f32 %v3784_v62, %v6672_v22  ;;  %v3768_v2 = vmul.f32 %v3840_v32, %v6698_v38  ;;  %v3657_v27 = vmul.f32 %v6675_v49, %v6736_v41 }
 0xce7   : > { %v3912_v30 = vmul.f32 0.7978846, %v3904_v6  ;;  %v3890_v52 = vmul.f32 %v3882_v16, %v6816_v19  ;;  %v3897_v61 = vmul.f32 0.044715, %v3889_v60  ;;  %v3748_v42 = vadd.f32 %v3740_v45, %v3720_v59  ;;  %v3814_v16 = vld [vmem:[#allocation2 + $0x91] sm:$0xff] }
 0xce8   : > { %v6835_v11 = vadd.f32 %v6761_v20, %v3860_v18  ;;  %v3797_v55 = vmul.f32 %v6687_v28, %v3785_v63  ;;  %v3665_v22 = vadd.f32 %v3657_v27, %v3629_v8  ;;  %v3685_v62 = vmul.f32 %v3840_v32, %v6680_v26 }
 0xce9   : > { %5522 = vtanh.f32 %v3912_v30  ;;  %v3898_v0 = vmul.f32 0.044715, %v3890_v52  ;;  %v3905_v54 = vadd.f32 %v3897_v61, %v6812_v24  ;;  %v3776_v9 = vadd.f32 %v3768_v2, %v3748_v42 }
 0xcea   : > { %v5519_v35 = vpop.eup %5518  ;;  %v3883_v49 = vmul.f32 %v6835_v11, %v6835_v11  ;;  %v3825_v41 = vmul.f32 %v6685_v47, %v6733_v31  ;;  %v3693_v44 = vadd.f32 %v3685_v62, %v3665_v22  ;;  %v3713_v56 = vmul.f32 %v3785_v63, %v6690_v7  ;;  %v3842_v63 = vld [vmem:[#allocation2 + $0x92] sm:$0xff] }
 0xceb   : > { %v3926_v48 = vadd.f32 1.0, %v5519_v35  ;;  %v3906_v33 = vadd.f32 %v3898_v0, %v6816_v19  ;;  %v3913_v14 = vmul.f32 0.7978846, %v3905_v54  ;;  %v3805_v21 = vadd.f32 %v3797_v55, %v3776_v9 }
 0xcec   : > { %v3891_v46 = vmul.f32 %v3883_v49, %v6835_v11  ;;  %v3853_v26 = vmul.f32 %v6696_v25, %v3841_v43  ;;  %v3721_v15 = vadd.f32 %v3713_v56, %v3693_v44  ;;  %v3741_v36 = vmul.f32 %v6683_v10, %v6733_v31 }
 0xced   : > { %v3934_v5 = vmul.f32 0.5, %v3926_v48  ;;  %v3914_v29 = vmul.f32 0.7978846, %v3906_v33  ;;  %5524 = vtanh.f32 %v3913_v14  ;;  %v3833_v1 = vadd.f32 %v3825_v41, %v3805_v21 }
 0xcee   : > { %v5521_v32 = vpop.eup %5520  ;;  %v3899_v6 = vmul.f32 0.044715, %v3891_v46  ;;  %v3749_v39 = vadd.f32 %v3741_v36, %v3721_v15  ;;  %v3769_v53 = vmul.f32 %v3841_v43, %v6698_v38  ;;  %v3798_v60 = vmul.f32 0.0, %v6687_v28 }
 0xcef   : > { %v3942_v4 = vmul.f32 %v3934_v5, %v6770_v50  ;;  %v3927_v58 = vadd.f32 1.0, %v5521_v32  ;;  %5526 = vtanh.f32 %v3914_v29  ;;  %v3861_v7 = vadd.f32 %v3853_v26, %v3833_v1 }
 0xcf0   : > { %v3907_v45 = vadd.f32 %v3899_v6, %v6835_v11  ;;  %v3777_v10 = vadd.f32 %v3769_v53, %v3749_v39  ;;  %v3826_v31 = vmul.f32 %v6685_v47, %v3814_v16  ;;  %v3854_v38 = vmul.f32 %v6696_v25, %v3842_v63 }
 0xcf1   : > { %4934 = vmatprep.mubr.f32.mxu1 %v3942_v4  ;;  %v3935_v59 = vmul.f32 0.5, %v3927_v58  ;;  %v3876_v30 = vadd.f32 %v6761_v20, %v3861_v7  ;;  %v4332_v4 = vld [vmem:[%s6904_s15] ss:$0 sm:$0xff] }
 0xcf2   : > { %v3915_v18 = vmul.f32 0.7978846, %v3907_v45  ;;  %v3806_v42 = vadd.f32 %v3798_v60, %v3777_v10 }
 0xcf3   : > { %v5523_v50 = vpop.eup %5522  ;;  %v3943_v52 = vmul.f32 %v3935_v59, %v6783_v34  ;;  %v3884_v61 = vmul.f32 %v3876_v30, %v3876_v30 }
 0xcf4   : > { %v3928_v8 = vadd.f32 1.0, %v5523_v50  ;;  %5528 = vtanh.f32 %v3915_v18  ;;  %v3834_v27 = vadd.f32 %v3826_v31, %v3806_v42 }
 0xcf5   : > { %4935 = vmatmul.mubr.f32.vlgmr.msra.gmra.mrb[48].mxu1 %v3943_v52  ;;  %v3892_v2 = vmul.f32 %v3884_v61, %v3876_v30 }
 0xcf6   : > { %v3936_v28 = vmul.f32 0.5, %v3928_v8  ;;  %v3862_v54 = vadd.f32 %v3854_v38, %v3834_v27 }
 0xcf7   : > { %v5525_v0 = vpop.eup %5524  ;;  %v3900_v35 = vmul.f32 0.044715, %v3892_v2 }
 0xcf8   : > { %v3944_v55 = vmul.f32 %v3936_v28, %v6797_v12  ;;  %v3929_v9 = vadd.f32 1.0, %v5525_v0  ;;  %v3877_v22 = vadd.f32 %v6761_v20, %v3862_v54 }
 0xcf9   : > { %v5527_v47 = vpop.eup %5526  ;;  %v3908_v43 = vadd.f32 %v3900_v35, %v3876_v30 }
 0xcfa   : > { %4937 = vmatprep.mubr.f32.mxu1 %v3944_v55  ;;  %v3930_v34 = vadd.f32 1.0, %v5527_v47  ;;  %v3937_v62 = vmul.f32 0.5, %v3929_v9  ;;  %v3885_v33 = vmul.f32 %v3877_v22, %v3877_v22 }
 0xcfb   : > { %v3916_v25 = vmul.f32 0.7978846, %v3908_v43 }
 0xcfc   : > { %v3938_v48 = vmul.f32 0.5, %v3930_v34  ;;  %v3945_v49 = vmul.f32 %v3937_v62, %v6812_v24  ;;  %v3893_v14 = vmul.f32 %v3885_v33, %v3877_v22 }
 0xcfd   : > { %5530 = vtanh.f32 %v3916_v25 }
 0xcfe   : > { %v3946_v41 = vmul.f32 %v3938_v48, %v6816_v19  ;;  %v5529_v12 = vpop.eup %5528  ;;  %4938 = vmatmul.mubr.f32.gmra.mrb[50].mxu1 %v3945_v49  ;;  %v3901_v44 = vmul.f32 0.044715, %v3893_v14 }
 0xcff   : > { %v3931_v21 = vadd.f32 1.0, %v5529_v12 }
 0xd00   : > { %4940 = vmatprep.mubr.f32.mxu1 %v3946_v41  ;;  %v3909_v5 = vadd.f32 %v3901_v44, %v3877_v22 }
 0xd01   : > { %v3939_v56 = vmul.f32 0.5, %v3931_v21 }
 0xd02   : > { %v3917_v20 = vmul.f32 0.7978846, %v3909_v5 }
 0xd03   : > { %v3947_v29 = vmul.f32 %v3939_v56, %v6835_v11 }
 0xd04   : > { %5532 = vtanh.f32 %v3917_v20 }
 0xd05   : > { %4941 = vmatmul.mubr.f32.gmra.mrb[52].mxu1 %v3947_v29 }
 0xd07   : > { %v5531_v46 = vpop.eup %5530 }
 0xd08   : > { %v3932_v26 = vadd.f32 1.0, %v5531_v46 }
 0xd0a   : > { %v3940_v24 = vmul.f32 0.5, %v3932_v26 }
 0xd0c   : > { %v3948_v32 = vmul.f32 %v3940_v24, %v3876_v30 }
 0xd0e   : > { %4943 = vmatprep.mubr.f32.mxu1 %v3948_v32  ;;  %v5533_v19 = vpop.eup %5532 }
 0xd0f   : > { %v3933_v1 = vadd.f32 1.0, %v5533_v19 }
 0xd11   : > { %v3941_v15 = vmul.f32 0.5, %v3933_v1 }
 0xd13   : > { %v3949_v36 = vmul.f32 %v3941_v15, %v3877_v22 }
 0xd15   : > { %4944 = vmatmul.mubr.f32.gmra.mrb[54].mxu1 %v3949_v36 }
 0xdc8   : > { %v4936_v58 = vpop.f32.mrb[48].mxu1 }
 0xdc9   : > { %v4045_v11 = vadd.f32 %v4936_v58, %v4332_v4  ;;  %v4039_v6 = vpop.f32.mrb[49].mxu1 }
 0xdca   : > { %v4040_v16 = vadd.f32 %v4332_v4, %v4039_v6 }
 0xdcb   : > { %v4079_v7 = vadd.f32 %v4045_v11, %v6496_v40 }
 0xdcc   : > { %v4078_v39 = vadd.f32 %v4040_v16, %v6498_v57 }
 0xdcd   : > { %4087 = vst.msk [vmem:[%s541_s20 + $0x8] sm:$0xff] %vm560_vm0, %v4079_v7 }
 0xdce   : > { %4086 = vst.msk [vmem:[%s541_s20] sm:$0xff] %vm560_vm0, %v4078_v39 }
 0xdd1   : > { %v4939_v53 = vpop.f32.mrb[50].mxu1 }
 0xdd2   : > { %v4055_v60 = vadd.f32 %v4939_v53, %v4332_v4  ;;  %v4049_v59 = vpop.f32.mrb[51].mxu1 }
 0xdd3   : > { %v4050_v45 = vadd.f32 %v4332_v4, %v4049_v59 }
 0xdd4   : > { %v4081_v63 = vadd.f32 %v4055_v60, %v6506_v23 }
 0xdd5   : > { %v4080_v30 = vadd.f32 %v4050_v45, %v6511_v37 }
 0xdd6   : > { %4089 = vst.msk [vmem:[%s541_s20 + $0x18] sm:$0xff] %vm560_vm0, %v4081_v63 }
 0xdd7   : > { %4088 = vst.msk [vmem:[%s541_s20 + $0x10] sm:$0xff] %vm560_vm0, %v4080_v30 }
 0xdd8   : > { %v4942_v10 = vpop.f32.mrb[52].mxu1 }
 0xdd9   : > { %v4065_v40 = vadd.f32 %v4942_v10, %v4332_v4  ;;  %v4059_v31 = vpop.f32.mrb[53].mxu1 }
 0xdda   : > { %v4060_v57 = vadd.f32 %v4332_v4, %v4059_v31 }
 0xddb   : > { %v4083_v50 = vadd.f32 %v4065_v40, %v6514_v17 }
 0xddc   : > { %v4082_v52 = vadd.f32 %v4060_v57, %v6519_v3 }
 0xddd   : > { %4091 = vst.msk [vmem:[%s541_s20 + $0x28] sm:$0xff] %vm560_vm0, %v4083_v50 }
 0xdde   : > { %4090 = vst.msk [vmem:[%s541_s20 + $0x20] sm:$0xff] %vm560_vm0, %v4082_v52 }
 0xde8   : > { %v4945_v18 = vpop.f32.mrb[54].mxu1 }
 0xde9   : > { %v4075_v23 = vadd.f32 %v4945_v18, %v4332_v4  ;;  %v4069_v8 = vpop.f32.mrb[55].mxu1 }
 0xdea   : > { %v4070_v37 = vadd.f32 %v4332_v4, %v4069_v8 }
 0xdeb   : > { %v4085_v61 = vadd.f32 %v4075_v23, %v6524_v51 }
 0xdec   : > { %v4084_v42 = vadd.f32 %v4070_v37, %v6528_v13 }
 0xded   : > { %4093 = vst.msk [vmem:[%s541_s20 + $0x38] sm:$0xff] %vm560_vm0, %v4085_v61 }
 0xdee   : > { %4092 = vst.msk [vmem:[%s541_s20 + $0x30] sm:$0xff] %vm560_vm0, %v4084_v42 }
 0xdef PF: > { %s26_s21 = sadd.s32 1, %s5548_s21  }
 0xdf0   : > { %p23_p4 = scmp.ge.s32.totalorder %s26_s21, 4  }
 0xdf2   :  { %25 = sbr.rel (!%p23_p4) target bundleno = 2 (0x2), region = 119 }

</bundles_post_ra>
